<compile_context>
chip_gen: v7x
topology: tpu7x:2x2x1
jax: 0.10.0
libtpu: 0.0.40
codegen_flags: <defaults>
</compile_context>

<pallas_src>
import functools

import jax
import jax.numpy as jnp
from jax.experimental import pallas as pl
from jax.experimental.pallas import tpu as pltpu


# ---------------------------------------------------------------------------
# BlockSpec helpers.  Grid = (batch, n_tile).
# ---------------------------------------------------------------------------
def _tile_spec(shape, tile_n):
    """Array (B, N, ...) -> block (None, tile_n, ...rest), indexed by (b, t)."""
    rest = tuple(shape[2:])
    blk = (None, tile_n) + rest

    def idx(b, t, _r=len(rest)):
        return (b, t) + (0,) * _r

    return pl.BlockSpec(blk, idx)


def _const_spec(shape):
    """Full-array block (weights / biases), same for every grid step."""
    nd = len(shape)

    def idx(b, t, _n=nd):
        return (0,) * _n

    return pl.BlockSpec(tuple(shape), idx)


# ---------------------------------------------------------------------------
# Kernel A: fused LFA.mlp1 (d_in -> d_out//2, BN+ReLU) + LFA.shortcut
#           (d_in -> 2*d_out, BN, no act) -- single MXU pass on shared LHS.
# ---------------------------------------------------------------------------
def _mlp1_shortcut_kernel(feat_ref, w_ref, b_ref, fpc_ref, sc_ref):
    x = feat_ref[...]                                             # (TN, d_in)
    y = jnp.dot(x, w_ref[...], preferred_element_type=jnp.float32) + b_ref[...]
    c1 = fpc_ref.shape[-1]
    fpc_ref[...] = jnp.maximum(y[:, :c1], 0.0)                    # mlp1 (ReLU)
    sc_ref[...] = y[:, c1:]                                       # shortcut


# ---------------------------------------------------------------------------
# Kernel B: Local_Context_Learning stage 1
#   LCL.mlp1 (9 -> C), feature distance, Dualdis_Att_Pool #1
#   (split-weight fc -> softmax over K -> weighted sum -> mlp), LCL.mlp2.
# ---------------------------------------------------------------------------
def _lcl_stage1_kernel(lrep_ref, gdis_ref, fpc_ref, fnbr_ref,
                       w_m1_ref, b_m1_ref,
                       wg1_ref, wf1_ref, wcat1_ref,
                       w_p1_ref, b_p1_ref, w_m2_ref, b_m2_ref,
                       flc1_ref, lrep2_ref):
    TN, K, _ = lrep_ref.shape
    C = w_m1_ref.shape[1]

    # LCL.mlp1: (TN*K, 9) @ (9, C), BN folded, ReLU.
    lrc = jnp.maximum(
        jnp.dot(lrep_ref[...].reshape(TN * K, 9), w_m1_ref[...],
                preferred_element_type=jnp.float32) + b_m1_ref[...], 0.0)
    lrc3 = lrc.reshape(TN, K, C)

    fnbr = fnbr_ref[...]                                          # (TN, K, C)
    f_cat = jnp.concatenate([fnbr, lrc3], axis=-1)                # (TN, K, 2C)

    # feature distance: exp(-mean_c |f - f_neighbours|)
    f_dis = jnp.exp(-jnp.mean(jnp.abs(fpc_ref[...][:, None, :] - fnbr),
                              axis=-1, keepdims=True))            # (TN, K, 1)

    # Dualdis_Att_Pool #1.  fc weight split row-wise at trace time: the two
    # width-1 distance channels become rank-1 broadcast updates (no lane-axis
    # concat); lamda is already folded into wf1.
    logits = (gdis_ref[...] * wg1_ref[...].reshape(1, 1, 2 * C)
              + f_dis * wf1_ref[...].reshape(1, 1, 2 * C)
              + jnp.dot(f_cat.reshape(TN * K, 2 * C), wcat1_ref[...],
                        preferred_element_type=jnp.float32).reshape(TN, K, 2 * C))
    att = jnp.exp(logits - jnp.max(logits, axis=1, keepdims=True))
    att = att * pl.reciprocal(jnp.sum(att, axis=1, keepdims=True), approx=True)
    f_agg = jnp.sum(f_cat * att, axis=1)                          # (TN, 2C)
    flc1_ref[...] = jnp.maximum(
        jnp.dot(f_agg, w_p1_ref[...], preferred_element_type=jnp.float32)
        + b_p1_ref[...], 0.0)                                     # (TN, D//2)

    # LCL.mlp2 on local_rep: C -> D//2, BN folded, ReLU.
    lrep2_ref[...] = jnp.maximum(
        jnp.dot(lrc, w_m2_ref[...], preferred_element_type=jnp.float32)
        + b_m2_ref[...], 0.0).reshape(TN, K, -1)


# ---------------------------------------------------------------------------
# Kernel C: Dualdis_Att_Pool #2 fused with LFA.mlp2, shortcut add,
#           LFA.mlp3 (global context) and LFA.mlp4.
# ---------------------------------------------------------------------------
def _lfa_stage2_kernel(flc1_ref, fnbr_ref, lrep2_ref, gdis_ref,
                       lgv_ref, xyz_ref, sc_ref,
                       wg2_ref, wf2_ref, wcat2_ref,
                       w_p2_ref, b_p2_ref,
                       w_m2lfa_ref, b_m2lfa_ref,
                       w_m3xyz_ref, w_m3v_ref, b_m3_ref,
                       w_m4a_ref, w_m4b_ref, b_m4_ref,
                       out_ref):
    TN, K, Dh = lrep2_ref.shape
    D = 2 * Dh

    fnbr = fnbr_ref[...]                                          # (TN, K, Dh)
    f_cat = jnp.concatenate([fnbr, lrep2_ref[...]], axis=-1)      # (TN, K, D)
    f_dis = jnp.exp(-jnp.mean(jnp.abs(flc1_ref[...][:, None, :] - fnbr),
                              axis=-1, keepdims=True))            # (TN, K, 1)

    # Dualdis_Att_Pool #2 (split-weight attention fc, lamda folded into wf2).
    logits = (gdis_ref[...] * wg2_ref[...].reshape(1, 1, D)
              + f_dis * wf2_ref[...].reshape(1, 1, D)
              + jnp.dot(f_cat.reshape(TN * K, D), wcat2_ref[...],
                        preferred_element_type=jnp.float32).reshape(TN, K, D))
    att = jnp.exp(logits - jnp.max(logits, axis=1, keepdims=True))
    att = att * pl.reciprocal(jnp.sum(att, axis=1, keepdims=True), approx=True)
    f_agg = jnp.sum(f_cat * att, axis=1)                          # (TN, D)
    f_lc = jnp.maximum(
        jnp.dot(f_agg, w_p2_ref[...], preferred_element_type=jnp.float32)
        + b_p2_ref[...], 0.0)                                     # (TN, D)

    # LFA.mlp2 (no activation).
    f_lc2 = jnp.dot(f_lc, w_m2lfa_ref[...],
                    preferred_element_type=jnp.float32) + b_m2lfa_ref[...]

    # Global context mlp3 (no activation): split weight, no lane concat of
    # xyz (3) with lg_volume_ratio (1).
    f_gc = (jnp.dot(xyz_ref[...], w_m3xyz_ref[...],
                    preferred_element_type=jnp.float32)
            + lgv_ref[...] * w_m3v_ref[...] + b_m3_ref[...])      # (TN, 2D)

    # Residual add + mlp4 (split weight instead of 4D-wide lane concat), ReLU.
    f_sum = f_lc2 + sc_ref[...]                                   # (TN, 2D)
    out_ref[...] = jnp.maximum(
        jnp.dot(f_sum, w_m4a_ref[...], preferred_element_type=jnp.float32)
        + jnp.dot(f_gc, w_m4b_ref[...], preferred_element_type=jnp.float32)
        + b_m4_ref[...], 0.0)


# ---------------------------------------------------------------------------
# Plain-JAX glue: neighbor gather + local polar representation (geometry).
# ---------------------------------------------------------------------------
def gather_neighbour(pc, neigh_idx):
    # pc: (B, N, d), neigh_idx: (B, N, K) int32 -> (B, N, K, d)
    B, N, d = pc.shape
    K = neigh_idx.shape[-1]
    idx = neigh_idx.reshape(B, N * K)
    g = jnp.take_along_axis(pc, idx[..., None], axis=1)
    return g.reshape(B, N, K, d)


def local_polar_representation(xyz, neighbor_xyz):
    # xyz: (B, N, 3), neighbor_xyz: (B, N, K, 3)
    xyz_tile = jnp.broadcast_to(xyz[:, :, None, :], neighbor_xyz.shape)
    rel = xyz_tile - neighbor_xyz
    rel_alpha = jnp.arctan2(rel[..., 1], rel[..., 0])
    rel_xydis = jnp.sqrt(rel[..., 0] ** 2 + rel[..., 1] ** 2)
    rel_beta = jnp.arctan2(rel[..., 2], rel_xydis)
    rel_dis = jnp.sqrt(jnp.sum(rel ** 2, axis=-1))                    # (B,N,K)
    relative_info = jnp.concatenate(
        [rel_dis[..., None], xyz_tile, neighbor_xyz], axis=-1)        # (B,N,K,7)
    g_dis = jnp.exp(-rel_dis)[..., None]                              # (B,N,K,1)
    local_volume = jnp.max(rel_dis, axis=-1) ** 3                     # (B,N)

    nbr_mean = jnp.mean(neighbor_xyz, axis=2)                         # (B,N,3)
    direction = xyz - nbr_mean
    dir_alpha = jnp.arctan2(direction[..., 1], direction[..., 0])
    dir_xydis = jnp.sqrt(direction[..., 0] ** 2 + direction[..., 1] ** 2)
    dir_beta = jnp.arctan2(direction[..., 2], dir_xydis)
    angle_alpha = rel_alpha - dir_alpha[:, :, None]
    angle_beta = rel_beta - dir_beta[:, :, None]
    local_rep = jnp.concatenate(
        [angle_alpha[..., None], angle_beta[..., None], relative_info], axis=-1)  # (B,N,K,9)

    global_dis = jnp.sqrt(jnp.sum(xyz ** 2, axis=-1))                 # (B,N)
    global_volume = global_dis ** 3
    # Guard against a point exactly at the origin (torch reference would emit inf).
    lg_volume_ratio = (local_volume / jnp.maximum(global_volume, 1e-12))[..., None]
    return local_rep, g_dis, lg_volume_ratio


# ---------------------------------------------------------------------------
# Deterministic parameter construction (eval-mode BN folded into 1x1 conv).
# ---------------------------------------------------------------------------
def _conv_bn_params(key, c_in, c_out, eps=1e-5):
    k1, k2, k3, k4, k5 = jax.random.split(key, 5)
    w = jax.random.normal(k1, (c_in, c_out), jnp.float32) * 0.1
    gamma = jax.random.uniform(k2, (c_out,), jnp.float32, 0.5, 1.5)
    beta = jax.random.normal(k3, (c_out,), jnp.float32) * 0.1
    mean = jax.random.normal(k4, (c_out,), jnp.float32) * 0.1
    var = jax.random.uniform(k5, (c_out,), jnp.float32, 0.5, 1.5)
    scale = gamma / jnp.sqrt(var + eps)
    w_eff = w * scale[None, :]
    b_eff = (beta - mean * scale).reshape(1, c_out)
    return w_eff, b_eff


def init_lfa_params(key, d_in, d_out):
    C = d_out // 2
    D = d_out
    ks = jax.random.split(key, 11)
    p = {}
    p["mlp1"] = _conv_bn_params(ks[0], d_in, C)             # LFA.mlp1
    p["lcl_mlp1"] = _conv_bn_params(ks[1], 9, C)            # LCL.mlp1
    p["fc1"] = jax.random.normal(ks[2], (2 * C + 2, 2 * C), jnp.float32) * 0.1
    p["pool1_mlp"] = _conv_bn_params(ks[3], 2 * C, D // 2)  # Dualdis #1 mlp
    p["lcl_mlp2"] = _conv_bn_params(ks[4], C, D // 2)       # LCL.mlp2
    p["fc2"] = jax.random.normal(ks[5], (D + 2, D), jnp.float32) * 0.1
    p["pool2_mlp"] = _conv_bn_params(ks[6], D, D)           # Dualdis #2 mlp
    p["mlp2"] = _conv_bn_params(ks[7], D, 2 * D)            # LFA.mlp2 (no act)
    p["shortcut"] = _conv_bn_params(ks[8], d_in, 2 * D)     # LFA.shortcut (no act)
    p["mlp3"] = _conv_bn_params(ks[9], 4, 2 * D)            # LFA.mlp3 (no act)
    p["mlp4"] = _conv_bn_params(ks[10], 4 * D, 2 * D)       # LFA.mlp4
    return p


# ---------------------------------------------------------------------------
# LFA forward pass.
# ---------------------------------------------------------------------------
def lfa_forward(params, feature_nchw, xyz, neigh_idx, lamda, tile_n=None):
    B, d_in, N, _ = feature_nchw.shape
    K = neigh_idx.shape[-1]
    C = params["mlp1"][0].shape[1]     # d_out // 2
    D = 2 * C                          # d_out
    Dh = D // 2                        # == C

    if tile_n is None:
        # v7x-safe default (64 MiB VMEM); bump towards 1024-2048 on v6e/v5e.
        tile_n = min(512, N)
    assert N % tile_n == 0, "N must be divisible by tile_n"
    assert tile_n % 8 == 0 or tile_n == N, "tile_n must be a multiple of 8"
    NT = N // tile_n

    feature = jnp.transpose(feature_nchw[..., 0], (0, 2, 1))       # (B, N, d_in)

    comp = pltpu.CompilerParams(
        dimension_semantics=("parallel", "parallel"),   # shard over v7x's 2 TCs
        vmem_limit_bytes=64 * 1024 * 1024)

    # ---- trace-time weight fusion / splitting ---------------------------
    w1, b1 = params["mlp1"]
    wsc, bsc = params["shortcut"]
    w_a = jnp.concatenate([w1, wsc], axis=1)       # fused mlp1 + shortcut
    b_a = jnp.concatenate([b1, bsc], axis=1)

    w_fc1 = params["fc1"]                          # rows: [g_dis, f_dis, feat]
    wg1, wf1, wcat1 = w_fc1[0:1], lamda * w_fc1[1:2], w_fc1[2:]
    w_fc2 = params["fc2"]
    wg2, wf2, wcat2 = w_fc2[0:1], lamda * w_fc2[1:2], w_fc2[2:]

    w_m3, b_m3 = params["mlp3"]
    w_m3xyz, w_m3v = w_m3[:3], w_m3[3:4]
    w_m4, b_m4 = params["mlp4"]
    w_m4a, w_m4b = w_m4[:2 * D], w_m4[2 * D:]

    # ---- Kernel A: fused mlp1 + shortcut --------------------------------
    f_pc, shortcut = pl.pallas_call(
        _mlp1_shortcut_kernel,
        grid=(B, NT),
        in_specs=[_tile_spec((B, N, d_in), tile_n),
                  _const_spec(w_a.shape), _const_spec(b_a.shape)],
        out_specs=(_tile_spec((B, N, C), tile_n),
                   _tile_spec((B, N, 2 * D), tile_n)),
        out_shape=(jax.ShapeDtypeStruct((B, N, C), jnp.float32),
                   jax.ShapeDtypeStruct((B, N, 2 * D), jnp.float32)),
        compiler_params=comp,
    )(feature, w_a, b_a)

    # ---- JAX glue: neighbor gather + polar geometry ----------------------
    neighbor_xyz = gather_neighbour(xyz, neigh_idx)                # (B,N,K,3)
    local_rep, g_dis, lg_vol = local_polar_representation(xyz, neighbor_xyz)
    # TODO(synk): in-kernel gather of arbitrary rows from a VMEM-resident
    # (N, C) table is not expressible with current Mosaic lowering, so the
    # gathered (B,N,K,C) tensors round-trip HBM between pallas_calls.
    f_pc_nbr = gather_neighbour(f_pc, neigh_idx)                   # (B,N,K,C)

    # ---- Kernel B: LCL stage 1 (mlp1, att-pool #1, mlp2) ------------------
    w_m1, b_m1 = params["lcl_mlp1"]
    w_p1, b_p1 = params["pool1_mlp"]
    w_m2, b_m2 = params["lcl_mlp2"]
    f_lc1, lrep2 = pl.pallas_call(
        _lcl_stage1_kernel,
        grid=(B, NT),
        in_specs=[_tile_spec((B, N, K, 9), tile_n),
                  _tile_spec((B, N, K, 1), tile_n),
                  _tile_spec((B, N, C), tile_n),
                  _tile_spec((B, N, K, C), tile_n),
                  _const_spec(w_m1.shape), _const_spec(b_m1.shape),
                  _const_spec(wg1.shape), _const_spec(wf1.shape),
                  _const_spec(wcat1.shape),
                  _const_spec(w_p1.shape), _const_spec(b_p1.shape),
                  _const_spec(w_m2.shape), _const_spec(b_m2.shape)],
        out_specs=(_tile_spec((B, N, Dh), tile_n),
                   _tile_spec((B, N, K, Dh), tile_n)),
        out_shape=(jax.ShapeDtypeStruct((B, N, Dh), jnp.float32),
                   jax.ShapeDtypeStruct((B, N, K, Dh), jnp.float32)),
        compiler_params=comp,
    )(local_rep, g_dis, f_pc, f_pc_nbr,
      w_m1, b_m1, wg1, wf1, wcat1, w_p1, b_p1, w_m2, b_m2)

    # ---- JAX glue: gather neighbours of f_lc1 -----------------------------
    f_lc1_nbr = gather_neighbour(f_lc1, neigh_idx)                 # (B,N,K,Dh)

    # ---- Kernel C: att-pool #2 + mlp2/mlp3/shortcut/mlp4 ------------------
    w_p2, b_p2 = params["pool2_mlp"]
    w_m2lfa, b_m2lfa = params["mlp2"]
    out = pl.pallas_call(
        _lfa_stage2_kernel,
        grid=(B, NT),
        in_specs=[_tile_spec((B, N, Dh), tile_n),
                  _tile_spec((B, N, K, Dh), tile_n),
                  _tile_spec((B, N, K, Dh), tile_n),
                  _tile_spec((B, N, K, 1), tile_n),
                  _tile_spec((B, N, 1), tile_n),
                  _tile_spec((B, N, 3), tile_n),
                  _tile_spec((B, N, 2 * D), tile_n),
                  _const_spec(wg2.shape), _const_spec(wf2.shape),
                  _const_spec(wcat2.shape),
                  _const_spec(w_p2.shape), _const_spec(b_p2.shape),
                  _const_spec(w_m2lfa.shape), _const_spec(b_m2lfa.shape),
                  _const_spec(w_m3xyz.shape), _const_spec(w_m3v.shape),
                  _const_spec(b_m3.shape),
                  _const_spec(w_m4a.shape), _const_spec(w_m4b.shape),
                  _const_spec(b_m4.shape)],
        out_specs=_tile_spec((B, N, 2 * D), tile_n),
        out_shape=jax.ShapeDtypeStruct((B, N, 2 * D), jnp.float32),
        compiler_params=comp,
    )(f_lc1, f_lc1_nbr, lrep2, g_dis, lg_vol, xyz, shortcut,
      wg2, wf2, wcat2, w_p2, b_p2, w_m2lfa, b_m2lfa,
      w_m3xyz, w_m3v, b_m3, w_m4a, w_m4b, b_m4)

    # back to PyTorch NCHW convention: (B, 2*d_out, N, 1)
    return jnp.transpose(out, (0, 2, 1))[..., None]


# ---------------------------------------------------------------------------
if __name__ == "__main__":
    B, N, K = 2, 16, 8
    d_in, d_out = 8, 16
    lamda = 0.5          # config.lfa_param

    key = jax.random.PRNGKey(0)
    k_feat, k_xyz, k_idx, k_par = jax.random.split(key, 4)
    feature = jax.random.normal(k_feat, (B, d_in, N, 1), jnp.float32)   # NCHW
    xyz = jax.random.normal(k_xyz, (B, N, 3), jnp.float32)
    neigh_idx = jax.random.randint(k_idx, (B, N, K), 0, N, jnp.int32)

    params = init_lfa_params(k_par, d_in, d_out)

    # tile_n=8 -> grid = (B, 2): exercises the N-tiled, multi-step pipeline.
    fwd = jax.jit(functools.partial(lfa_forward, lamda=lamda, tile_n=8))
    out = fwd(params, feature, xyz, neigh_idx)
    out = jax.block_until_ready(out)

    assert out.shape == (B, 2 * d_out, N, 1), out.shape
    assert bool(jnp.all(jnp.isfinite(out)))
    print("KERNEL_OK")
</pallas_src>

<mosaic_0001>
module attributes {stable_mosaic.version = 11 : i64} {
  func.func @_mlp1_shortcut_kernel(%arg0: i32, %arg1: i32, %arg2: memref<1x8x8xf32, #tpu.memory_space<vmem>>, %arg3: memref<8x40xf32, #tpu.memory_space<vmem>>, %arg4: memref<1x40xf32, #tpu.memory_space<vmem>>, %arg5: memref<1x8x8xf32, #tpu.memory_space<vmem>>, %arg6: memref<1x8x32xf32, #tpu.memory_space<vmem>>) attributes {dimension_semantics = [#tpu.dimension_semantics<parallel>, #tpu.dimension_semantics<parallel>], iteration_bounds = array<i64: 2, 2>, scalar_prefetch = 0 : i64, scratch_operands = 0 : i64, tpu.core_type = #tpu.core_type<tc>, window_params = [{transform_indices = @transform_0, window_bounds = array<i64: 1, 8, 8>}, {pipeline_mode = #tpu.pipeline_mode<synchronous>, transform_indices = @transform_1, window_bounds = array<i64: 8, 40>}, {pipeline_mode = #tpu.pipeline_mode<synchronous>, transform_indices = @transform_2, window_bounds = array<i64: 1, 40>}, {transform_indices = @transform_3, window_bounds = array<i64: 1, 8, 8>}, {transform_indices = @transform_4, window_bounds = array<i64: 1, 8, 32>}]} {
    %c0 = arith.constant 0 : index
    %c0_0 = arith.constant 0 : index
    %c0_1 = arith.constant 0 : index
    %0 = vector.load %arg2[%c0, %c0_0, %c0_1] : memref<1x8x8xf32, #tpu.memory_space<vmem>>, vector<1x8x8xf32>
    %1 = vector.shape_cast %0 : vector<1x8x8xf32> to vector<8x8xf32>
    %c0_2 = arith.constant 0 : index
    %c0_3 = arith.constant 0 : index
    %2 = vector.load %arg3[%c0_2, %c0_3] : memref<8x40xf32, #tpu.memory_space<vmem>>, vector<8x40xf32>
    %cst = arith.constant dense<0.000000e+00> : vector<8x40xf32>
    %3 = tpu.matmul %1, %2, %cst {dimension_numbers = #tpu.dot_dimension_numbers<[1], [0], [0], [1], [0, 0, 1, 1], [], []>} : vector<8x8xf32>, vector<8x40xf32>, vector<8x40xf32> -> vector<8x40xf32>
    %c0_4 = arith.constant 0 : index
    %c0_5 = arith.constant 0 : index
    %4 = vector.load %arg4[%c0_4, %c0_5] : memref<1x40xf32, #tpu.memory_space<vmem>>, vector<1x40xf32>
    %5 = vector.broadcast %4 : vector<1x40xf32> to vector<8x40xf32>
    %6 = arith.addf %3, %5 : vector<8x40xf32>
    %7 = vector.extract_strided_slice %6 {offsets = [0, 0], sizes = [8, 8], strides = [1, 1]} : vector<8x40xf32> to vector<8x8xf32>
    %cst_6 = arith.constant 0.000000e+00 : f32
    %8 = vector.broadcast %cst_6 : f32 to vector<8x8xf32>
    %9 = arith.maximumf %7, %8 : vector<8x8xf32>
    %c0_7 = arith.constant 0 : index
    %c0_8 = arith.constant 0 : index
    %c0_9 = arith.constant 0 : index
    %10 = vector.load %arg5[%c0_7, %c0_8, %c0_9] : memref<1x8x8xf32, #tpu.memory_space<vmem>>, vector<1x8x8xf32>
    %11 = vector.shape_cast %10 : vector<1x8x8xf32> to vector<8x8xf32>
    %12 = vector.shape_cast %9 : vector<8x8xf32> to vector<1x8x8xf32>
    tpu.vector_store %arg5[%c0_7, %c0_8, %c0_9], %12 {strides = array<i32>} : memref<1x8x8xf32, #tpu.memory_space<vmem>>, vector<1x8x8xf32>,
    %13 = vector.extract_strided_slice %6 {offsets = [0, 8], sizes = [8, 32], strides = [1, 1]} : vector<8x40xf32> to vector<8x32xf32>
    %c0_10 = arith.constant 0 : index
    %c0_11 = arith.constant 0 : index
    %c0_12 = arith.constant 0 : index
    %14 = vector.load %arg6[%c0_10, %c0_11, %c0_12] : memref<1x8x32xf32, #tpu.memory_space<vmem>>, vector<1x8x32xf32>
    %15 = vector.shape_cast %14 : vector<1x8x32xf32> to vector<8x32xf32>
    %16 = vector.shape_cast %13 : vector<8x32xf32> to vector<1x8x32xf32>
    tpu.vector_store %arg6[%c0_10, %c0_11, %c0_12], %16 {strides = array<i32>} : memref<1x8x32xf32, #tpu.memory_space<vmem>>, vector<1x8x32xf32>,
    return
  }
  func.func @transform_0(%arg0: i32, %arg1: i32) -> (i32, i32, i32) {
    %c0_i32 = arith.constant 0 : i32
    %c0_i32_0 = arith.constant 0 : i32
    return %arg0, %arg1, %c0_i32 : i32, i32, i32
  }
  func.func @transform_1(%arg0: i32, %arg1: i32) -> (i32, i32) {
    %c0_i32 = arith.constant 0 : i32
    %c0_i32_0 = arith.constant 0 : i32
    %c0_i32_1 = arith.constant 0 : i32
    return %c0_i32, %c0_i32_0 : i32, i32
  }
  func.func @transform_2(%arg0: i32, %arg1: i32) -> (i32, i32) {
    %c0_i32 = arith.constant 0 : i32
    %c0_i32_0 = arith.constant 0 : i32
    %c0_i32_1 = arith.constant 0 : i32
    return %c0_i32, %c0_i32_0 : i32, i32
  }
  func.func @transform_3(%arg0: i32, %arg1: i32) -> (i32, i32, i32) {
    %c0_i32 = arith.constant 0 : i32
    %c0_i32_0 = arith.constant 0 : i32
    return %arg0, %arg1, %c0_i32 : i32, i32, i32
  }
  func.func @transform_4(%arg0: i32, %arg1: i32) -> (i32, i32, i32) {
    %c0_i32 = arith.constant 0 : i32
    %c0_i32_0 = arith.constant 0 : i32
    return %arg0, %arg1, %c0_i32 : i32, i32, i32
  }
}

module attributes {stable_mosaic.version = 11 : i64} {
  func.func @_lcl_stage1_kernel(%arg0: i32, %arg1: i32, %arg2: memref<1x8x8x9xf32, #tpu.memory_space<vmem>>, %arg3: memref<1x8x8x1xf32, #tpu.memory_space<vmem>>, %arg4: memref<1x8x8xf32, #tpu.memory_space<vmem>>, %arg5: memref<1x8x8x8xf32, #tpu.memory_space<vmem>>, %arg6: memref<9x8xf32, #tpu.memory_space<vmem>>, %arg7: memref<1x8xf32, #tpu.memory_space<vmem>>, %arg8: memref<1x16xf32, #tpu.memory_space<vmem>>, %arg9: memref<1x16xf32, #tpu.memory_space<vmem>>, %arg10: memref<16x16xf32, #tpu.memory_space<vmem>>, %arg11: memref<16x8xf32, #tpu.memory_space<vmem>>, %arg12: memref<1x8xf32, #tpu.memory_space<vmem>>, %arg13: memref<8x8xf32, #tpu.memory_space<vmem>>, %arg14: memref<1x8xf32, #tpu.memory_space<vmem>>, %arg15: memref<1x8x8xf32, #tpu.memory_space<vmem>>, %arg16: memref<1x8x8x8xf32, #tpu.memory_space<vmem>>) attributes {dimension_semantics = [#tpu.dimension_semantics<parallel>, #tpu.dimension_semantics<parallel>], iteration_bounds = array<i64: 2, 2>, scalar_prefetch = 0 : i64, scratch_operands = 0 : i64, tpu.core_type = #tpu.core_type<tc>, window_params = [{transform_indices = @transform_0, window_bounds = array<i64: 1, 8, 8, 9>}, {transform_indices = @transform_1, window_bounds = array<i64: 1, 8, 8, 1>}, {transform_indices = @transform_2, window_bounds = array<i64: 1, 8, 8>}, {transform_indices = @transform_3, window_bounds = array<i64: 1, 8, 8, 8>}, {pipeline_mode = #tpu.pipeline_mode<synchronous>, transform_indices = @transform_4, window_bounds = array<i64: 9, 8>}, {pipeline_mode = #tpu.pipeline_mode<synchronous>, transform_indices = @transform_5, window_bounds = array<i64: 1, 8>}, {pipeline_mode = #tpu.pipeline_mode<synchronous>, transform_indices = @transform_6, window_bounds = array<i64: 1, 16>}, {pipeline_mode = #tpu.pipeline_mode<synchronous>, transform_indices = @transform_7, window_bounds = array<i64: 1, 16>}, {pipeline_mode = #tpu.pipeline_mode<synchronous>, transform_indices = @transform_8, window_bounds = array<i64: 16, 16>}, {pipeline_mode = #tpu.pipeline_mode<synchronous>, transform_indices = @transform_9, window_bounds = array<i64: 16, 8>}, {pipeline_mode = #tpu.pipeline_mode<synchronous>, transform_indices = @transform_10, window_bounds = array<i64: 1, 8>}, {pipeline_mode = #tpu.pipeline_mode<synchronous>, transform_indices = @transform_11, window_bounds = array<i64: 8, 8>}, {pipeline_mode = #tpu.pipeline_mode<synchronous>, transform_indices = @transform_12, window_bounds = array<i64: 1, 8>}, {transform_indices = @transform_13, window_bounds = array<i64: 1, 8, 8>}, {transform_indices = @transform_14, window_bounds = array<i64: 1, 8, 8, 8>}]} {
    %c0 = arith.constant 0 : index
    %c0_0 = arith.constant 0 : index
    %c0_1 = arith.constant 0 : index
    %c0_2 = arith.constant 0 : index
    %0 = vector.load %arg2[%c0, %c0_0, %c0_1, %c0_2] : memref<1x8x8x9xf32, #tpu.memory_space<vmem>>, vector<1x8x8x9xf32>
    %1 = vector.shape_cast %0 : vector<1x8x8x9xf32> to vector<8x8x9xf32>
    %2 = vector.shape_cast %1 : vector<8x8x9xf32> to vector<64x9xf32>
    %c0_3 = arith.constant 0 : index
    %c0_4 = arith.constant 0 : index
    %3 = vector.load %arg6[%c0_3, %c0_4] : memref<9x8xf32, #tpu.memory_space<vmem>>, vector<9x8xf32>
    %cst = arith.constant dense<0.000000e+00> : vector<64x8xf32>
    %4 = tpu.matmul %2, %3, %cst {dimension_numbers = #tpu.dot_dimension_numbers<[1], [0], [0], [1], [0, 0, 1, 1], [], []>} : vector<64x9xf32>, vector<9x8xf32>, vector<64x8xf32> -> vector<64x8xf32>
    %c0_5 = arith.constant 0 : index
    %c0_6 = arith.constant 0 : index
    %5 = vector.load %arg7[%c0_5, %c0_6] : memref<1x8xf32, #tpu.memory_space<vmem>>, vector<1x8xf32>
    %6 = vector.broadcast %5 : vector<1x8xf32> to vector<64x8xf32>
    %7 = arith.addf %4, %6 : vector<64x8xf32>
    %cst_7 = arith.constant 0.000000e+00 : f32
    %8 = vector.broadcast %cst_7 : f32 to vector<64x8xf32>
    %9 = arith.maximumf %7, %8 : vector<64x8xf32>
    %10 = vector.shape_cast %9 : vector<64x8xf32> to vector<8x8x8xf32>
    %c0_8 = arith.constant 0 : index
    %c0_9 = arith.constant 0 : index
    %c0_10 = arith.constant 0 : index
    %c0_11 = arith.constant 0 : index
    %11 = vector.load %arg5[%c0_8, %c0_9, %c0_10, %c0_11] : memref<1x8x8x8xf32, #tpu.memory_space<vmem>>, vector<1x8x8x8xf32>
    %12 = vector.shape_cast %11 : vector<1x8x8x8xf32> to vector<8x8x8xf32>
    %13 = tpu.concatenate %12, %10 in 2 : vector<8x8x8xf32>, vector<8x8x8xf32> -> vector<8x8x16xf32>
    %c0_12 = arith.constant 0 : index
    %c0_13 = arith.constant 0 : index
    %c0_14 = arith.constant 0 : index
    %14 = vector.load %arg4[%c0_12, %c0_13, %c0_14] : memref<1x8x8xf32, #tpu.memory_space<vmem>>, vector<1x8x8xf32>
    %15 = vector.shape_cast %14 : vector<1x8x8xf32> to vector<8x8xf32>
    %16 = vector.shape_cast %15 : vector<8x8xf32> to vector<8x1x8xf32>
    %17 = vector.broadcast %16 : vector<8x1x8xf32> to vector<8x8x8xf32>
    %18 = arith.subf %17, %12 : vector<8x8x8xf32>
    %19 = math.absf %18 : vector<8x8x8xf32>
    %cst_15 = arith.constant dense<0.000000e+00> : vector<8x8xf32>
    %20 = vector.multi_reduction <add>, %19, %cst_15 [2] : vector<8x8x8xf32> to vector<8x8xf32>
    %21 = vector.shape_cast %20 : vector<8x8xf32> to vector<8x8x1xf32>
    %cst_16 = arith.constant 8.000000e+00 : f32
    %22 = vector.broadcast %cst_16 : f32 to vector<8x8x1xf32>
    %23 = arith.divf %21, %22 : vector<8x8x1xf32>
    %cst_17 = arith.constant 0.000000e+00 : f32
    %24 = vector.broadcast %cst_17 : f32 to vector<8x8x1xf32>
    %25 = arith.subf %24, %23 : vector<8x8x1xf32>
    %26 = math.exp %25 : vector<8x8x1xf32>
    %c0_18 = arith.constant 0 : index
    %c0_19 = arith.constant 0 : index
    %c0_20 = arith.constant 0 : index
    %c0_21 = arith.constant 0 : index
    %27 = vector.load %arg3[%c0_18, %c0_19, %c0_20, %c0_21] : memref<1x8x8x1xf32, #tpu.memory_space<vmem>>, vector<1x8x8x1xf32>
    %28 = vector.shape_cast %27 : vector<1x8x8x1xf32> to vector<8x8x1xf32>
    %c0_22 = arith.constant 0 : index
    %c0_23 = arith.constant 0 : index
    %29 = vector.load %arg8[%c0_22, %c0_23] : memref<1x16xf32, #tpu.memory_space<vmem>>, vector<1x16xf32>
    %30 = vector.shape_cast %29 : vector<1x16xf32> to vector<1x1x16xf32>
    %31 = vector.broadcast %28 : vector<8x8x1xf32> to vector<8x8x16xf32>
    %32 = vector.broadcast %30 : vector<1x1x16xf32> to vector<8x8x16xf32>
    %33 = arith.mulf %31, %32 : vector<8x8x16xf32>
    %c0_24 = arith.constant 0 : index
    %c0_25 = arith.constant 0 : index
    %34 = vector.load %arg9[%c0_24, %c0_25] : memref<1x16xf32, #tpu.memory_space<vmem>>, vector<1x16xf32>
    %35 = vector.shape_cast %34 : vector<1x16xf32> to vector<1x1x16xf32>
    %36 = vector.broadcast %26 : vector<8x8x1xf32> to vector<8x8x16xf32>
    %37 = vector.broadcast %35 : vector<1x1x16xf32> to vector<8x8x16xf32>
    %38 = arith.mulf %36, %37 : vector<8x8x16xf32>
    %39 = arith.addf %33, %38 : vector<8x8x16xf32>
    %40 = vector.shape_cast %13 : vector<8x8x16xf32> to vector<64x16xf32>
    %c0_26 = arith.constant 0 : index
    %c0_27 = arith.constant 0 : index
    %41 = vector.load %arg10[%c0_26, %c0_27] : memref<16x16xf32, #tpu.memory_space<vmem>>, vector<16x16xf32>
    %cst_28 = arith.constant dense<0.000000e+00> : vector<64x16xf32>
    %42 = tpu.matmul %40, %41, %cst_28 {dimension_numbers = #tpu.dot_dimension_numbers<[1], [0], [0], [1], [0, 0, 1, 1], [], []>} : vector<64x16xf32>, vector<16x16xf32>, vector<64x16xf32> -> vector<64x16xf32>
    %43 = vector.shape_cast %42 : vector<64x16xf32> to vector<8x8x16xf32>
    %44 = arith.addf %39, %43 : vector<8x8x16xf32>
    %cst_29 = arith.constant dense<0xFF800000> : vector<8x16xf32>
    %45 = vector.multi_reduction <maximumf>, %44, %cst_29 [1] : vector<8x8x16xf32> to vector<8x16xf32>
    %46 = vector.shape_cast %45 : vector<8x16xf32> to vector<8x1x16xf32>
    %47 = vector.broadcast %46 : vector<8x1x16xf32> to vector<8x8x16xf32>
    %48 = arith.subf %44, %47 : vector<8x8x16xf32>
    %49 = math.exp %48 : vector<8x8x16xf32>
    %cst_30 = arith.constant dense<0.000000e+00> : vector<8x16xf32>
    %50 = vector.multi_reduction <add>, %49, %cst_30 [1] : vector<8x8x16xf32> to vector<8x16xf32>
    %51 = vector.shape_cast %50 : vector<8x16xf32> to vector<8x1x16xf32>
    %52 = tpu.reciprocal %51 {approx = true} : vector<8x1x16xf32> -> vector<8x1x16xf32>
    %53 = vector.broadcast %52 : vector<8x1x16xf32> to vector<8x8x16xf32>
    %54 = arith.mulf %49, %53 : vector<8x8x16xf32>
    %55 = arith.mulf %13, %54 : vector<8x8x16xf32>
    %cst_31 = arith.constant dense<0.000000e+00> : vector<8x16xf32>
    %56 = vector.multi_reduction <add>, %55, %cst_31 [1] : vector<8x8x16xf32> to vector<8x16xf32>
    %c0_32 = arith.constant 0 : index
    %c0_33 = arith.constant 0 : index
    %57 = vector.load %arg11[%c0_32, %c0_33] : memref<16x8xf32, #tpu.memory_space<vmem>>, vector<16x8xf32>
    %cst_34 = arith.constant dense<0.000000e+00> : vector<8x8xf32>
    %58 = tpu.matmul %56, %57, %cst_34 {dimension_numbers = #tpu.dot_dimension_numbers<[1], [0], [0], [1], [0, 0, 1, 1], [], []>} : vector<8x16xf32>, vector<16x8xf32>, vector<8x8xf32> -> vector<8x8xf32>
    %c0_35 = arith.constant 0 : index
    %c0_36 = arith.constant 0 : index
    %59 = vector.load %arg12[%c0_35, %c0_36] : memref<1x8xf32, #tpu.memory_space<vmem>>, vector<1x8xf32>
    %60 = vector.broadcast %59 : vector<1x8xf32> to vector<8x8xf32>
    %61 = arith.addf %58, %60 : vector<8x8xf32>
    %cst_37 = arith.constant 0.000000e+00 : f32
    %62 = vector.broadcast %cst_37 : f32 to vector<8x8xf32>
    %63 = arith.maximumf %61, %62 : vector<8x8xf32>
    %c0_38 = arith.constant 0 : index
    %c0_39 = arith.constant 0 : index
    %c0_40 = arith.constant 0 : index
    %64 = vector.load %arg15[%c0_38, %c0_39, %c0_40] : memref<1x8x8xf32, #tpu.memory_space<vmem>>, vector<1x8x8xf32>
    %65 = vector.shape_cast %64 : vector<1x8x8xf32> to vector<8x8xf32>
    %66 = vector.shape_cast %63 : vector<8x8xf32> to vector<1x8x8xf32>
    tpu.vector_store %arg15[%c0_38, %c0_39, %c0_40], %66 {strides = array<i32>} : memref<1x8x8xf32, #tpu.memory_space<vmem>>, vector<1x8x8xf32>,
    %c0_41 = arith.constant 0 : index
    %c0_42 = arith.constant 0 : index
    %67 = vector.load %arg13[%c0_41, %c0_42] : memref<8x8xf32, #tpu.memory_space<vmem>>, vector<8x8xf32>
    %cst_43 = arith.constant dense<0.000000e+00> : vector<64x8xf32>
    %68 = tpu.matmul %9, %67, %cst_43 {dimension_numbers = #tpu.dot_dimension_numbers<[1], [0], [0], [1], [0, 0, 1, 1], [], []>} : vector<64x8xf32>, vector<8x8xf32>, vector<64x8xf32> -> vector<64x8xf32>
    %c0_44 = arith.constant 0 : index
    %c0_45 = arith.constant 0 : index
    %69 = vector.load %arg14[%c0_44, %c0_45] : memref<1x8xf32, #tpu.memory_space<vmem>>, vector<1x8xf32>
    %70 = vector.broadcast %69 : vector<1x8xf32> to vector<64x8xf32>
    %71 = arith.addf %68, %70 : vector<64x8xf32>
    %cst_46 = arith.constant 0.000000e+00 : f32
    %72 = vector.broadcast %cst_46 : f32 to vector<64x8xf32>
    %73 = arith.maximumf %71, %72 : vector<64x8xf32>
    %74 = vector.shape_cast %73 : vector<64x8xf32> to vector<8x8x8xf32>
    %c0_47 = arith.constant 0 : index
    %c0_48 = arith.constant 0 : index
    %c0_49 = arith.constant 0 : index
    %c0_50 = arith.constant 0 : index
    %75 = vector.load %arg16[%c0_47, %c0_48, %c0_49, %c0_50] : memref<1x8x8x8xf32, #tpu.memory_space<vmem>>, vector<1x8x8x8xf32>
    %76 = vector.shape_cast %75 : vector<1x8x8x8xf32> to vector<8x8x8xf32>
    %77 = vector.shape_cast %74 : vector<8x8x8xf32> to vector<1x8x8x8xf32>
    tpu.vector_store %arg16[%c0_47, %c0_48, %c0_49, %c0_50], %77 {strides = array<i32>} : memref<1x8x8x8xf32, #tpu.memory_space<vmem>>, vector<1x8x8x8xf32>,
    return
  }
  func.func @transform_0(%arg0: i32, %arg1: i32) -> (i32, i32, i32, i32) {
    %c0_i32 = arith.constant 0 : i32
    %c0_i32_0 = arith.constant 0 : i32
    %c0_i32_1 = arith.constant 0 : i32
    return %arg0, %arg1, %c0_i32, %c0_i32_0 : i32, i32, i32, i32
  }
  func.func @transform_1(%arg0: i32, %arg1: i32) -> (i32, i32, i32, i32) {
    %c0_i32 = arith.constant 0 : i32
    %c0_i32_0 = arith.constant 0 : i32
    %c0_i32_1 = arith.constant 0 : i32
    return %arg0, %arg1, %c0_i32, %c0_i32_0 : i32, i32, i32, i32
  }
  func.func @transform_2(%arg0: i32, %arg1: i32) -> (i32, i32, i32) {
    %c0_i32 = arith.constant 0 : i32
    %c0_i32_0 = arith.constant 0 : i32
    return %arg0, %arg1, %c0_i32 : i32, i32, i32
  }
  func.func @transform_3(%arg0: i32, %arg1: i32) -> (i32, i32, i32, i32) {
    %c0_i32 = arith.constant 0 : i32
    %c0_i32_0 = arith.constant 0 : i32
    %c0_i32_1 = arith.constant 0 : i32
    return %arg0, %arg1, %c0_i32, %c0_i32_0 : i32, i32, i32, i32
  }
  func.func @transform_4(%arg0: i32, %arg1: i32) -> (i32, i32) {
    %c0_i32 = arith.constant 0 : i32
    %c0_i32_0 = arith.constant 0 : i32
    %c0_i32_1 = arith.constant 0 : i32
    return %c0_i32, %c0_i32_0 : i32, i32
  }
  func.func @transform_5(%arg0: i32, %arg1: i32) -> (i32, i32) {
    %c0_i32 = arith.constant 0 : i32
    %c0_i32_0 = arith.constant 0 : i32
    %c0_i32_1 = arith.constant 0 : i32
    return %c0_i32, %c0_i32_0 : i32, i32
  }
  func.func @transform_6(%arg0: i32, %arg1: i32) -> (i32, i32) {
    %c0_i32 = arith.constant 0 : i32
    %c0_i32_0 = arith.constant 0 : i32
    %c0_i32_1 = arith.constant 0 : i32
    return %c0_i32, %c0_i32_0 : i32, i32
  }
  func.func @transform_7(%arg0: i32, %arg1: i32) -> (i32, i32) {
    %c0_i32 = arith.constant 0 : i32
    %c0_i32_0 = arith.constant 0 : i32
    %c0_i32_1 = arith.constant 0 : i32
    return %c0_i32, %c0_i32_0 : i32, i32
  }
  func.func @transform_8(%arg0: i32, %arg1: i32) -> (i32, i32) {
    %c0_i32 = arith.constant 0 : i32
    %c0_i32_0 = arith.constant 0 : i32
    %c0_i32_1 = arith.constant 0 : i32
    return %c0_i32, %c0_i32_0 : i32, i32
  }
  func.func @transform_9(%arg0: i32, %arg1: i32) -> (i32, i32) {
    %c0_i32 = arith.constant 0 : i32
    %c0_i32_0 = arith.constant 0 : i32
    %c0_i32_1 = arith.constant 0 : i32
    return %c0_i32, %c0_i32_0 : i32, i32
  }
  func.func @transform_10(%arg0: i32, %arg1: i32) -> (i32, i32) {
    %c0_i32 = arith.constant 0 : i32
    %c0_i32_0 = arith.constant 0 : i32
    %c0_i32_1 = arith.constant 0 : i32
    return %c0_i32, %c0_i32_0 : i32, i32
  }
  func.func @transform_11(%arg0: i32, %arg1: i32) -> (i32, i32) {
    %c0_i32 = arith.constant 0 : i32
    %c0_i32_0 = arith.constant 0 : i32
    %c0_i32_1 = arith.constant 0 : i32
    return %c0_i32, %c0_i32_0 : i32, i32
  }
  func.func @transform_12(%arg0: i32, %arg1: i32) -> (i32, i32) {
    %c0_i32 = arith.constant 0 : i32
    %c0_i32_0 = arith.constant 0 : i32
    %c0_i32_1 = arith.constant 0 : i32
    return %c0_i32, %c0_i32_0 : i32, i32
  }
  func.func @transform_13(%arg0: i32, %arg1: i32) -> (i32, i32, i32) {
    %c0_i32 = arith.constant 0 : i32
    %c0_i32_0 = arith.constant 0 : i32
    return %arg0, %arg1, %c0_i32 : i32, i32, i32
  }
  func.func @transform_14(%arg0: i32, %arg1: i32) -> (i32, i32, i32, i32) {
    %c0_i32 = arith.constant 0 : i32
    %c0_i32_0 = arith.constant 0 : i32
    %c0_i32_1 = arith.constant 0 : i32
    return %arg0, %arg1, %c0_i32, %c0_i32_0 : i32, i32, i32, i32
  }
}

module attributes {stable_mosaic.version = 11 : i64} {
  func.func @_lfa_stage2_kernel(%arg0: i32, %arg1: i32, %arg2: memref<1x8x8xf32, #tpu.memory_space<vmem>>, %arg3: memref<1x8x8x8xf32, #tpu.memory_space<vmem>>, %arg4: memref<1x8x8x8xf32, #tpu.memory_space<vmem>>, %arg5: memref<1x8x8x1xf32, #tpu.memory_space<vmem>>, %arg6: memref<1x8x1xf32, #tpu.memory_space<vmem>>, %arg7: memref<1x8x3xf32, #tpu.memory_space<vmem>>, %arg8: memref<1x8x32xf32, #tpu.memory_space<vmem>>, %arg9: memref<1x16xf32, #tpu.memory_space<vmem>>, %arg10: memref<1x16xf32, #tpu.memory_space<vmem>>, %arg11: memref<16x16xf32, #tpu.memory_space<vmem>>, %arg12: memref<16x16xf32, #tpu.memory_space<vmem>>, %arg13: memref<1x16xf32, #tpu.memory_space<vmem>>, %arg14: memref<16x32xf32, #tpu.memory_space<vmem>>, %arg15: memref<1x32xf32, #tpu.memory_space<vmem>>, %arg16: memref<3x32xf32, #tpu.memory_space<vmem>>, %arg17: memref<1x32xf32, #tpu.memory_space<vmem>>, %arg18: memref<1x32xf32, #tpu.memory_space<vmem>>, %arg19: memref<32x32xf32, #tpu.memory_space<vmem>>, %arg20: memref<32x32xf32, #tpu.memory_space<vmem>>, %arg21: memref<1x32xf32, #tpu.memory_space<vmem>>, %arg22: memref<1x8x32xf32, #tpu.memory_space<vmem>>) attributes {dimension_semantics = [#tpu.dimension_semantics<parallel>, #tpu.dimension_semantics<parallel>], iteration_bounds = array<i64: 2, 2>, scalar_prefetch = 0 : i64, scratch_operands = 0 : i64, tpu.core_type = #tpu.core_type<tc>, window_params = [{transform_indices = @transform_0, window_bounds = array<i64: 1, 8, 8>}, {transform_indices = @transform_1, window_bounds = array<i64: 1, 8, 8, 8>}, {transform_indices = @transform_2, window_bounds = array<i64: 1, 8, 8, 8>}, {transform_indices = @transform_3, window_bounds = array<i64: 1, 8, 8, 1>}, {transform_indices = @transform_4, window_bounds = array<i64: 1, 8, 1>}, {transform_indices = @transform_5, window_bounds = array<i64: 1, 8, 3>}, {transform_indices = @transform_6, window_bounds = array<i64: 1, 8, 32>}, {pipeline_mode = #tpu.pipeline_mode<synchronous>, transform_indices = @transform_7, window_bounds = array<i64: 1, 16>}, {pipeline_mode = #tpu.pipeline_mode<synchronous>, transform_indices = @transform_8, window_bounds = array<i64: 1, 16>}, {pipeline_mode = #tpu.pipeline_mode<synchronous>, transform_indices = @transform_9, window_bounds = array<i64: 16, 16>}, {pipeline_mode = #tpu.pipeline_mode<synchronous>, transform_indices = @transform_10, window_bounds = array<i64: 16, 16>}, {pipeline_mode = #tpu.pipeline_mode<synchronous>, transform_indices = @transform_11, window_bounds = array<i64: 1, 16>}, {pipeline_mode = #tpu.pipeline_mode<synchronous>, transform_indices = @transform_12, window_bounds = array<i64: 16, 32>}, {pipeline_mode = #tpu.pipeline_mode<synchronous>, transform_indices = @transform_13, window_bounds = array<i64: 1, 32>}, {pipeline_mode = #tpu.pipeline_mode<synchronous>, transform_indices = @transform_14, window_bounds = array<i64: 3, 32>}, {pipeline_mode = #tpu.pipeline_mode<synchronous>, transform_indices = @transform_15, window_bounds = array<i64: 1, 32>}, {pipeline_mode = #tpu.pipeline_mode<synchronous>, transform_indices = @transform_16, window_bounds = array<i64: 1, 32>}, {pipeline_mode = #tpu.pipeline_mode<synchronous>, transform_indices = @transform_17, window_bounds = array<i64: 32, 32>}, {pipeline_mode = #tpu.pipeline_mode<synchronous>, transform_indices = @transform_18, window_bounds = array<i64: 32, 32>}, {pipeline_mode = #tpu.pipeline_mode<synchronous>, transform_indices = @transform_19, window_bounds = array<i64: 1, 32>}, {transform_indices = @transform_20, window_bounds = array<i64: 1, 8, 32>}]} {
    %c0 = arith.constant 0 : index
    %c0_0 = arith.constant 0 : index
    %c0_1 = arith.constant 0 : index
    %c0_2 = arith.constant 0 : index
    %0 = vector.load %arg3[%c0, %c0_0, %c0_1, %c0_2] : memref<1x8x8x8xf32, #tpu.memory_space<vmem>>, vector<1x8x8x8xf32>
    %1 = vector.shape_cast %0 : vector<1x8x8x8xf32> to vector<8x8x8xf32>
    %c0_3 = arith.constant 0 : index
    %c0_4 = arith.constant 0 : index
    %c0_5 = arith.constant 0 : index
    %c0_6 = arith.constant 0 : index
    %2 = vector.load %arg4[%c0_3, %c0_4, %c0_5, %c0_6] : memref<1x8x8x8xf32, #tpu.memory_space<vmem>>, vector<1x8x8x8xf32>
    %3 = vector.shape_cast %2 : vector<1x8x8x8xf32> to vector<8x8x8xf32>
    %4 = tpu.concatenate %1, %3 in 2 : vector<8x8x8xf32>, vector<8x8x8xf32> -> vector<8x8x16xf32>
    %c0_7 = arith.constant 0 : index
    %c0_8 = arith.constant 0 : index
    %c0_9 = arith.constant 0 : index
    %5 = vector.load %arg2[%c0_7, %c0_8, %c0_9] : memref<1x8x8xf32, #tpu.memory_space<vmem>>, vector<1x8x8xf32>
    %6 = vector.shape_cast %5 : vector<1x8x8xf32> to vector<8x8xf32>
    %7 = vector.shape_cast %6 : vector<8x8xf32> to vector<8x1x8xf32>
    %8 = vector.broadcast %7 : vector<8x1x8xf32> to vector<8x8x8xf32>
    %9 = arith.subf %8, %1 : vector<8x8x8xf32>
    %10 = math.absf %9 : vector<8x8x8xf32>
    %cst = arith.constant dense<0.000000e+00> : vector<8x8xf32>
    %11 = vector.multi_reduction <add>, %10, %cst [2] : vector<8x8x8xf32> to vector<8x8xf32>
    %12 = vector.shape_cast %11 : vector<8x8xf32> to vector<8x8x1xf32>
    %cst_10 = arith.constant 8.000000e+00 : f32
    %13 = vector.broadcast %cst_10 : f32 to vector<8x8x1xf32>
    %14 = arith.divf %12, %13 : vector<8x8x1xf32>
    %cst_11 = arith.constant 0.000000e+00 : f32
    %15 = vector.broadcast %cst_11 : f32 to vector<8x8x1xf32>
    %16 = arith.subf %15, %14 : vector<8x8x1xf32>
    %17 = math.exp %16 : vector<8x8x1xf32>
    %c0_12 = arith.constant 0 : index
    %c0_13 = arith.constant 0 : index
    %c0_14 = arith.constant 0 : index
    %c0_15 = arith.constant 0 : index
    %18 = vector.load %arg5[%c0_12, %c0_13, %c0_14, %c0_15] : memref<1x8x8x1xf32, #tpu.memory_space<vmem>>, vector<1x8x8x1xf32>
    %19 = vector.shape_cast %18 : vector<1x8x8x1xf32> to vector<8x8x1xf32>
    %c0_16 = arith.constant 0 : index
    %c0_17 = arith.constant 0 : index
    %20 = vector.load %arg9[%c0_16, %c0_17] : memref<1x16xf32, #tpu.memory_space<vmem>>, vector<1x16xf32>
    %21 = vector.shape_cast %20 : vector<1x16xf32> to vector<1x1x16xf32>
    %22 = vector.broadcast %19 : vector<8x8x1xf32> to vector<8x8x16xf32>
    %23 = vector.broadcast %21 : vector<1x1x16xf32> to vector<8x8x16xf32>
    %24 = arith.mulf %22, %23 : vector<8x8x16xf32>
    %c0_18 = arith.constant 0 : index
    %c0_19 = arith.constant 0 : index
    %25 = vector.load %arg10[%c0_18, %c0_19] : memref<1x16xf32, #tpu.memory_space<vmem>>, vector<1x16xf32>
    %26 = vector.shape_cast %25 : vector<1x16xf32> to vector<1x1x16xf32>
    %27 = vector.broadcast %17 : vector<8x8x1xf32> to vector<8x8x16xf32>
    %28 = vector.broadcast %26 : vector<1x1x16xf32> to vector<8x8x16xf32>
    %29 = arith.mulf %27, %28 : vector<8x8x16xf32>
    %30 = arith.addf %24, %29 : vector<8x8x16xf32>
    %31 = vector.shape_cast %4 : vector<8x8x16xf32> to vector<64x16xf32>
    %c0_20 = arith.constant 0 : index
    %c0_21 = arith.constant 0 : index
    %32 = vector.load %arg11[%c0_20, %c0_21] : memref<16x16xf32, #tpu.memory_space<vmem>>, vector<16x16xf32>
    %cst_22 = arith.constant dense<0.000000e+00> : vector<64x16xf32>
    %33 = tpu.matmul %31, %32, %cst_22 {dimension_numbers = #tpu.dot_dimension_numbers<[1], [0], [0], [1], [0, 0, 1, 1], [], []>} : vector<64x16xf32>, vector<16x16xf32>, vector<64x16xf32> -> vector<64x16xf32>
    %34 = vector.shape_cast %33 : vector<64x16xf32> to vector<8x8x16xf32>
    %35 = arith.addf %30, %34 : vector<8x8x16xf32>
    %cst_23 = arith.constant dense<0xFF800000> : vector<8x16xf32>
    %36 = vector.multi_reduction <maximumf>, %35, %cst_23 [1] : vector<8x8x16xf32> to vector<8x16xf32>
    %37 = vector.shape_cast %36 : vector<8x16xf32> to vector<8x1x16xf32>
    %38 = vector.broadcast %37 : vector<8x1x16xf32> to vector<8x8x16xf32>
    %39 = arith.subf %35, %38 : vector<8x8x16xf32>
    %40 = math.exp %39 : vector<8x8x16xf32>
    %cst_24 = arith.constant dense<0.000000e+00> : vector<8x16xf32>
    %41 = vector.multi_reduction <add>, %40, %cst_24 [1] : vector<8x8x16xf32> to vector<8x16xf32>
    %42 = vector.shape_cast %41 : vector<8x16xf32> to vector<8x1x16xf32>
    %43 = tpu.reciprocal %42 {approx = true} : vector<8x1x16xf32> -> vector<8x1x16xf32>
    %44 = vector.broadcast %43 : vector<8x1x16xf32> to vector<8x8x16xf32>
    %45 = arith.mulf %40, %44 : vector<8x8x16xf32>
    %46 = arith.mulf %4, %45 : vector<8x8x16xf32>
    %cst_25 = arith.constant dense<0.000000e+00> : vector<8x16xf32>
    %47 = vector.multi_reduction <add>, %46, %cst_25 [1] : vector<8x8x16xf32> to vector<8x16xf32>
    %c0_26 = arith.constant 0 : index
    %c0_27 = arith.constant 0 : index
    %48 = vector.load %arg12[%c0_26, %c0_27] : memref<16x16xf32, #tpu.memory_space<vmem>>, vector<16x16xf32>
    %cst_28 = arith.constant dense<0.000000e+00> : vector<8x16xf32>
    %49 = tpu.matmul %47, %48, %cst_28 {dimension_numbers = #tpu.dot_dimension_numbers<[1], [0], [0], [1], [0, 0, 1, 1], [], []>} : vector<8x16xf32>, vector<16x16xf32>, vector<8x16xf32> -> vector<8x16xf32>
    %c0_29 = arith.constant 0 : index
    %c0_30 = arith.constant 0 : index
    %50 = vector.load %arg13[%c0_29, %c0_30] : memref<1x16xf32, #tpu.memory_space<vmem>>, vector<1x16xf32>
    %51 = vector.broadcast %50 : vector<1x16xf32> to vector<8x16xf32>
    %52 = arith.addf %49, %51 : vector<8x16xf32>
    %cst_31 = arith.constant 0.000000e+00 : f32
    %53 = vector.broadcast %cst_31 : f32 to vector<8x16xf32>
    %54 = arith.maximumf %52, %53 : vector<8x16xf32>
    %c0_32 = arith.constant 0 : index
    %c0_33 = arith.constant 0 : index
    %55 = vector.load %arg14[%c0_32, %c0_33] : memref<16x32xf32, #tpu.memory_space<vmem>>, vector<16x32xf32>
    %cst_34 = arith.constant dense<0.000000e+00> : vector<8x32xf32>
    %56 = tpu.matmul %54, %55, %cst_34 {dimension_numbers = #tpu.dot_dimension_numbers<[1], [0], [0], [1], [0, 0, 1, 1], [], []>} : vector<8x16xf32>, vector<16x32xf32>, vector<8x32xf32> -> vector<8x32xf32>
    %c0_35 = arith.constant 0 : index
    %c0_36 = arith.constant 0 : index
    %57 = vector.load %arg15[%c0_35, %c0_36] : memref<1x32xf32, #tpu.memory_space<vmem>>, vector<1x32xf32>
    %58 = vector.broadcast %57 : vector<1x32xf32> to vector<8x32xf32>
    %59 = arith.addf %56, %58 : vector<8x32xf32>
    %c0_37 = arith.constant 0 : index
    %c0_38 = arith.constant 0 : index
    %c0_39 = arith.constant 0 : index
    %60 = vector.load %arg7[%c0_37, %c0_38, %c0_39] : memref<1x8x3xf32, #tpu.memory_space<vmem>>, vector<1x8x3xf32>
    %61 = vector.shape_cast %60 : vector<1x8x3xf32> to vector<8x3xf32>
    %c0_40 = arith.constant 0 : index
    %c0_41 = arith.constant 0 : index
    %62 = vector.load %arg16[%c0_40, %c0_41] : memref<3x32xf32, #tpu.memory_space<vmem>>, vector<3x32xf32>
    %cst_42 = arith.constant dense<0.000000e+00> : vector<8x32xf32>
    %63 = tpu.matmul %61, %62, %cst_42 {dimension_numbers = #tpu.dot_dimension_numbers<[1], [0], [0], [1], [0, 0, 1, 1], [], []>} : vector<8x3xf32>, vector<3x32xf32>, vector<8x32xf32> -> vector<8x32xf32>
    %c0_43 = arith.constant 0 : index
    %c0_44 = arith.constant 0 : index
    %c0_45 = arith.constant 0 : index
    %64 = vector.load %arg6[%c0_43, %c0_44, %c0_45] : memref<1x8x1xf32, #tpu.memory_space<vmem>>, vector<1x8x1xf32>
    %65 = vector.shape_cast %64 : vector<1x8x1xf32> to vector<8x1xf32>
    %c0_46 = arith.constant 0 : index
    %c0_47 = arith.constant 0 : index
    %66 = vector.load %arg17[%c0_46, %c0_47] : memref<1x32xf32, #tpu.memory_space<vmem>>, vector<1x32xf32>
    %67 = vector.broadcast %65 : vector<8x1xf32> to vector<8x32xf32>
    %68 = vector.broadcast %66 : vector<1x32xf32> to vector<8x32xf32>
    %69 = arith.mulf %67, %68 : vector<8x32xf32>
    %70 = arith.addf %63, %69 : vector<8x32xf32>
    %c0_48 = arith.constant 0 : index
    %c0_49 = arith.constant 0 : index
    %71 = vector.load %arg18[%c0_48, %c0_49] : memref<1x32xf32, #tpu.memory_space<vmem>>, vector<1x32xf32>
    %72 = vector.broadcast %71 : vector<1x32xf32> to vector<8x32xf32>
    %73 = arith.addf %70, %72 : vector<8x32xf32>
    %c0_50 = arith.constant 0 : index
    %c0_51 = arith.constant 0 : index
    %c0_52 = arith.constant 0 : index
    %74 = vector.load %arg8[%c0_50, %c0_51, %c0_52] : memref<1x8x32xf32, #tpu.memory_space<vmem>>, vector<1x8x32xf32>
    %75 = vector.shape_cast %74 : vector<1x8x32xf32> to vector<8x32xf32>
    %76 = arith.addf %59, %75 : vector<8x32xf32>
    %c0_53 = arith.constant 0 : index
    %c0_54 = arith.constant 0 : index
    %77 = vector.load %arg19[%c0_53, %c0_54] : memref<32x32xf32, #tpu.memory_space<vmem>>, vector<32x32xf32>
    %cst_55 = arith.constant dense<0.000000e+00> : vector<8x32xf32>
    %78 = tpu.matmul %76, %77, %cst_55 {dimension_numbers = #tpu.dot_dimension_numbers<[1], [0], [0], [1], [0, 0, 1, 1], [], []>} : vector<8x32xf32>, vector<32x32xf32>, vector<8x32xf32> -> vector<8x32xf32>
    %c0_56 = arith.constant 0 : index
    %c0_57 = arith.constant 0 : index
    %79 = vector.load %arg20[%c0_56, %c0_57] : memref<32x32xf32, #tpu.memory_space<vmem>>, vector<32x32xf32>
    %cst_58 = arith.constant dense<0.000000e+00> : vector<8x32xf32>
    %80 = tpu.matmul %73, %79, %cst_58 {dimension_numbers = #tpu.dot_dimension_numbers<[1], [0], [0], [1], [0, 0, 1, 1], [], []>} : vector<8x32xf32>, vector<32x32xf32>, vector<8x32xf32> -> vector<8x32xf32>
    %81 = arith.addf %78, %80 : vector<8x32xf32>
    %c0_59 = arith.constant 0 : index
    %c0_60 = arith.constant 0 : index
    %82 = vector.load %arg21[%c0_59, %c0_60] : memref<1x32xf32, #tpu.memory_space<vmem>>, vector<1x32xf32>
    %83 = vector.broadcast %82 : vector<1x32xf32> to vector<8x32xf32>
    %84 = arith.addf %81, %83 : vector<8x32xf32>
    %cst_61 = arith.constant 0.000000e+00 : f32
    %85 = vector.broadcast %cst_61 : f32 to vector<8x32xf32>
    %86 = arith.maximumf %84, %85 : vector<8x32xf32>
    %c0_62 = arith.constant 0 : index
    %c0_63 = arith.constant 0 : index
    %c0_64 = arith.constant 0 : index
    %87 = vector.load %arg22[%c0_62, %c0_63, %c0_64] : memref<1x8x32xf32, #tpu.memory_space<vmem>>, vector<1x8x32xf32>
    %88 = vector.shape_cast %87 : vector<1x8x32xf32> to vector<8x32xf32>
    %89 = vector.shape_cast %86 : vector<8x32xf32> to vector<1x8x32xf32>
    tpu.vector_store %arg22[%c0_62, %c0_63, %c0_64], %89 {strides = array<i32>} : memref<1x8x32xf32, #tpu.memory_space<vmem>>, vector<1x8x32xf32>,
    return
  }
  func.func @transform_0(%arg0: i32, %arg1: i32) -> (i32, i32, i32) {
    %c0_i32 = arith.constant 0 : i32
    %c0_i32_0 = arith.constant 0 : i32
    return %arg0, %arg1, %c0_i32 : i32, i32, i32
  }
  func.func @transform_1(%arg0: i32, %arg1: i32) -> (i32, i32, i32, i32) {
    %c0_i32 = arith.constant 0 : i32
    %c0_i32_0 = arith.constant 0 : i32
    %c0_i32_1 = arith.constant 0 : i32
    return %arg0, %arg1, %c0_i32, %c0_i32_0 : i32, i32, i32, i32
  }
  func.func @transform_2(%arg0: i32, %arg1: i32) -> (i32, i32, i32, i32) {
    %c0_i32 = arith.constant 0 : i32
    %c0_i32_0 = arith.constant 0 : i32
    %c0_i32_1 = arith.constant 0 : i32
    return %arg0, %arg1, %c0_i32, %c0_i32_0 : i32, i32, i32, i32
  }
  func.func @transform_3(%arg0: i32, %arg1: i32) -> (i32, i32, i32, i32) {
    %c0_i32 = arith.constant 0 : i32
    %c0_i32_0 = arith.constant 0 : i32
    %c0_i32_1 = arith.constant 0 : i32
    return %arg0, %arg1, %c0_i32, %c0_i32_0 : i32, i32, i32, i32
  }
  func.func @transform_4(%arg0: i32, %arg1: i32) -> (i32, i32, i32) {
    %c0_i32 = arith.constant 0 : i32
    %c0_i32_0 = arith.constant 0 : i32
    return %arg0, %arg1, %c0_i32 : i32, i32, i32
  }
  func.func @transform_5(%arg0: i32, %arg1: i32) -> (i32, i32, i32) {
    %c0_i32 = arith.constant 0 : i32
    %c0_i32_0 = arith.constant 0 : i32
    return %arg0, %arg1, %c0_i32 : i32, i32, i32
  }
  func.func @transform_6(%arg0: i32, %arg1: i32) -> (i32, i32, i32) {
    %c0_i32 = arith.constant 0 : i32
    %c0_i32_0 = arith.constant 0 : i32
    return %arg0, %arg1, %c0_i32 : i32, i32, i32
  }
  func.func @transform_7(%arg0: i32, %arg1: i32) -> (i32, i32) {
    %c0_i32 = arith.constant 0 : i32
    %c0_i32_0 = arith.constant 0 : i32
    %c0_i32_1 = arith.constant 0 : i32
    return %c0_i32, %c0_i32_0 : i32, i32
  }
  func.func @transform_8(%arg0: i32, %arg1: i32) -> (i32, i32) {
    %c0_i32 = arith.constant 0 : i32
    %c0_i32_0 = arith.constant 0 : i32
    %c0_i32_1 = arith.constant 0 : i32
    return %c0_i32, %c0_i32_0 : i32, i32
  }
  func.func @transform_9(%arg0: i32, %arg1: i32) -> (i32, i32) {
    %c0_i32 = arith.constant 0 : i32
    %c0_i32_0 = arith.constant 0 : i32
    %c0_i32_1 = arith.constant 0 : i32
    return %c0_i32, %c0_i32_0 : i32, i32
  }
  func.func @transform_10(%arg0: i32, %arg1: i32) -> (i32, i32) {
    %c0_i32 = arith.constant 0 : i32
    %c0_i32_0 = arith.constant 0 : i32
    %c0_i32_1 = arith.constant 0 : i32
    return %c0_i32, %c0_i32_0 : i32, i32
  }
  func.func @transform_11(%arg0: i32, %arg1: i32) -> (i32, i32) {
    %c0_i32 = arith.constant 0 : i32
    %c0_i32_0 = arith.constant 0 : i32
    %c0_i32_1 = arith.constant 0 : i32
    return %c0_i32, %c0_i32_0 : i32, i32
  }
  func.func @transform_12(%arg0: i32, %arg1: i32) -> (i32, i32) {
    %c0_i32 = arith.constant 0 : i32
    %c0_i32_0 = arith.constant 0 : i32
    %c0_i32_1 = arith.constant 0 : i32
    return %c0_i32, %c0_i32_0 : i32, i32
  }
  func.func @transform_13(%arg0: i32, %arg1: i32) -> (i32, i32) {
    %c0_i32 = arith.constant 0 : i32
    %c0_i32_0 = arith.constant 0 : i32
    %c0_i32_1 = arith.constant 0 : i32
    return %c0_i32, %c0_i32_0 : i32, i32
  }
  func.func @transform_14(%arg0: i32, %arg1: i32) -> (i32, i32) {
    %c0_i32 = arith.constant 0 : i32
    %c0_i32_0 = arith.constant 0 : i32
    %c0_i32_1 = arith.constant 0 : i32
    return %c0_i32, %c0_i32_0 : i32, i32
  }
  func.func @transform_15(%arg0: i32, %arg1: i32) -> (i32, i32) {
    %c0_i32 = arith.constant 0 : i32
    %c0_i32_0 = arith.constant 0 : i32
    %c0_i32_1 = arith.constant 0 : i32
    return %c0_i32, %c0_i32_0 : i32, i32
  }
  func.func @transform_16(%arg0: i32, %arg1: i32) -> (i32, i32) {
    %c0_i32 = arith.constant 0 : i32
    %c0_i32_0 = arith.constant 0 : i32
    %c0_i32_1 = arith.constant 0 : i32
    return %c0_i32, %c0_i32_0 : i32, i32
  }
  func.func @transform_17(%arg0: i32, %arg1: i32) -> (i32, i32) {
    %c0_i32 = arith.constant 0 : i32
    %c0_i32_0 = arith.constant 0 : i32
    %c0_i32_1 = arith.constant 0 : i32
    return %c0_i32, %c0_i32_0 : i32, i32
  }
  func.func @transform_18(%arg0: i32, %arg1: i32) -> (i32, i32) {
    %c0_i32 = arith.constant 0 : i32
    %c0_i32_0 = arith.constant 0 : i32
    %c0_i32_1 = arith.constant 0 : i32
    return %c0_i32, %c0_i32_0 : i32, i32
  }
  func.func @transform_19(%arg0: i32, %arg1: i32) -> (i32, i32) {
    %c0_i32 = arith.constant 0 : i32
    %c0_i32_0 = arith.constant 0 : i32
    %c0_i32_1 = arith.constant 0 : i32
    return %c0_i32, %c0_i32_0 : i32, i32
  }
  func.func @transform_20(%arg0: i32, %arg1: i32) -> (i32, i32, i32) {
    %c0_i32 = arith.constant 0 : i32
    %c0_i32_0 = arith.constant 0 : i32
    return %arg0, %arg1, %c0_i32 : i32, i32, i32
  }
}

</mosaic_0001>

<bundles_post_ra>
// kernel: lfa_forward.3
= control target key start
LH: loop header
LB: loop body
LE: loop exit
PB: predicated region body
PF: predicated region fallthrough
CT: control target
= control target key end

     0   :  { %s1241_s0 = inlined_call_operand.hbm [shape: f32[2,16,8], index: 0, kind: input, shape index: {}]   ;;  %s1242_s1 = inlined_call_operand.hbm [shape: f32[8,40], index: 1, kind: input, shape index: {}]   ;;  %s1243_s2 = inlined_call_operand.hbm [shape: f32[1,40], index: 2, kind: input, shape index: {}]   ;;  %s1244_s3 = inlined_call_operand.hbm [shape: f32[2,16,8], index: 3, kind: output, shape index: {0}]   ;;  %s1245_s4 = inlined_call_operand.hbm [shape: f32[2,16,32], index: 4, kind: output, shape index: {1}]  }
   0x1   :  { %1253 = sst [smem:[#allocation18_spill]] %s1242_s1 }
   0x2   :  { %1254 = sst [smem:[#allocation19_spill]] %s1243_s2 }
   0x3   :  { %10 = vsyncpa [#allocation3], 0 }
   0x4   :  { %12 = vsyncpa [#allocation3 + $0x1], 0 }
   0x5   :  { %13 = vsyncpa [#allocation6], 0 }
   0x6   :  { %14 = vsyncpa [#allocation4], 0 }
   0x7   :  { %16 = vsyncpa [#allocation4 + $0x1], 0 }
   0x8   :  { %17 = vsyncpa [#allocation10], 0 }
   0x9   :  { %19 = vsyncpa [#allocation10 + $0x1], 0  ;;  %s928_s15 = smov 0   ;;  %s930_s16 = smov 0  }
   0xa   :  { %s932_s17 = smov 0   ;;  %s934_s18 = smov 0  }
   0xb   :  { %s936_s19 = smov 0   ;;  %s938_s20 = smov 0  }
   0xc   :  { %s940_s21 = smov 0   ;;  %s942_s22 = smov 0  }
   0xd LB: > { %1255 = sst [smem:[#allocation15_spill]] %s865_s15  ;;  %s534_s23 = sadd.s32 4294967295, %s893_s22   ;;  %s893_s22 = sphi %s942_s22, %s25_s22   ;;  %s889_s21 = sphi %s940_s21, %s1281_s21   ;;  %s885_s20 = sphi %s938_s20, %s1280_s20   ;;  %s881_s19 = sphi %s936_s19, %s1279_s19   ;;  %s877_s18 = sphi %s934_s18, %s1278_s18   ;;  %s873_s17 = sphi %s932_s17, %s1277_s17   ;;  %s869_s16 = sphi %s930_s16, %s1276_s16   ;;  %s865_s15 = sphi %s928_s15, %s1275_s15  }
   0xe   : > { %s535_s24 = sadd.s32 4294967294, %s893_s22   ;;  %p59_p0 = scmp.ne.s32.totalorder %s869_s16, %s865_s15 }
   0xf   : > { %p974_p1 = scmp.eq.s32.totalorder %s534_s23, 0  ;;  %p133_p2 = scmp.eq.s32.totalorder %s535_s24, 3 }
  0x10   : > { %p536_p4 = scmp.ge.s32.totalorder %s893_s22, 1  ;;  %p168_p6 = scmp.lt.s32.totalorder %s893_s22, 5 }
  0x11   : > { %s1256_s25 = scalar_select %p974_p1, 1, 0 }
  0x12   : > { %p980_p3 = por %p974_p1, %p59_p0  ;;  %p985_p5 = por %p133_p2, %p59_p0 }
  0x13   : > { %p990_p7 = pnand %p536_p4, %p168_p6  ;;  %s895_s29 = smov [#allocation5]  }
  0x14   : > { %s1257_s26 = scalar_select %p980_p3, 1, 0 }
  0x15   : > { %s1258_s27 = scalar_select %p985_p5, 1, 0 }
  0x16   : > { %s1260_s28 = scalar_select %p990_p7, 1, 0 }
  0x17   : > { %1259 = sst [smem:[#allocation16_spill]] %s1258_s27  ;;  %s181_s30 = sshll.u32 %s895_s29, 4  ;;  %s182_s30 = int_to_ptr.vmem [resolvable:$true] %s181_s30 }
  0x18   : > { %p580_p8 = pneg %p990_p7  ;;  %s896_s5 = smov [#allocation7]  }
  0x19   : > { %s192_s6 = sshll.u32 %s896_s5, 4  ;;  %s1262_s1 = sld [smem:[#allocation18_spill]]  ;;  %s1002_s6 = int_to_ptr.vmem [resolvable:$true] %s192_s6 }
  0x1a   : > { %p998_p9 = pnand %p580_p8, %p974_p1 }
  0x1c   : > { %p675_p11 = pneg %p998_p9 }
  0x1f   : > { %s673_s10 = scalar_lea.hbm %s1262_s1, 128 }
  0x20   : > { %p674_p10 = scmp.ne.s32.totalorder %s1262_s1, %s673_s10  ;;  %p680_p0 = scmp.lt.u32.totalorder %s673_s10, %s1262_s1 }
  0x22   : > { %p676_p12 = pnand %p675_p11, %p674_p10 }
  0x24   : > { %p677_p13 = pneg %p676_p12 }
  0x26   : > { %p682_p2 = pnand %p680_p0, %p677_p13 }
  0x28   : > { %685 = shalt.err (!%p682_p2)
}
  0x29   : > { %s686_s24 = scalar_lea.vmem %s182_s30, 128  ;;  %p694_p5 = scmp.lt.s32.totalorder %s182_s30, %s182_s30 }
  0x2a   : > { %p687_p4 = scmp.ne.s32.totalorder %s182_s30, %s686_s24  ;;  %p695_p1 = scmp.lt.s32.totalorder %s686_s24, %s686_s24 }
  0x2c   : > { %p689_p6 = pnand %p687_p4, %p675_p11  ;;  %p696_p3 = por %p695_p1, %p694_p5 }
  0x2e   : > { %p690_p8 = pneg %p689_p6 }
  0x30   : > { %p697_p7 = pnand %p696_p3, %p690_p8 }
  0x32   : > { %700 = shalt.err (!%p697_p7)
}
  0x33   : > { %583 = dma.hbm_to_vmem [thread:$0]  (!%p998_p9), %s1262_s1, 128, %s182_s30, [#allocation6]  }
  0x34   : > { %s1263_s2 = sld [smem:[#allocation19_spill]] }
  0x3a   : > { %s701_s10 = scalar_lea.hbm %s1263_s2, 16 }
  0x3b   : > { %p702_p10 = scmp.ne.s32.totalorder %s1263_s2, %s701_s10  ;;  %p708_p5 = scmp.lt.u32.totalorder %s701_s10, %s1263_s2 }
  0x3d   : > { %p704_p1 = pnand %p702_p10, %p675_p11 }
  0x3f   : > { %p705_p3 = pneg %p704_p1 }
  0x41   : > { %p710_p7 = pnand %p708_p5, %p705_p3 }
  0x43   : > { %713 = shalt.err (!%p710_p7)
}
  0x44   : > { %s714_s30 = scalar_lea.vmem %s1002_s6, 16  ;;  %s721_s24 = scalar_lea.vmem %s1002_s6, 32 }
  0x45   : > { %p715_p12 = scmp.ne.s32.totalorder %s1002_s6, %s714_s30  ;;  %p722_p2 = scmp.lt.s32.totalorder %s1002_s6, %s1002_s6 }
  0x46   : > { %p723_p4 = scmp.lt.s32.totalorder %s721_s24, %s714_s30 }
  0x47   : > { %p717_p13 = pnand %p715_p12, %p675_p11 }
  0x48   : > { %p724_p6 = por %p723_p4, %p722_p2 }
  0x49   : > { %p718_p0 = pneg %p717_p13 }
  0x4b   : > { %p725_p8 = pnand %p724_p6, %p718_p0 }
  0x4d   : > { %728 = shalt.err (!%p725_p8)
}
  0x4e   : > { %586 = dma.hbm_to_vmem [thread:$0]  (!%p998_p9), %s1263_s2, 16, %s1002_s6, [#allocation6]  }
  0x4f   : > { %p127_p11 = scmp.eq.s32.totalorder %s534_s23, 3  ;;  %s34_s8 = sadd.s32 1, %s885_s20 }
  0x50   : > { %p35_p10 = scmp.ge.s32.totalorder %s34_s8, 2  ;;  %s37_s7 = sadd.s32 1, %s889_s21 }
  0x51   : > { %p53_p1 = scmp.ne.s32.totalorder %s873_s17, %s869_s16  ;;  %p54_p3 = scmp.eq.s32.totalorder %s893_s22, 0 }
  0x52   : > { %s1283_s8 = smov (%p35_p10, %s34_s8), 0  ;;  %s1285_s7 = smov (!%p35_p10, %s37_s7), %s889_s21 }
  0x53   : > { %1264 = sst [smem:[#allocation17_spill]] %s1283_s8  ;;  %s42_s9 = ssub.s32 %s885_s20, %s1283_s8 }
  0x54   : > { %s46_s10 = sadd.s32 1, %s873_s17  ;;  %p39_p5 = scmp.ge.s32.totalorder %s1285_s7, 2 }
  0x55   : > { %p1065_p9 = por %p127_p11, %p53_p1  ;;  %p1069_p7 = por %p54_p3, %p53_p1 }
  0x56   : > { %s203_s11 = sand.u32 1, %s873_s17   ;;  %s1287_s7 = smov (%p39_p5, %s1285_s7), 0 }
  0x57   : > { %p600_p12 = scmp.lt.s32.totalorder %s893_s22, 4  ;;  %s540_s12 = sshll.u32 %s203_s11, 3 }
  0x58   : > { %s41_s13 = ssub.s32 %s889_s21, %s1287_s7  ;;  %s541_s30 = sshll.u32 %s889_s21, 1 }
  0x59   : > { %s43_s14 = sor.u32 %s42_s9, %s41_s13  ;;  %s212_s24 = sadd.s32 %s885_s20, %s541_s30 }
  0x5a   : > { %p44_p13 = scmp.eq.s32.totalorder %s43_s14, 0  ;;  %s542_s29 = sshll.u32 %s212_s24, 7 }
  0x5b   : > { %s207_s5 = scalar_lea.vmem [#allocation2], %s540_s12  ;;  %s1087_s15 = scalar_lea.hbm %s1241_s0, %s542_s29 }
  0x5c   : > { %s216_s1 = sshll.u32 %s207_s5, 4  ;;  %p1095_p0 = pnand %p600_p12, %p1069_p7  ;;  %s1089_s1 = int_to_ptr.vmem [resolvable:$true] %s216_s1 }
  0x5d   : > { %s1082_s2 = scalar_select %p44_p13, %s873_s17, %s46_s10  }
  0x5e   : > { %s204_s10 = scalar_lea.sflag [#allocation3], %s203_s11  ;;  %s729_s12 = scalar_lea.hbm %s1087_s15, 128 }
  0x5f   : > { %p730_p2 = scmp.ne.s32.totalorder %s1087_s15, %s729_s12  ;;  %p731_p4 = pneg %p1095_p0 }
  0x60   : > { %s734_s23 = scalar_lea.hbm %s1241_s0, 512  ;;  %p735_p11 = scmp.lt.u32.totalorder %s1087_s15, %s1241_s0 }
  0x61   : > { %p732_p6 = pnand %p731_p4, %p730_p2  ;;  %p736_p10 = scmp.lt.u32.totalorder %s734_s23, %s729_s12 }
  0x62   : > { %p738_p3 = scmp.lt.u32.totalorder %s729_s12, %s1087_s15 }
  0x63   : > { %p733_p8 = pneg %p732_p6  ;;  %p737_p1 = por %p736_p10, %p735_p11 }
  0x65   : > { %p739_p5 = por %p738_p3, %p737_p1 }
  0x67   : > { %p740_p7 = pnand %p739_p5, %p733_p8 }
  0x69   : > { %743 = shalt.err (!%p740_p7)
}
  0x6a   : > { %s744_s11 = scalar_lea.vmem %s1089_s1, 128  ;;  %s897_s30 = smov [#allocation2]  }
  0x6b   : > { %p745_p12 = scmp.ne.s32.totalorder %s1089_s1, %s744_s11  ;;  %s749_s24 = sshll.u32 %s897_s30, 4  ;;  %s750_s24 = int_to_ptr.vmem [resolvable:$false] %s749_s24 }
  0x6c   : > { %s751_s29 = scalar_lea.vmem %s750_s24, 256  ;;  %p752_p6 = scmp.lt.s32.totalorder %s1089_s1, %s750_s24 }
  0x6d   : > { %p747_p13 = pnand %p745_p12, %p731_p4  ;;  %p753_p11 = scmp.lt.s32.totalorder %s751_s29, %s744_s11 }
  0x6f   : > { %p748_p2 = pneg %p747_p13  ;;  %p754_p10 = por %p753_p11, %p752_p6 }
  0x71   : > { %p755_p1 = pnand %p754_p10, %p748_p2 }
  0x73   : > { %758 = shalt.err (!%p755_p1)
}
  0x74   : > { %590 = dma.hbm_to_vmem [thread:$0]  (!%p1095_p0), %s1087_s15, 128, %s1089_s1, %s204_s10  }
  0x75   : > { %p1268_p8 = scmp.ne.s32.totalorder %s1260_s28, 0 }
  0x76   : > { %s1127_s5 = sand.u32 (!%p1268_p8), 1, %s869_s16   ;;  %p1269_p4 = scmp.ne.s32.totalorder (!%p1268_p8), %s1257_s26, 0 }
  0x77   : > { %225 = sbr.rel (%p1268_p8) target bundleno = 476 (0x1dc), region = 32  ;;  %s1130_s12 = sshll.u32 (!%p1268_p8), %s1127_s5, 3 }
  0x78   : > { %s228_s27 = scalar_lea.sflag (!%p1268_p8), [#allocation3], %s1127_s5  ;;  %s231_s8 = scalar_lea.vmem (!%p1268_p8), [#allocation2], %s1130_s12 }
  0x7e   : > { %848 = dma.done.wait (%p1269_p4), %s228_s27, 128  }
  0x7f   : > { %850 = vsyncadd (%p1269_p4), %s228_s27, 4294967168  ;;  %p1270_p0 = scmp.ne.s32.totalorder %s1256_s25, 0 }
  0x81   : > { %852 = dma.done.wait (%p1270_p0), [#allocation6], 144  }
  0x82   : > { %854 = vsyncadd (%p1270_p0), [#allocation6], 4294967152  ;;  %v898_v0 = vmov 0.0   ;;  %vm899_vm0 = vmmov 0   ;;  %vm278_vm1 = vcmask 64512   ;;  %v270_v1 = vld [vmem:[#allocation5] sm:$0xff] }
  0x83   : > { %561 = vmatprep.subr.mxu0 %v898_v0  ;;  %563 = vmatprep.mubr.msk.f32.mxu0 %vm899_vm0, %v898_v0  ;;  %v269_v2 = vld [vmem:[%s231_s8] sm:$0xff]  ;;  %s553_s1 = sshll.u32 %s881_s19, 1  ;;  %v549_v3 = vld [vmem:[#allocation7] ss:$0 sm:$0xff]  ;;  %s261_s26 = scalar_lea.vmem [#allocation8], %s1130_s12 }
  0x84   : > { %562 = vmatpush3.msra.mxu0 %v270_v1  ;;  %s1145_s15 = sadd.s32 %s877_s18, %s553_s1  ;;  %s381_s28 = sshll.u32 %s261_s26, 4  ;;  %s1156_s28 = int_to_ptr.vmem [resolvable:$true] %s381_s28 }
  0x85   : > { %564 = vmatmul.mubr.msk.f32.vlgmr.msra.gmra.mrb[0].mxu0 %vm278_vm1, %v269_v2  ;;  %s554_s25 = sshll.u32 %s1145_s15, 7  ;;  %s900_s9 = smov 120  }
  0x86   : > { %s1154_s19 = scalar_lea.hbm %s1244_s3, %s554_s25  ;;  %s361_s18 = scalar_lea.sflag [#allocation4], %s1127_s5 }
  0x87   : > { %s759_s13 = scalar_lea.vmem %s1156_s28, 128  ;;  %s901_s14 = smov [#allocation8]  }
  0x88   : > { %p760_p3 = scmp.ne.s32.totalorder %s1156_s28, %s759_s13  ;;  %s763_s11 = sshll.u32 %s901_s14, 4  ;;  %s764_s11 = int_to_ptr.vmem [resolvable:$false] %s763_s11 }
  0x89   : > { %s765_s30 = scalar_lea.vmem %s764_s11, 256  ;;  %p766_p12 = scmp.lt.s32.totalorder %s1156_s28, %s764_s11 }
  0x8a   : > { %p761_p5 = pnand %p760_p3, %p1065_p9  ;;  %p767_p13 = scmp.lt.s32.totalorder %s765_s30, %s759_s13 }
  0x8c   : > { %p762_p7 = pneg %p761_p5  ;;  %p768_p2 = por %p767_p13, %p766_p12 }
  0x8e   : > { %p769_p6 = pnand %p768_p2, %p762_p7 }
 0x158   : > { %v348_v4 = vpop.f32.mrb[0].mxu0 }
 0x159   : > { %v349_v5 = vadd.f32 %v549_v3, %v348_v4  ;;  %v565_v6 = vpop.f32.mrb[1].mxu0 }
 0x15b   : > { %v352_v7 = vmax.f32 %v349_v5, 0.0  ;;  %355 = vrot.lane.b32.xlu0 %v349_v5, %s900_s9 }
 0x15d   : > { %353 = vst.msk [vmem:[%s261_s26] sm:$0xff] %vm278_vm1, %v352_v7 }
 0x15e   : > { %772 = shalt.err (!%p769_p6)
}
 0x15f   : > { %s773_s24 = scalar_lea.hbm %s1154_s19, 128  ;;  %s777_s8 = scalar_lea.hbm %s1244_s3, 512 }
 0x160   : > { %p774_p11 = scmp.ne.s32.totalorder %s1154_s19, %s773_s24  ;;  %p778_p8 = scmp.lt.u32.totalorder %s1154_s19, %s1244_s3 }
 0x161   : > { %p779_p4 = scmp.lt.u32.totalorder %s777_s8, %s773_s24  ;;  %p781_p3 = scmp.lt.u32.totalorder %s773_s24, %s1154_s19 }
 0x162   : > { %p775_p10 = pnand %p774_p11, %p1065_p9 }
 0x163   : > { %p780_p0 = por %p779_p4, %p778_p8 }
 0x164   : > { %p776_p1 = pneg %p775_p10 }
 0x165   : > { %p782_p5 = por %p781_p3, %p780_p0 }
 0x167   : > { %p783_p7 = pnand %p782_p5, %p776_p1 }
 0x169   : > { %786 = shalt.err (!%p783_p7)
}
 0x16a   : > { %576 = dma.vmem_to_hbm [thread:$0]  (%p1065_p9), %s1156_s28, 128, %s1154_s19, %s361_s18   ;;  %vm358_vm2 = vcmask 261120  }
 0x16b   : > { %s268_s9 = scalar_lea.vmem [#allocation9], %s1130_s12  ;;  %s1187_s14 = scalar_lea.hbm %s1245_s4, %s554_s25 }
 0x16c   : > { %s396_s10 = sshll.u32 %s268_s9, 4  ;;  %s366_s11 = scalar_lea.sflag [#allocation10], %s1127_s5  ;;  %s1189_s10 = int_to_ptr.vmem [resolvable:$true] %s396_s10 }
 0x16d   : > { %s787_s30 = scalar_lea.vmem %s1189_s10, 128  ;;  %s902_s12 = smov [#allocation9]  }
 0x16e   : > { %p788_p12 = scmp.ne.s32.totalorder %s1189_s10, %s787_s30  ;;  %s791_s15 = sshll.u32 %s902_s12, 4  ;;  %s792_s15 = int_to_ptr.vmem [resolvable:$false] %s791_s15 }
 0x16f   : > { %s793_s28 = scalar_lea.vmem %s792_s15, 256  ;;  %p794_p6 = scmp.lt.s32.totalorder %s1189_s10, %s792_s15 }
 0x170   : > { %p789_p13 = pnand %p788_p12, %p1065_p9  ;;  %p795_p11 = scmp.lt.s32.totalorder %s793_s28, %s787_s30 }
 0x172   : > { %p790_p2 = pneg %p789_p13  ;;  %p796_p10 = por %p795_p11, %p794_p6 }
 0x174   : > { %p797_p1 = pnand %p796_p10, %p790_p2 }
 0x1cd   : > { %v356_v8 = vpop.permute.xlu0 %355 }
 0x1ce   : > { %359 = vst.msk [vmem:[%s268_s9] sm:$0xff] %vm358_vm2, %v356_v8 }
 0x1cf   : > { %800 = shalt.err (!%p797_p1)
}
 0x1d0   : > { %s801_s5 = scalar_lea.hbm %s1187_s14, 128  ;;  %s805_s18 = scalar_lea.hbm %s1245_s4, 512 }
 0x1d1   : > { %p802_p8 = scmp.ne.s32.totalorder %s1187_s14, %s801_s5  ;;  %p806_p3 = scmp.lt.u32.totalorder %s1187_s14, %s1245_s4 }
 0x1d2   : > { %p807_p5 = scmp.lt.u32.totalorder %s805_s18, %s801_s5  ;;  %p809_p12 = scmp.lt.u32.totalorder %s801_s5, %s1187_s14 }
 0x1d3   : > { %p803_p4 = pnand %p802_p8, %p1065_p9 }
 0x1d4   : > { %p808_p7 = por %p807_p5, %p806_p3 }
 0x1d5   : > { %p804_p0 = pneg %p803_p4 }
 0x1d6   : > { %p810_p13 = por %p809_p12, %p808_p7 }
 0x1d8   : > { %p811_p2 = pnand %p810_p13, %p804_p0 }
 0x1da   : > { %814 = shalt.err (!%p811_p2)
}
 0x1db   : > { %577 = dma.vmem_to_hbm [thread:$0]  (%p1065_p9), %s1189_s10, 128, %s1187_s14, %s366_s11  }
 0x1dc PF: > { %s1271_s27 = sld [smem:[#allocation15_spill]]  ;;  %s1272_s8 = sld [smem:[#allocation16_spill]] }
 0x1dd   : > { %p603_p6 = scmp.ge.s32.totalorder %s893_s22, 2 }
 0x1e2   : > { %s408_s1 = sand.u32 1, %s1271_s27   ;;  %p1273_p11 = scmp.ne.s32.totalorder %s1272_s8, 0 }
 0x1e3   : > { %s409_s26 = scalar_lea.sflag [#allocation4], %s408_s1 }
 0x1e4   : > { %p592_p10 = pnand %p603_p6, %p1273_p11 }
 0x1e6   : > { %856 = dma.done.wait (!%p592_p10), %s409_s26, 128  }
 0x1e7   : > { %858 = vsyncadd (!%p592_p10), %s409_s26, 4294967168  ;;  %s418_s9 = scalar_lea.sflag [#allocation10], %s408_s1 }
 0x1e8   : > { %860 = dma.done.wait (!%p592_p10), %s418_s9, 128  }
 0x1e9   : > { %862 = vsyncadd (!%p592_p10), %s418_s9, 4294967168  ;;  %s25_s22 = sadd.s32 1, %s893_s22   ;;  %s1274_s6 = sld [smem:[#allocation17_spill]] }
 0x1ea   : > { %p22_p1 = scmp.ge.s32.totalorder %s25_s22, 6   ;;  %s1275_s15 = smov %s869_s16 }
 0x1eb   : > { %s1276_s16 = smov %s873_s17  ;;  %s1277_s17 = smov %s1082_s2 }
 0x1ec   : > { %s1278_s18 = smov %s885_s20  ;;  %s1279_s19 = smov %s889_s21 }
 0x1ed   : > { %s1281_s21 = smov %s1287_s7  ;;  %24 = sbr.rel (!%p22_p1) target bundleno = 13 (0xd), region = 102 }
 0x1ef   : > { %s1280_s20 = smov %s1274_s6 }
 0x1f4   :  { %423 = vsyncpa [#allocation3], 1 }
 0x1f5   :  { %425 = vsyncpa [#allocation3 + $0x1], 1 }
 0x1f6   :  { %426 = vsyncpa [#allocation6], 1 }
 0x1f7   :  { %427 = vsyncpa [#allocation4], 1 }
 0x1f8   :  { %429 = vsyncpa [#allocation4 + $0x1], 1 }
 0x1f9   :  { %430 = vsyncpa [#allocation10], 1 }
 0x1fa   :  { %432 = vsyncpa [#allocation10 + $0x1], 1 }

// kernel: lfa_forward.4
= control target key start
LH: loop header
LB: loop body
LE: loop exit
PB: predicated region body
PF: predicated region fallthrough
CT: control target
= control target key end

     0   :  { %s4126_s0 = inlined_call_operand.hbm [shape: f32[2,16,8,9], index: 0, kind: input, shape index: {}]   ;;  %s4127_s1 = inlined_call_operand.hbm [shape: f32[2,16,8,1], index: 1, kind: input, shape index: {}]   ;;  %s4128_s2 = inlined_call_operand.hbm [shape: f32[2,16,8], index: 2, kind: input, shape index: {}]   ;;  %s4129_s3 = inlined_call_operand.hbm [shape: f32[2,16,8,8], index: 3, kind: input, shape index: {}]   ;;  %s4130_s4 = inlined_call_operand.hbm [shape: f32[9,8], index: 4, kind: input, shape index: {}]   ;;  %s4131_s5 = inlined_call_operand.hbm [shape: f32[1,8], index: 5, kind: input, shape index: {}]   ;;  %s4132_s6 = inlined_call_operand.hbm [shape: f32[1,16], index: 6, kind: input, shape index: {}]   ;;  %s4133_s7 = inlined_call_operand.hbm [shape: f32[1,16], index: 7, kind: input, shape index: {}]   ;;  %s4134_s8 = inlined_call_operand.hbm [shape: f32[16,16], index: 8, kind: input, shape index: {}]   ;;  %s4135_s9 = inlined_call_operand.hbm [shape: f32[16,8], index: 9, kind: input, shape index: {}]   ;;  %s4136_s10 = inlined_call_operand.hbm [shape: f32[1,8], index: 10, kind: input, shape index: {}]   ;;  %s4137_s11 = inlined_call_operand.hbm [shape: f32[8,8], index: 11, kind: input, shape index: {}]   ;;  %s4138_s12 = inlined_call_operand.hbm [shape: f32[1,8], index: 12, kind: input, shape index: {}]   ;;  %s4139_s13 = inlined_call_operand.hbm [shape: f32[2,16,8], index: 13, kind: output, shape index: {0}]   ;;  %s4140_s14 = inlined_call_operand.hbm [shape: f32[2,16,8,8], index: 14, kind: output, shape index: {1}]  }
   0x1   :  { %4176 = sst [smem:[#allocation45_spill]] %s4126_s0 }
   0x2   :  { %4177 = sst [smem:[#allocation46_spill]] %s4127_s1 }
   0x3   :  { %4178 = sst [smem:[#allocation47_spill]] %s4128_s2 }
   0x4   :  { %4179 = sst [smem:[#allocation48_spill]] %s4129_s3 }
   0x5   :  { %4180 = sst [smem:[#allocation49_spill]] %s4130_s4 }
   0x6   :  { %4181 = sst [smem:[#allocation50_spill]] %s4131_s5 }
   0x7   :  { %4182 = sst [smem:[#allocation51_spill]] %s4132_s6 }
   0x8   :  { %4183 = sst [smem:[#allocation52_spill]] %s4133_s7 }
   0x9   :  { %4184 = sst [smem:[#allocation53_spill]] %s4134_s8 }
   0xa   :  { %4185 = sst [smem:[#allocation54_spill]] %s4135_s9 }
   0xb   :  { %4186 = sst [smem:[#allocation55_spill]] %s4136_s10 }
   0xc   :  { %4187 = sst [smem:[#allocation56_spill]] %s4137_s11 }
   0xd   :  { %4188 = sst [smem:[#allocation57_spill]] %s4138_s12 }
   0xe   :  { %4189 = sst [smem:[#allocation58_spill]] %s4139_s13 }
   0xf   :  { %4190 = sst [smem:[#allocation59_spill]] %s4140_s14 }
  0x10   :  { %20 = vsyncpa [#allocation3], 0 }
  0x11   :  { %22 = vsyncpa [#allocation3 + $0x1], 0 }
  0x12   :  { %23 = vsyncpa [#allocation6], 0 }
  0x13   :  { %25 = vsyncpa [#allocation6 + $0x1], 0 }
  0x14   :  { %26 = vsyncpa [#allocation9], 0 }
  0x15   :  { %28 = vsyncpa [#allocation9 + $0x1], 0 }
  0x16   :  { %29 = vsyncpa [#allocation12], 0 }
  0x17   :  { %30 = vsyncpa [#allocation15], 0 }
  0x18   :  { %31 = vsyncpa [#allocation18], 0 }
  0x19   :  { %32 = vsyncpa [#allocation21], 0 }
  0x1a   :  { %33 = vsyncpa [#allocation4], 0 }
  0x1b   :  { %35 = vsyncpa [#allocation4 + $0x1], 0 }
  0x1c   :  { %36 = vsyncpa [#allocation25], 0 }
  0x1d   :  { %38 = vsyncpa [#allocation25 + $0x1], 0  ;;  %s3214_s29 = smov 0   ;;  %s3216_s30 = smov 0  }
  0x1e   :  { %s3218_s15 = smov 0   ;;  %s3220_s16 = smov 0  }
  0x1f   :  { %s3222_s17 = smov 0   ;;  %s3224_s18 = smov 0  }
  0x20   :  { %s3226_s19 = smov 0   ;;  %s3228_s20 = smov 0  }
  0x21 LB: > { %4191 = sst [smem:[#allocation36_spill]] %s3084_s29  ;;  %s3255_s21 = sadd.s32 4294967295, %s3112_s20   ;;  %s3112_s20 = sphi %s3228_s20, %s44_s20   ;;  %s3108_s19 = sphi %s3226_s19, %s4262_s19   ;;  %s3104_s18 = sphi %s3224_s18, %s4261_s18   ;;  %s3100_s17 = sphi %s3222_s17, %s4260_s17   ;;  %s3096_s16 = sphi %s3220_s16, %s4259_s16   ;;  %s3092_s15 = sphi %s3218_s15, %s4254_s15   ;;  %s3088_s30 = sphi %s3216_s30, %s4258_s30   ;;  %s3084_s29 = sphi %s3214_s29, %s4257_s29  }
  0x22   : > { %4192 = sst [smem:[#allocation37_spill]] %s3092_s15  ;;  %p2150_p0 = scmp.ge.s32.totalorder %s3112_s20, 1 }
  0x23   : > { %4193 = sst [smem:[#allocation38_spill]] %s3096_s16  ;;  %p4151_p1 = scmp.eq.s32.totalorder %s3255_s21, 0 }
  0x24   : > { %4194 = sst [smem:[#allocation39_spill]] %s3100_s17  ;;  %p418_p2 = scmp.lt.s32.totalorder %s3112_s20, 5 }
  0x25   : > { %s3114_s23 = smov [#allocation10]   ;;  %s3115_s26 = smov [#allocation11]  }
  0x26   : > { %p3260_p3 = pnand %p2150_p0, %p418_p2  ;;  %s430_s24 = sshll.u32 %s3114_s23, 4  ;;  %s3264_s24 = int_to_ptr.vmem [resolvable:$true] %s430_s24 }
  0x27   : > { %s444_s27 = sshll.u32 %s3115_s26, 4  ;;  %s3116_s28 = smov [#allocation14]   ;;  %s3274_s27 = int_to_ptr.vmem [resolvable:$true] %s444_s27 }
  0x28   : > { %s4195_s22 = scalar_select %p3260_p3, 1, 0 }
  0x29   : > { %p2380_p4 = pneg %p3260_p3  ;;  %s3276_s13 = sshll.u32 %s3116_s28, 4  ;;  %s467_s13 = int_to_ptr.vmem [resolvable:$true] %s3276_s13 }
  0x2a   : > { %4196 = sst [smem:[#allocation40_spill]] %s4195_s22  ;;  %s4198_s4 = sld [smem:[#allocation49_spill]] }
  0x2b   : > { %p3270_p5 = pnand %p2380_p4, %p4151_p1 }
  0x2d   : > { %s4197_s25 = scalar_select %p3270_p5, 1, 0 }
  0x2e   : > { %p3286_p7 = pneg %p3270_p5 }
  0x30   : > { %s2582_s23 = scalar_lea.hbm %s4198_s4, 256 }
  0x31   : > { %p2583_p6 = scmp.ne.s32.totalorder %s4198_s4, %s2582_s23  ;;  %p2589_p10 = scmp.lt.u32.totalorder %s2582_s23, %s4198_s4 }
  0x32   : > { %s4199_s3 = scalar_select %p3286_p7, 1, 0 }
  0x33   : > { %p2585_p8 = pnand %p3286_p7, %p2583_p6 }
  0x35   : > { %p2586_p9 = pneg %p2585_p8 }
  0x37   : > { %p2591_p11 = pnand %p2589_p10, %p2586_p9 }
  0x39   : > { %2594 = shalt.err (!%p2591_p11)
}
  0x3a   : > { %s2595_s14 = scalar_lea.vmem %s3264_s24, 256  ;;  %p2603_p2 = scmp.lt.s32.totalorder %s3264_s24, %s3264_s24 }
  0x3b   : > { %p2596_p12 = scmp.ne.s32.totalorder %s3264_s24, %s2595_s14  ;;  %p2604_p4 = scmp.lt.s32.totalorder %s2595_s14, %s2595_s14 }
  0x3d   : > { %p2598_p13 = pnand %p2596_p12, %p3286_p7  ;;  %p2605_p6 = por %p2604_p4, %p2603_p2 }
  0x3f   : > { %p2599_p0 = pneg %p2598_p13 }
  0x41   : > { %p2606_p8 = pnand %p2605_p6, %p2599_p0 }
  0x43   : > { %2609 = shalt.err (!%p2606_p8)
}
  0x44   : > { %s4153_s16 = smov 128   ;;  %s4155_s17 = smov 8  }
  0x45   : > { %2383 = dma.hbm_to_vmem [thread:$0]  (!%p3270_p5), %s4198_s4, 256, %s3264_s24, [#allocation9], %s4153_s16, %s4153_s16, %s4155_s17  }
  0x46   : > { %s4200_s5 = sld [smem:[#allocation50_spill]] }
  0x4c   : > { %s2610_s14 = scalar_lea.hbm %s4200_s5, 16 }
  0x4d   : > { %p2611_p9 = scmp.ne.s32.totalorder %s4200_s5, %s2610_s14  ;;  %p2617_p12 = scmp.lt.u32.totalorder %s2610_s14, %s4200_s5 }
  0x4f   : > { %p2613_p10 = pnand %p2611_p9, %p3286_p7 }
  0x51   : > { %p2614_p11 = pneg %p2613_p10 }
  0x53   : > { %p2619_p13 = pnand %p2617_p12, %p2614_p11 }
  0x55   : > { %2622 = shalt.err (!%p2619_p13)
}
  0x56   : > { %s2623_s24 = scalar_lea.vmem %s3274_s27, 16  ;;  %s2630_s0 = scalar_lea.vmem %s3274_s27, 32 }
  0x57   : > { %p2624_p0 = scmp.ne.s32.totalorder %s3274_s27, %s2623_s24  ;;  %p2631_p6 = scmp.lt.s32.totalorder %s3274_s27, %s3274_s27 }
  0x58   : > { %p2632_p8 = scmp.lt.s32.totalorder %s2630_s0, %s2623_s24 }
  0x59   : > { %p2626_p2 = pnand %p2624_p0, %p3286_p7 }
  0x5a   : > { %p2633_p9 = por %p2632_p8, %p2631_p6 }
  0x5b   : > { %p2627_p4 = pneg %p2626_p2 }
  0x5d   : > { %p2634_p10 = pnand %p2633_p9, %p2627_p4 }
  0x5f   : > { %2637 = shalt.err (!%p2634_p10)
}
  0x60   : > { %2386 = dma.hbm_to_vmem [thread:$0]  (!%p3270_p5), %s4200_s5, 16, %s3274_s27, [#allocation12]  }
  0x61   : > { %s4201_s7 = sld [smem:[#allocation52_spill]] }
  0x67   : > { %s2638_s23 = scalar_lea.hbm %s4201_s7, 16 }
  0x68   : > { %p2639_p11 = scmp.ne.s32.totalorder %s4201_s7, %s2638_s23  ;;  %p2645_p0 = scmp.lt.u32.totalorder %s2638_s23, %s4201_s7 }
  0x6a   : > { %p2641_p12 = pnand %p2639_p11, %p3286_p7 }
  0x6c   : > { %p2642_p13 = pneg %p2641_p12 }
  0x6e   : > { %p2647_p2 = pnand %p2645_p0, %p2642_p13 }
  0x70   : > { %2650 = shalt.err (!%p2647_p2)
}
  0x71   : > { %s2651_s0 = scalar_lea.vmem %s467_s13, 16  ;;  %s2658_s27 = scalar_lea.vmem %s467_s13, 32 }
  0x72   : > { %p2652_p4 = scmp.ne.s32.totalorder %s467_s13, %s2651_s0  ;;  %p2659_p9 = scmp.lt.s32.totalorder %s467_s13, %s467_s13 }
  0x73   : > { %p2660_p10 = scmp.lt.s32.totalorder %s2658_s27, %s2651_s0 }
  0x74   : > { %p2654_p6 = pnand %p2652_p4, %p3286_p7 }
  0x75   : > { %p2661_p1 = por %p2660_p10, %p2659_p9 }
  0x76   : > { %p2655_p8 = pneg %p2654_p6 }
  0x78   : > { %p2662_p3 = pnand %p2661_p1, %p2655_p8 }
  0x7a   : > { %2665 = shalt.err (!%p2662_p3)
}
  0x7b   : > { %2392 = dma.hbm_to_vmem [thread:$0]  (!%p3270_p5), %s4201_s7, 16, %s467_s13, [#allocation15]  }
  0x7c   : > { %s3119_s12 = smov [#allocation17]   ;;  %s3120_s23 = smov [#allocation20]  }
  0x7d   : > { %s489_s22 = sshll.u32 %s3119_s12, 4  ;;  %s514_s26 = sshll.u32 %s3120_s23, 4  ;;  %s490_s22 = int_to_ptr.vmem [resolvable:$true] %s489_s22  ;;  %s515_s26 = int_to_ptr.vmem [resolvable:$true] %s514_s26 }
  0x7e   : > { %s4202_s9 = sld [smem:[#allocation54_spill]] }
  0x84   : > { %s2666_s24 = scalar_lea.hbm %s4202_s9, 256 }
  0x85   : > { %p2667_p1 = scmp.ne.s32.totalorder %s4202_s9, %s2666_s24  ;;  %p2673_p12 = scmp.lt.u32.totalorder %s2666_s24, %s4202_s9 }
  0x87   : > { %p2669_p3 = pnand %p2667_p1, %p3286_p7 }
  0x89   : > { %p2670_p11 = pneg %p2669_p3 }
  0x8b   : > { %p2675_p13 = pnand %p2673_p12, %p2670_p11 }
  0x8d   : > { %2678 = shalt.err (!%p2675_p13)
}
  0x8e   : > { %s2679_s13 = scalar_lea.vmem %s490_s22, 256  ;;  %p2687_p6 = scmp.lt.s32.totalorder %s490_s22, %s490_s22 }
  0x8f   : > { %p2680_p0 = scmp.ne.s32.totalorder %s490_s22, %s2679_s13  ;;  %p2688_p8 = scmp.lt.s32.totalorder %s2679_s13, %s2679_s13 }
  0x91   : > { %p2682_p2 = pnand %p2680_p0, %p3286_p7  ;;  %p2689_p9 = por %p2688_p8, %p2687_p6 }
  0x93   : > { %p2683_p4 = pneg %p2682_p2 }
  0x95   : > { %p2690_p10 = pnand %p2689_p9, %p2683_p4 }
  0x97   : > { %2693 = shalt.err (!%p2690_p10)
}
  0x98   : > { %s4203_s10 = smov 128   ;;  %s4204_s11 = sld [smem:[#allocation56_spill]] }
  0x99   : > { %2398 = dma.hbm_to_vmem [thread:$0]  (!%p3270_p5), %s4202_s9, 256, %s490_s22, [#allocation18], %s4203_s10, %s4203_s10, %s4155_s17  }
  0x9e   : > { %s2694_s14 = scalar_lea.hbm %s4204_s11, 128 }
  0x9f   : > { %p2695_p1 = scmp.ne.s32.totalorder %s4204_s11, %s2694_s14  ;;  %p2701_p12 = scmp.lt.u32.totalorder %s2694_s14, %s4204_s11 }
  0xa1   : > { %p2697_p3 = pnand %p2695_p1, %p3286_p7 }
  0xa3   : > { %p2698_p11 = pneg %p2697_p3 }
  0xa5   : > { %p2703_p13 = pnand %p2701_p12, %p2698_p11 }
  0xa7   : > { %2706 = shalt.err (!%p2703_p13)
}
  0xa8   : > { %s2707_s13 = scalar_lea.vmem %s515_s26, 128  ;;  %p2715_p6 = scmp.lt.s32.totalorder %s515_s26, %s515_s26 }
  0xa9   : > { %p2708_p0 = scmp.ne.s32.totalorder %s515_s26, %s2707_s13  ;;  %p2716_p8 = scmp.lt.s32.totalorder %s2707_s13, %s2707_s13 }
  0xab   : > { %p2710_p2 = pnand %p2708_p0, %p3286_p7  ;;  %p2717_p9 = por %p2716_p8, %p2715_p6 }
  0xad   : > { %p2711_p4 = pneg %p2710_p2 }
  0xaf   : > { %p2718_p10 = pnand %p2717_p9, %p2711_p4 }
  0xb1   : > { %2721 = shalt.err (!%p2718_p10)
}
  0xb2   : > { %2404 = dma.hbm_to_vmem [thread:$0]  (!%p3270_p5), %s4204_s11, 128, %s515_s26, [#allocation21]  }
  0xb3   : > { %s2149_s12 = sadd.s32 4294967294, %s3112_s20   ;;  %s53_s23 = sadd.s32 1, %s3104_s18 }
  0xb4   : > { %s56_s28 = sadd.s32 1, %s3108_s19  ;;  %p54_p1 = scmp.ge.s32.totalorder %s53_s23, 2 }
  0xb5   : > { %s65_s14 = sadd.s32 1, %s3092_s15  ;;  %p72_p3 = scmp.ne.s32.totalorder %s3092_s15, %s3088_s30 }
  0xb6   : > { %p73_p11 = scmp.eq.s32.totalorder %s3112_s20, 0  ;;  %s4264_s23 = smov (%p54_p1, %s53_s23), 0 }
  0xb7   : > { %4205 = sst [smem:[#allocation41_spill]] %s4264_s23  ;;  %s4266_s28 = smov (!%p54_p1, %s56_s28), %s3108_s19 }
  0xb8   : > { %s61_s24 = ssub.s32 %s3104_s18, %s4264_s23  ;;  %p3404_p12 = por %p73_p11, %p72_p3 }
  0xb9   : > { %p58_p13 = scmp.ge.s32.totalorder %s4266_s28, 2  ;;  %p78_p0 = scmp.ne.s32.totalorder %s3088_s30, %s3084_s29 }
  0xba   : > { %p377_p2 = scmp.eq.s32.totalorder %s3255_s21, 3  ;;  %p383_p4 = scmp.eq.s32.totalorder %s2149_s12, 3 }
  0xbb   : > { %s4268_s28 = smov (%p58_p13, %s4266_s28), 0  ;;  %p4208_p6 = scmp.eq.s32.totalorder %s3255_s21, 0 }
  0xbc   : > { %4207 = sst [smem:[#allocation42_spill]] %s4268_s28  ;;  %p3419_p9 = por %p377_p2, %p72_p3 }
  0xbd   : > { %p3415_p8 = por %p4208_p6, %p78_p0  ;;  %s60_s2 = ssub.s32 %s3108_s19, %s4268_s28 }
  0xbe   : > { %s4210_s27 = scalar_select %p3419_p9, 1, 0 }
  0xbf   : > { %s4209_s26 = scalar_select %p3415_p8, 1, 0 }
  0xc0   : > { %p3425_p10 = por %p383_p4, %p78_p0  ;;  %s62_s22 = sor.u32 %s61_s24, %s60_s2 }
  0xc1   : > { %p2437_p1 = scmp.lt.s32.totalorder %s3112_s20, 4  ;;  %p63_p11 = scmp.eq.s32.totalorder %s62_s22, 0 }
  0xc2   : > { %s4211_s13 = scalar_select %p3425_p10, 1, 0 }
  0xc3   : > { %s3431_s16 = sand.u32 1, %s3092_s15   ;;  %s2162_s17 = sshll.u32 %s3104_s18, 3 }
  0xc4   : > { %4212 = sst [smem:[#allocation43_spill]] %s4211_s13  ;;  %s3434_s12 = sshll.u32 %s3431_s16, 6 }
  0xc5   : > { %s3438_s4 = scalar_select %p63_p11, %s3092_s15, %s65_s14  }
  0xc6   : > { %s2163_s5 = sshll.u32 %s3108_s19, 4  ;;  %p3443_p3 = pnand %p2437_p1, %p3404_p12 }
  0xc7   : > { %4213 = sst [smem:[#allocation44_spill]] %s3438_s4  ;;  %s546_s24 = sadd.s32 %s2163_s5, %s2162_s17 }
  0xc8   : > { %s4214_s7 = scalar_select %p3443_p3, 1, 0 }
  0xc9   : > { %s4160_s2 = sand.u32 1, %s3112_s20   ;;  %s3448_s9 = sshll.u32 %s546_s24, 7 }
  0xca   : > { %s4215_s1 = sld [smem:[#allocation46_spill]]  ;;  %s563_s14 = scalar_lea.vmem [#allocation5], %s3434_s12 }
  0xcb   : > { %s572_s0 = sshll.u32 %s563_s14, 4  ;;  %s3461_s23 = scalar_lea.sflag [#allocation6], %s4160_s2  ;;  %s3457_s0 = int_to_ptr.vmem [resolvable:$true] %s572_s0 }
  0xcc   : > { %p3467_p13 = pneg %p3443_p3 }
  0xce   : > { %s4216_s17 = scalar_select %p3467_p13, 1, 0 }
  0xd0   : > { %s3454_s28 = scalar_lea.hbm %s4215_s1, %s3448_s9  ;;  %s2727_s22 = scalar_lea.hbm %s4215_s1, 4096 }
  0xd1   : > { %s2722_s5 = scalar_lea.hbm %s3454_s28, 1024  ;;  %p2728_p4 = scmp.lt.u32.totalorder %s3454_s28, %s4215_s1 }
  0xd2   : > { %p2723_p12 = scmp.ne.s32.totalorder %s3454_s28, %s2722_s5  ;;  %p2729_p6 = scmp.lt.u32.totalorder %s2727_s22, %s2722_s5 }
  0xd3   : > { %p2731_p11 = scmp.lt.u32.totalorder %s2722_s5, %s3454_s28 }
  0xd4   : > { %p2725_p0 = pnand %p3467_p13, %p2723_p12  ;;  %p2730_p1 = por %p2729_p6, %p2728_p4 }
  0xd6   : > { %p2726_p2 = pneg %p2725_p0  ;;  %p2732_p10 = por %p2731_p11, %p2730_p1 }
  0xd8   : > { %p2733_p9 = pnand %p2732_p10, %p2726_p2 }
  0xda   : > { %2736 = shalt.err (!%p2733_p9)
}
  0xdb   : > { %s2737_s2 = scalar_lea.vmem %s3457_s0, 1024  ;;  %s3121_s11 = smov [#allocation5]  }
  0xdc   : > { %p2738_p12 = scmp.ne.s32.totalorder %s3457_s0, %s2737_s2  ;;  %s2742_s24 = sshll.u32 %s3121_s11, 4  ;;  %s2743_s24 = int_to_ptr.vmem [resolvable:$false] %s2742_s24 }
  0xdd   : > { %s2744_s4 = scalar_lea.vmem %s2743_s24, 2048  ;;  %p2745_p5 = scmp.lt.s32.totalorder %s3457_s0, %s2743_s24 }
  0xde   : > { %p2740_p0 = pnand %p2738_p12, %p3467_p13  ;;  %p2746_p7 = scmp.lt.s32.totalorder %s2744_s4, %s2737_s2 }
  0xe0   : > { %p2741_p8 = pneg %p2740_p0  ;;  %p2747_p4 = por %p2746_p7, %p2745_p5 }
  0xe2   : > { %p2748_p6 = pnand %p2747_p4, %p2741_p8 }
  0xe4   : > { %2751 = shalt.err (!%p2748_p6)
}
  0xe5   : > { %s4217_s5 = smov 8   ;;  %s3122_s22 = smov [#allocation13]  }
  0xe6   : > { %2414 = dma.hbm_to_vmem [thread:$0]  (!%p3443_p3), %s3454_s28, 1024, %s3457_s0, %s3461_s23, %s4203_s10, %s4203_s10, %s4217_s5  }
  0xe7   : > { %s455_s14 = sshll.u32 %s3122_s22, 4  ;;  %s3123_s11 = smov [#allocation16]   ;;  %s456_s14 = int_to_ptr.vmem [resolvable:$true] %s455_s14 }
  0xe8   : > { %s476_s1 = sshll.u32 %s3123_s11, 4  ;;  %s4218_s6 = sld [smem:[#allocation51_spill]]  ;;  %s3494_s1 = int_to_ptr.vmem [resolvable:$true] %s476_s1 }
  0xe9   : > { %p4219_p7 = scmp.ne.s32.totalorder %s4199_s3, 0 }
  0xee   : > { %s2752_s4 = scalar_lea.hbm %s4218_s6, 16 }
  0xef   : > { %p2753_p5 = scmp.ne.s32.totalorder %s4218_s6, %s2752_s4  ;;  %p2759_p10 = scmp.lt.u32.totalorder %s2752_s4, %s4218_s6 }
  0xf1   : > { %p2755_p8 = pnand %p2753_p5, %p4219_p7 }
  0xf3   : > { %p2756_p9 = pneg %p2755_p8 }
  0xf5   : > { %p2761_p2 = pnand %p2759_p10, %p2756_p9 }
  0xf7   : > { %2764 = shalt.err (!%p2761_p2)
}
  0xf8   : > { %s2765_s0 = scalar_lea.vmem %s456_s14, 16  ;;  %s2772_s22 = scalar_lea.vmem %s456_s14, 32 }
  0xf9   : > { %p2766_p1 = scmp.ne.s32.totalorder %s456_s14, %s2765_s0  ;;  %p2773_p0 = scmp.lt.s32.totalorder %s456_s14, %s456_s14 }
  0xfa   : > { %p2774_p4 = scmp.lt.s32.totalorder %s2772_s22, %s2765_s0 }
  0xfb   : > { %p2768_p11 = pnand %p2766_p1, %p4219_p7 }
  0xfc   : > { %p2775_p6 = por %p2774_p4, %p2773_p0 }
  0xfd   : > { %p2769_p12 = pneg %p2768_p11 }
  0xff   : > { %p2776_p3 = pnand %p2775_p6, %p2769_p12 }
 0x101   : > { %2779 = shalt.err (!%p2776_p3)
}
 0x102   : > { %p4220_p5 = scmp.ne.s32.totalorder %s4197_s25, 0  ;;  %s4221_s8 = sld [smem:[#allocation53_spill]] }
 0x104   : > { %2389 = dma.hbm_to_vmem [thread:$0]  (!%p4220_p5), %s4218_s6, 16, %s456_s14, [#allocation12]  }
 0x108   : > { %s2780_s2 = scalar_lea.hbm %s4221_s8, 256 }
 0x109   : > { %p2781_p8 = scmp.ne.s32.totalorder %s4221_s8, %s2780_s2  ;;  %p2787_p3 = scmp.lt.u32.totalorder %s2780_s2, %s4221_s8 }
 0x10b   : > { %p2783_p9 = pnand %p2781_p8, %p4219_p7 }
 0x10d   : > { %p2784_p10 = pneg %p2783_p9 }
 0x10f   : > { %p2789_p2 = pnand %p2787_p3, %p2784_p10 }
 0x111   : > { %2792 = shalt.err (!%p2789_p2)
}
 0x112   : > { %s2793_s14 = scalar_lea.vmem %s3494_s1, 256  ;;  %p2801_p0 = scmp.lt.s32.totalorder %s3494_s1, %s3494_s1 }
 0x113   : > { %p2794_p1 = scmp.ne.s32.totalorder %s3494_s1, %s2793_s14  ;;  %p2802_p4 = scmp.lt.s32.totalorder %s2793_s14, %s2793_s14 }
 0x115   : > { %p2796_p11 = pnand %p2794_p1, %p4219_p7  ;;  %p2803_p6 = por %p2802_p4, %p2801_p0 }
 0x117   : > { %p2797_p12 = pneg %p2796_p11 }
 0x119   : > { %p2804_p8 = pnand %p2803_p6, %p2797_p12 }
 0x11b   : > { %2807 = shalt.err (!%p2804_p8)
}
 0x11c   : > { %2395 = dma.hbm_to_vmem [thread:$0]  (!%p4220_p5), %s4221_s8, 256, %s3494_s1, [#allocation15], %s4203_s10, %s4203_s10, %s4217_s5  }
 0x11d   : > { %s3124_s13 = smov [#allocation19]   ;;  %s3125_s11 = smov [#allocation22]  }
 0x11e   : > { %s503_s29 = sshll.u32 %s3124_s13, 4  ;;  %s525_s2 = sshll.u32 %s3125_s11, 4  ;;  %s504_s29 = int_to_ptr.vmem [resolvable:$true] %s503_s29  ;;  %s3540_s2 = int_to_ptr.vmem [resolvable:$true] %s525_s2 }
 0x11f   : > { %s4222_s28 = sld [smem:[#allocation55_spill]] }
 0x125   : > { %s2808_s0 = scalar_lea.hbm %s4222_s28, 16 }
 0x126   : > { %p2809_p9 = scmp.ne.s32.totalorder %s4222_s28, %s2808_s0  ;;  %p2815_p2 = scmp.lt.u32.totalorder %s2808_s0, %s4222_s28 }
 0x128   : > { %p2811_p10 = pnand %p2809_p9, %p4219_p7 }
 0x12a   : > { %p2812_p3 = pneg %p2811_p10 }
 0x12c   : > { %p2817_p1 = pnand %p2815_p2, %p2812_p3 }
 0x12e   : > { %2820 = shalt.err (!%p2817_p1)
}
 0x12f   : > { %s2821_s15 = scalar_lea.vmem %s504_s29, 16  ;;  %s2828_s13 = scalar_lea.vmem %s504_s29, 32 }
 0x130   : > { %p2822_p11 = scmp.ne.s32.totalorder %s504_s29, %s2821_s15  ;;  %p2829_p4 = scmp.lt.s32.totalorder %s504_s29, %s504_s29 }
 0x131   : > { %p2830_p6 = scmp.lt.s32.totalorder %s2828_s13, %s2821_s15 }
 0x132   : > { %p2824_p12 = pnand %p2822_p11, %p4219_p7 }
 0x133   : > { %p2831_p8 = por %p2830_p6, %p2829_p4 }
 0x134   : > { %p2825_p0 = pneg %p2824_p12 }
 0x136   : > { %p2832_p13 = pnand %p2831_p8, %p2825_p0 }
 0x138   : > { %2835 = shalt.err (!%p2832_p13)
}
 0x139   : > { %2401 = dma.hbm_to_vmem [thread:$0]  (!%p4220_p5), %s4222_s28, 16, %s504_s29, [#allocation18]  }
 0x13a   : > { %s4223_s0 = sld [smem:[#allocation57_spill]] }
 0x140   : > { %s2836_s14 = scalar_lea.hbm %s4223_s0, 16 }
 0x141   : > { %p2837_p9 = scmp.ne.s32.totalorder %s4223_s0, %s2836_s14  ;;  %p2843_p13 = scmp.lt.u32.totalorder %s2836_s14, %s4223_s0 }
 0x143   : > { %p2839_p10 = pnand %p2837_p9, %p4219_p7 }
 0x145   : > { %p2840_p3 = pneg %p2839_p10 }
 0x147   : > { %p2845_p2 = pnand %p2843_p13, %p2840_p3 }
 0x149   : > { %2848 = shalt.err (!%p2845_p2)
}
 0x14a   : > { %s2849_s29 = scalar_lea.vmem %s3540_s2, 16  ;;  %s2856_s6 = scalar_lea.vmem %s3540_s2, 32 }
 0x14b   : > { %p2850_p1 = scmp.ne.s32.totalorder %s3540_s2, %s2849_s29  ;;  %p2857_p0 = scmp.lt.s32.totalorder %s3540_s2, %s3540_s2 }
 0x14c   : > { %p2858_p4 = scmp.lt.s32.totalorder %s2856_s6, %s2849_s29 }
 0x14d   : > { %p2852_p11 = pnand %p2850_p1, %p4219_p7 }
 0x14e   : > { %p2859_p6 = por %p2858_p4, %p2857_p0 }
 0x14f   : > { %p2853_p12 = pneg %p2852_p11 }
 0x151   : > { %p2860_p8 = pnand %p2859_p6, %p2853_p12 }
 0x153   : > { %2863 = shalt.err (!%p2860_p8)
}
 0x154   : > { %2407 = dma.hbm_to_vmem [thread:$0]  (!%p4220_p5), %s4223_s0, 16, %s3540_s2, [#allocation21]  }
 0x155   : > { %s4224_s14 = sld [smem:[#allocation45_spill]]  ;;  %s540_s25 = scalar_lea.vmem [#allocation2], %s3434_s12 }
 0x156   : > { %s549_s1 = sshll.u32 %s540_s25, 4  ;;  %s2169_s15 = sshll.u32 %s3431_s16, 3  ;;  %s3591_s1 = int_to_ptr.vmem [resolvable:$true] %s549_s1 }
 0x157   : > { %s537_s13 = scalar_lea.sflag [#allocation3], %s3431_s16  ;;  %p4225_p9 = scmp.ne.s32.totalorder %s4216_s17, 0 }
 0x15b   : > { %s3588_s22 = scalar_lea.hbm %s4224_s14, %s3448_s9  ;;  %s2869_s11 = scalar_lea.hbm %s4224_s14, 4096 }
 0x15c   : > { %s2864_s29 = scalar_lea.hbm %s3588_s22, 1024  ;;  %p2870_p3 = scmp.lt.u32.totalorder %s3588_s22, %s4224_s14 }
 0x15d   : > { %p2865_p7 = scmp.ne.s32.totalorder %s3588_s22, %s2864_s29  ;;  %p2871_p13 = scmp.lt.u32.totalorder %s2869_s11, %s2864_s29 }
 0x15e   : > { %p2873_p1 = scmp.lt.u32.totalorder %s2864_s29, %s3588_s22 }
 0x15f   : > { %p2867_p10 = pnand %p2865_p7, %p4225_p9  ;;  %p2872_p2 = por %p2871_p13, %p2870_p3 }
 0x161   : > { %p2868_p5 = pneg %p2867_p10  ;;  %p2874_p11 = por %p2873_p1, %p2872_p2 }
 0x163   : > { %p2875_p12 = pnand %p2874_p11, %p2868_p5 }
 0x165   : > { %2878 = shalt.err (!%p2875_p12)
}
 0x166   : > { %s2879_s4 = scalar_lea.vmem %s3591_s1, 1024  ;;  %s3126_s25 = smov [#allocation2]  }
 0x167   : > { %p2880_p0 = scmp.ne.s32.totalorder %s3591_s1, %s2879_s4  ;;  %s2884_s2 = sshll.u32 %s3126_s25, 4  ;;  %s2885_s2 = int_to_ptr.vmem [resolvable:$false] %s2884_s2 }
 0x168   : > { %s2886_s6 = scalar_lea.vmem %s2885_s2, 2048  ;;  %p2887_p8 = scmp.lt.s32.totalorder %s3591_s1, %s2885_s2 }
 0x169   : > { %p2882_p4 = pnand %p2880_p0, %p4225_p9  ;;  %p2888_p7 = scmp.lt.s32.totalorder %s2886_s6, %s2879_s4 }
 0x16b   : > { %p2883_p6 = pneg %p2882_p4  ;;  %p2889_p10 = por %p2888_p7, %p2887_p8 }
 0x16d   : > { %p2890_p3 = pnand %p2889_p10, %p2883_p6 }
 0x16f   : > { %2893 = shalt.err (!%p2890_p3)
}
 0x170   : > { %p4226_p5 = scmp.ne.s32.totalorder %s4214_s7, 0  ;;  %s2170_s29 = sshll.u32 %s3108_s19, 1 }
 0x171   : > { %s591_s11 = sadd.s32 %s3104_s18, %s2170_s29  ;;  %s586_s24 = scalar_lea.vmem [#allocation7], %s2169_s15 }
 0x172   : > { %2411 = dma.hbm_to_vmem [thread:$0]  (!%p4226_p5), %s3588_s22, 1024, %s3591_s1, %s537_s13, %s4203_s10, %s4203_s10, %s4217_s5  }
 0x173   : > { %s595_s3 = sshll.u32 %s586_s24, 4  ;;  %s2171_s4 = sshll.u32 %s591_s11, 7  ;;  %s596_s3 = int_to_ptr.vmem [resolvable:$true] %s595_s3 }
 0x174   : > { %s4227_s6 = sld [smem:[#allocation47_spill]] }
 0x17a   : > { %s593_s0 = scalar_lea.hbm %s4227_s6, %s2171_s4  ;;  %s2899_s22 = scalar_lea.hbm %s4227_s6, 512 }
 0x17b   : > { %s2894_s8 = scalar_lea.hbm %s593_s0, 128  ;;  %p2900_p11 = scmp.lt.u32.totalorder %s593_s0, %s4227_s6 }
 0x17c   : > { %p2895_p13 = scmp.ne.s32.totalorder %s593_s0, %s2894_s8  ;;  %p2901_p12 = scmp.lt.u32.totalorder %s2899_s22, %s2894_s8 }
 0x17d   : > { %p2903_p4 = scmp.lt.u32.totalorder %s2894_s8, %s593_s0 }
 0x17e   : > { %p2897_p2 = pnand %p2895_p13, %p4225_p9  ;;  %p2902_p0 = por %p2901_p12, %p2900_p11 }
 0x180   : > { %p2898_p1 = pneg %p2897_p2  ;;  %p2904_p6 = por %p2903_p4, %p2902_p0 }
 0x182   : > { %p2905_p8 = pnand %p2904_p6, %p2898_p1 }
 0x184   : > { %2908 = shalt.err (!%p2905_p8)
}
 0x185   : > { %s2909_s16 = scalar_lea.vmem %s596_s3, 128  ;;  %s3127_s15 = smov [#allocation7]  }
 0x186   : > { %p2910_p7 = scmp.ne.s32.totalorder %s596_s3, %s2909_s16  ;;  %s2914_s29 = sshll.u32 %s3127_s15, 4  ;;  %s2915_s29 = int_to_ptr.vmem [resolvable:$false] %s2914_s29 }
 0x187   : > { %s2916_s28 = scalar_lea.vmem %s2915_s29, 256  ;;  %p2917_p13 = scmp.lt.s32.totalorder %s596_s3, %s2915_s29 }
 0x188   : > { %p2912_p10 = pnand %p2910_p7, %p4225_p9  ;;  %p2918_p2 = scmp.lt.s32.totalorder %s2916_s28, %s2909_s16 }
 0x18a   : > { %p2913_p3 = pneg %p2912_p10  ;;  %p2919_p5 = por %p2918_p2, %p2917_p13 }
 0x18c   : > { %p2920_p11 = pnand %p2919_p5, %p2913_p3 }
 0x18e   : > { %2923 = shalt.err (!%p2920_p11)
}
 0x18f   : > { %p4228_p12 = scmp.ne.s32.totalorder %s4214_s7, 0  ;;  %s4229_s11 = sld [smem:[#allocation48_spill]] }
 0x190   : > { %s606_s4 = scalar_lea.vmem [#allocation8], %s3434_s12  ;;  %s4230_s2 = sand.u32 1, %s3112_s20  }
 0x191   : > { %2417 = dma.hbm_to_vmem [thread:$0]  (!%p4228_p12), %s593_s0, 128, %s596_s3, %s3461_s23  }
 0x192   : > { %s615_s25 = sshll.u32 %s606_s4, 4  ;;  %s3652_s22 = scalar_lea.sflag [#allocation9], %s4230_s2  ;;  %s3648_s25 = int_to_ptr.vmem [resolvable:$true] %s615_s25 }
 0x195   : > { %s3645_s24 = scalar_lea.hbm %s4229_s11, %s3448_s9  ;;  %s2929_s9 = scalar_lea.hbm %s4229_s11, 4096 }
 0x196   : > { %s2924_s1 = scalar_lea.hbm %s3645_s24, 1024  ;;  %p2930_p4 = scmp.lt.u32.totalorder %s3645_s24, %s4229_s11 }
 0x197   : > { %p2925_p5 = scmp.ne.s32.totalorder %s3645_s24, %s2924_s1  ;;  %p2931_p6 = scmp.lt.u32.totalorder %s2929_s9, %s2924_s1 }
 0x198   : > { %p2933_p7 = scmp.lt.u32.totalorder %s2924_s1, %s3645_s24 }
 0x199   : > { %p2927_p1 = pnand %p2925_p5, %p4225_p9  ;;  %p2932_p8 = por %p2931_p6, %p2930_p4 }
 0x19b   : > { %p2928_p0 = pneg %p2927_p1  ;;  %p2934_p10 = por %p2933_p7, %p2932_p8 }
 0x19d   : > { %p2935_p3 = pnand %p2934_p10, %p2928_p0 }
 0x19f   : > { %2938 = shalt.err (!%p2935_p3)
}
 0x1a0   : > { %s2939_s12 = scalar_lea.vmem %s3648_s25, 1024  ;;  %s3128_s16 = smov [#allocation8]  }
 0x1a1   : > { %p2940_p13 = scmp.ne.s32.totalorder %s3648_s25, %s2939_s12  ;;  %s2944_s15 = sshll.u32 %s3128_s16, 4  ;;  %s2945_s15 = int_to_ptr.vmem [resolvable:$false] %s2944_s15 }
 0x1a2   : > { %s2946_s29 = scalar_lea.vmem %s2945_s15, 2048  ;;  %p2947_p5 = scmp.lt.s32.totalorder %s3648_s25, %s2945_s15 }
 0x1a3   : > { %p2942_p2 = pnand %p2940_p13, %p4225_p9  ;;  %p2948_p1 = scmp.lt.s32.totalorder %s2946_s29, %s2939_s12 }
 0x1a5   : > { %p2943_p11 = pneg %p2942_p2  ;;  %p2949_p4 = por %p2948_p1, %p2947_p5 }
 0x1a7   : > { %p2950_p6 = pnand %p2949_p4, %p2943_p11 }
 0x1a9   : > { %2953 = shalt.err (!%p2950_p6)
}
 0x1aa   : > { %2420 = dma.hbm_to_vmem [thread:$0]  (!%p4228_p12), %s3645_s24, 1024, %s3648_s25, %s3652_s22, %s4203_s10, %s4203_s10, %s4217_s5  }
 0x1ab   : > { %s4231_s17 = sld [smem:[#allocation40_spill]] }
 0x1b1   : > { %p4232_p9 = scmp.ne.s32.totalorder %s4231_s17, 0 }
 0x1b2   : > { %s3682_s28 = sand.u32 (!%p4232_p9), 1, %s3088_s30   ;;  %p4233_p0 = scmp.ne.s32.totalorder (!%p4232_p9), %s4209_s26, 0 }
 0x1b3   : > { %627 = sbr.rel (%p4232_p9) target bundleno = 1339 (0x53b), region = 72  ;;  %s3685_s8 = sshll.u32 (!%p4232_p9), %s3682_s28, 6 }
 0x1b4   : > { %s630_s7 = scalar_lea.sflag (!%p4232_p9), [#allocation3], %s3682_s28  ;;  %s3689_s14 = scalar_lea.vmem (!%p4232_p9), [#allocation2], %s3685_s8 }
 0x1ba   : > { %3043 = dma.done.wait (%p4233_p0), %s630_s7, 1024  }
 0x1bb   : > { %3045 = vsyncadd (%p4233_p0), %s630_s7, 4294966272  ;;  %s638_s10 = sand.u32 1, %s3255_s21   ;;  %s3697_s24 = scalar_lea.vmem [#allocation5], %s3685_s8 }
 0x1bc   : > { %s639_s5 = scalar_lea.sflag [#allocation6], %s638_s10 }
 0x1bd   : > { %3047 = dma.done.wait (%p4233_p0), %s639_s5, 1152  }
 0x1be   : > { %3049 = vsyncadd (%p4233_p0), %s639_s5, 4294966144  ;;  %s2179_s4 = sshll.u32 %s3682_s28, 3  ;;  %s657_s2 = scalar_lea.sflag [#allocation9], %s638_s10 }
 0x1bf   : > { %s3706_s25 = scalar_lea.vmem [#allocation7], %s2179_s4  ;;  %s3709_s22 = scalar_lea.vmem [#allocation8], %s3685_s8 }
 0x1c0   : > { %3051 = dma.done.wait (%p4233_p0), %s657_s2, 1024  }
 0x1c1   : > { %3053 = vsyncadd (%p4233_p0), %s657_s2, 4294966272  ;;  %p4234_p12 = scmp.eq.s32.totalorder %s3255_s21, 0 }
 0x1c3   : > { %3055 = dma.done.wait (%p4234_p12), [#allocation9], 256   ;;  %p4235_p8 = pmov %p4234_p12 }
 0x1c5   : > { %3057 = vsyncadd (%p4235_p8), [#allocation9], 4294967040  ;;  %p4236_p7 = pmov %p4235_p8 }
 0x1c7   : > { %3059 = dma.done.wait (%p4236_p7), [#allocation12], 32   ;;  %p4237_p10 = pmov %p4236_p7 }
 0x1c8   : > { %p4238_p3 = pmov %p4236_p7 }
 0x1c9   : > { %3061 = vsyncadd (%p4237_p10), [#allocation12], 4294967264 }
 0x1ca   : > { %3063 = dma.done.wait (%p4238_p3), [#allocation15], 272   ;;  %p4239_p13 = pmov %p4238_p3 }
 0x1cb   : > { %p4240_p2 = pmov %p4238_p3 }
 0x1cc   : > { %3065 = vsyncadd (%p4239_p13), [#allocation15], 4294967024 }
 0x1cd   : > { %3067 = dma.done.wait (%p4240_p2), [#allocation18], 272   ;;  %p4241_p11 = pmov %p4240_p2 }
 0x1ce   : > { %p4242_p5 = pmov %p4240_p2 }
 0x1cf   : > { %3069 = vsyncadd (%p4241_p11), [#allocation18], 4294967024 }
 0x1d0   : > { %3071 = dma.done.wait (%p4242_p5), [#allocation21], 144   ;;  %p4243_p1 = pmov %p4240_p2 }
 0x1d1   : > { %vm807_vm0 = vcmask 1040384   ;;  %vm782_vm1 = vcmask 72704   ;;  %vm3129_vm2 = vmmov 1   ;;  %v773_v0 = vld [vmem:[#allocation10] sm:$0xff]  ;;  %v774_v1 = vld [vmem:[#allocation10 + $0x8] sm:$0x1]  ;;  %v979_v40 = vlaneseq }
 0x1d2   : > { %3073 = vsyncadd (%p4243_p1), [#allocation21], 4294967152  ;;  %v765_v2 = vld [vmem:[%s3689_s14] sm:$0xff]  ;;  %v2317_v3 = vpack.c.bf16 %v774_v1, %v773_v0  ;;  %v766_v4 = vld [vmem:[%s3689_s14 + $0x8] sm:$0xff]  ;;  %s3130_s21 = smov 8   ;;  %v3132_v48 = vmov 0  }
 0x1d3   : > { %vm2318_vm3 = vmpackc.low %vm807_vm0, %vm3129_vm2  ;;  %2268 = vmatprep.mubr.msk.f32.mxu0 %vm782_vm1, %v765_v2  ;;  %v767_v5 = vld [vmem:[%s3689_s14 + $0x10] sm:$0xff]  ;;  %v768_v6 = vld [vmem:[%s3689_s14 + $0x18] sm:$0xff]  ;;  %v3131_v38 = vmov 1966171168   ;;  %v980_v44 = vshrl.u32 %v979_v40, 7  ;;  %2531 = vset.pattern.permute.xlu1 %v3132_v48  ;;  %vm964_vm4 = vcmask 64512  }
 0x1d4   : > { %2319 = vmatprep.subr.msk.bf16.mxu0 %vm2318_vm3, %v2317_v3  ;;  %v769_v7 = vld [vmem:[%s3689_s14 + $0x20] sm:$0xff]  ;;  %v770_v8 = vld [vmem:[%s3689_s14 + $0x28] sm:$0xff]  ;;  %v771_v9 = vld [vmem:[%s3689_s14 + $0x30] sm:$0xff]  ;;  %v977_v39 = vunpack.c.l.s4 %v3131_v38  ;;  %2532 = vset.pattern.permute.xlu0 %v3132_v48  ;;  %vm1225_vm5 = vcmask 130048   ;;  %vm3134_vm6 = vmmov 0   ;;  %s3951_s26 = scalar_lea.vmem [#allocation24], %s3685_s8 }
 0x1d5   : > { %2322 = vmatpush3.bf16.msk.msra.mxu0 %vm2318_vm3, %v2317_v3  ;;  %v772_v10 = vld [vmem:[%s3689_s14 + $0x38] sm:$0xff]  ;;  %v1223_v11 = vld [vmem:[#allocation16] sm:$0xff]  ;;  %v1224_v12 = vld [vmem:[#allocation16 + $0x8] sm:$0xff]  ;;  %v1026_v53 = vsub.s32 0, %v980_v44  ;;  %vm1596_vm7 = vcmask 1041409   ;;  %vm1598_vm8 = vcmask 1042434  }
 0x1d6   : > { %v2323_v13 = vpack.c.bf16 %v1224_v12, %v1223_v11  ;;  %v2192_v14 = vld [vmem:[#allocation11] ss:$0 sm:$0xff]  ;;  %v3777_v32 = vld [vmem:[#allocation20] sm:$0xff]  ;;  %v978_v43 = vunpack.c.0.s8 %v977_v39  ;;  %v3804_v59 = vld [vmem:[%s3709_s22] sm:$0xff]  ;;  %vm1600_vm9 = vcmask 1043459   ;;  %vm1602_vm10 = vcmask 1044484  }
 0x1d7   : > { %v973_v46 = vld [vmem:[%s3706_s25] sm:$0xff]  ;;  %v3808_v61 = vld [vmem:[%s3709_s22 + $0x8] sm:$0xff]  ;;  %s4244_s1 = sld [smem:[#allocation38_spill]]  ;;  %s4245_s23 = sld [smem:[#allocation39_spill]]  ;;  %vm1604_vm11 = vcmask 1045509   ;;  %vm1606_vm12 = vcmask 1046534  }
 0x1d8   : > { %2269 = vmatmul.mubr.msk.f32.vlgmr.msra.gmra.mrb[0].mxu0 %vm782_vm1, %v766_v4  ;;  %2324 = vmatprep.subr.bf16.mxu0 %v2323_v13  ;;  %v981_v45 = vsub.s32 %v978_v43, %v980_v44  ;;  %v975_v50 = vcombine.high %v973_v46, %v973_v46  ;;  %v3812_v4 = vld [vmem:[%s3709_s22 + $0x10] sm:$0xff]  ;;  %v929_v38 = vld [vmem:[%s3709_s22 + $0x28] sm:$0xff]  ;;  %vm1608_vm13 = vcmask 1047559   ;;  %s1865_s13 = sshll.u32 %s3951_s26, 4  ;;  %s4246_s29 = sld [smem:[#allocation59_spill]]  ;;  %s4032_s13 = int_to_ptr.vmem [resolvable:$true] %s1865_s13 }
 0x1d9   : > { %2271 = vmatprep.mubr.msk.f32.mxu0 %vm782_vm1, %v767_v5  ;;  %2330 = vmatprep.subr.bf16.mxu1 %v2323_v13  ;;  %s1835_s7 = scalar_lea.sflag [#allocation25], %s3682_s28  ;;  %s2954_s14 = scalar_lea.vmem %s4032_s13, 1024 }
 0x1da   : > { %2326 = vmatpush3.bf16.msra.mxu0 %v2323_v13  ;;  %2331 = vmatpush3.bf16.msra.mxu1 %v2323_v13  ;;  %v982_v47 = vrot.slane %v973_v46, %v981_v45  ;;  %v989_v54 = vrot.slane %v975_v50, %v981_v45  ;;  %v927_v13 = vld [vmem:[%s3709_s22 + $0x18] sm:$0xff]  ;;  %p2955_p4 = scmp.ne.s32.totalorder %s4032_s13, %s2954_s14  ;;  %p4248_p6 = scmp.ne.s32.totalorder %s4210_s27, 0 }
 0x1db   : > { %2303 = vmatprep.subr.mxu1 %v3777_v32  ;;  %s3136_s10 = smov [#allocation24]  }
 0x1dc   : > { %2272 = vmatmul.mubr.msk.f32.gmra.mrb[2].mxu0 %vm782_vm1, %v768_v6  ;;  %v990_v49 = vcombine.high %v982_v47, %v982_v47  ;;  %v998_v51 = vrot.slane %v982_v47, %v981_v45  ;;  %v1005_v58 = vrot.slane %v989_v54, %v981_v45  ;;  %v991_v0 = vcombine.high %v989_v54, %v989_v54  ;;  %v3815_v6 = vld [vmem:[%s3709_s22 + $0x20] sm:$0xff]  ;;  %v931_v47 = vld [vmem:[%s3709_s22 + $0x38] sm:$0xff]  ;;  %p2956_p9 = pnand %p2955_p4, %p4248_p6  ;;  %s2958_s5 = sshll.u32 %s3136_s10, 4  ;;  %s2959_s5 = int_to_ptr.vmem [resolvable:$false] %s2958_s5 }
 0x1dd   : > { %2274 = vmatprep.mubr.msk.f32.mxu0 %vm782_vm1, %v769_v7  ;;  %s2227_s0 = sshll.u32 %s4244_s1, 3  ;;  %s2228_s9 = sshll.u32 %s4245_s23, 4 }
 0x1de   : > { %v1012_v52 = vrot.slane %v990_v49, %v981_v45  ;;  %v1027_v55 = vrot.slane %v998_v51, %v1026_v53  ;;  %v1020_v56 = vcombine.high %v998_v51, %v998_v51  ;;  %v1043_v2 = vrot.slane %v1005_v58, %v1026_v53  ;;  %s1862_s3 = sadd.s32 %s2228_s9, %s2227_s0  ;;  %s4247_s8 = smov %s4246_s29 }
 0x1df   : > { %v1021_v3 = vcombine.high %v1005_v58, %v1005_v58  ;;  %v1141_v58 = vld [vmem:[%s3697_s24 + $0x20] sm:$0xff]  ;;  %s2229_s12 = sshll.u32 %s1862_s3, 7  ;;  %p2957_p0 = pneg %p2956_p9 }
 0x1e0   : > { %2275 = vmatmul.mubr.msk.f32.gmra.mrb[4].mxu0 %vm782_vm1, %v770_v8  ;;  %v1031_v57 = vrot.slane %v1012_v52, %v1026_v53  ;;  %v1064_v60 = vsub.f32 %v1027_v55, %v3804_v59  ;;  %v1035_v62 = vrot.slane %v1020_v56, %v1026_v53  ;;  %v1022_v63 = vcombine.high %v1012_v52, %v1012_v52  ;;  %v1137_v55 = vld [vmem:[%s3697_s24] sm:$0xff]  ;;  %v1139_v56 = vld [vmem:[%s3697_s24 + $0x10] sm:$0xff]  ;;  %s4037_s17 = scalar_lea.hbm %s4246_s29, %s2229_s12  ;;  %p2961_p12 = scmp.lt.s32.totalorder %s4032_s13, %s2959_s5 }
 0x1e1   : > { %2277 = vmatprep.mubr.msk.f32.mxu0 %vm782_vm1, %v771_v9  ;;  %v1019_v9 = vrot.slane %v991_v0, %v981_v45  ;;  %v1068_v11 = vsub.f32 %v1043_v2, %v3815_v6  ;;  %v1051_v12 = vrot.slane %v1021_v3, %v1026_v53  ;;  %v1144_v0 = vld [vmem:[%s3697_s24 + $0x38] sm:$0xff] }
 0x1e2   : > { %v1065_v1 = vsub.f32 %v1031_v57, %v3808_v61  ;;  %v1072_v5 = vand.u32 2147483647, %v1064_v60  ;;  %v1066_v7 = vsub.f32 %v1035_v62, %v3812_v4  ;;  %v1039_v8 = vrot.slane %v1022_v63, %v1026_v53  ;;  %v1140_v57 = vld [vmem:[%s3697_s24 + $0x18] sm:$0xff]  ;;  %v1138_v60 = vld [vmem:[%s3697_s24 + $0x8] sm:$0xff]  ;;  %v1143_v63 = vld [vmem:[%s3697_s24 + $0x30] sm:$0xff] }
 0x1e3   : > { %v1142_v62 = vld [vmem:[%s3697_s24 + $0x28] sm:$0xff]  ;;  %s2960_s24 = scalar_lea.vmem %s2959_s5, 2048 }
 0x1e4   : > { %2278 = vmatmul.mubr.msk.f32.gmra.mrb[6].mxu0 %vm782_vm1, %v772_v10  ;;  %v1073_v10 = vand.u32 2147483647, %v1065_v1  ;;  %p2962_p8 = scmp.lt.s32.totalorder %s2960_s24, %s2954_s14 }
 0x1e6   : > { %p2963_p7 = por %p2962_p8, %p2961_p12 }
 0x1e8   : > { %p2964_p10 = pnand %p2963_p7, %p2957_p0 }
 0x2ab   : > { %v2270_v15 = vpop.f32.mrb[0].mxu0 }
 0x2ac   : > { %v3751_v16 = vadd.f32 %v2270_v15, %v2192_v14  ;;  %v877_v17 = vpop.f32.mrb[1].mxu0  ;;  %v3822_v15 = vld [vmem:[%s3709_s22 + $0x30] sm:$0xff] }
 0x2ad   : > { %v3754_v19 = vadd.f32 %v2192_v14, %v877_v17  ;;  %v1074_v17 = vand.u32 2147483647, %v1066_v7 }
 0x2ae   : > { %v917_v18 = vmax.f32 %v3751_v16, 0.0  ;;  %v1579_v16 = vld [vmem:[#allocation17] sm:$0xff] }
 0x2af   : > { %v2273_v20 = vpop.f32.mrb[2].mxu0  ;;  %v916_v23 = vmax.f32 %v3754_v19, 0.0  ;;  %v1086_v39 = vsel %vm964_vm4, %v1074_v17, 0.0  ;;  %v3133_v19 = vmov 0.0|0.0  }
 0x2b0   : > { %v3756_v21 = vadd.f32 %v2273_v20, %v2192_v14  ;;  %942 = vrot.lane.b32.xlu1 %v917_v18, %s3130_s21  ;;  %v887_v22 = vpop.f32.mrb[3].mxu0  ;;  %v1067_v20 = vsub.f32 %v1039_v8, %v927_v13  ;;  %2327 = vmatprep.subr.bf16.mxu0 %v3133_v19 }
 0x2b1   : > { %v3763_v25 = vadd.f32 %v2192_v14, %v887_v22  ;;  %v1047_v22 = vrot.slane %v1019_v9, %v1026_v53 }
 0x2b2   : > { %v919_v24 = vmax.f32 %v3756_v21, 0.0  ;;  %v1075_v40 = vand.u32 2147483647, %v1067_v20 }
 0x2b3   : > { %v2276_v26 = vpop.f32.mrb[4].mxu0  ;;  %v918_v30 = vmax.f32 %v3763_v25, 0.0  ;;  %v1069_v43 = vsub.f32 %v1047_v22, %v929_v38 }
 0x2b4   : > { %946 = vrot.lane.b32.xlu0 %v919_v24, %s3130_s21  ;;  %940 = vrot.lane.b32.xlu1 %v916_v23, %s3130_s21  ;;  %v3771_v27 = vadd.f32 %v2276_v26, %v2192_v14  ;;  %v897_v28 = vpop.f32.mrb[5].mxu0  ;;  %v1023_v26 = vcombine.high %v1019_v9, %v1019_v9  ;;  %v1089_v48 = vsel %vm964_vm4, %v1075_v40, 0.0 }
 0x2b5   : > { %v3773_v29 = vadd.f32 %v2192_v14, %v897_v28  ;;  %v1083_v28 = vsel %vm964_vm4, %v1073_v10, 0.0  ;;  %v1077_v49 = vand.u32 2147483647, %v1069_v43 }
 0x2b6   : > { %v921_v31 = vmax.f32 %v3771_v27, 0.0  ;;  %v1055_v44 = vrot.slane %v1023_v26, %v1026_v53 }
 0x2b7   : > { %v2279_v33 = vpop.f32.mrb[6].mxu0  ;;  %v920_v34 = vmax.f32 %v3773_v29, 0.0  ;;  %v1095_v52 = vsel %vm964_vm4, %v1077_v49, 0.0 }
 0x2b8   : > { %944 = vrot.lane.b32.xlu0 %v918_v30, %s3130_s21  ;;  %v3784_v35 = vadd.f32 %v2279_v33, %v2192_v14  ;;  %v907_v36 = vpop.f32.mrb[7].mxu0  ;;  %950 = vrot.lane.b32.xlu1 %v921_v31, %s3130_s21  ;;  %v1076_v33 = vand.u32 2147483647, %v1068_v11  ;;  %v1071_v50 = vsub.f32 %v1055_v44, %v931_v47 }
 0x2b9   : > { %v3789_v37 = vadd.f32 %v2192_v14, %v907_v36  ;;  %v1080_v14 = vsel %vm964_vm4, %v1072_v5, 0.0  ;;  %v1070_v36 = vsub.f32 %v1051_v12, %v3822_v15 }
 0x2ba   : > { %v923_v41 = vmax.f32 %v3784_v35, 0.0  ;;  %v1092_v45 = vsel %vm964_vm4, %v1076_v33, 0.0  ;;  %v1079_v53 = vand.u32 2147483647, %v1071_v50 }
 0x2bb   : > { %v922_v42 = vmax.f32 %v3789_v37, 0.0  ;;  %v1078_v46 = vand.u32 2147483647, %v1070_v36 }
 0x2bc   : > { %948 = vrot.lane.b32.xlu0 %v920_v34, %s3130_s21  ;;  %954 = vrot.lane.b32.xlu1 %v923_v41, %s3130_s21  ;;  %v1101_v54 = vsel %vm964_vm4, %v1079_v53, 0.0 }
 0x2bd   : > { %v1098_v51 = vsel %vm964_vm4, %v1078_v46, 0.0 }
 0x2c0   : > { %952 = vrot.lane.b32.xlu0 %v922_v42, %s3130_s21 }
 0x2df   : > { %1081 = vadd.xlane.f32.xlu0 %v1080_v14 }
 0x2e0   : > { %1084 = vadd.xlane.f32.xlu1 %v1083_v28 }
 0x2e3   : > { %1087 = vadd.xlane.f32.xlu0 %v1086_v39 }
 0x2e4   : > { %1093 = vadd.xlane.f32.xlu1 %v1092_v45 }
 0x2e7   : > { %1090 = vadd.xlane.f32.xlu0 %v1089_v48 }
 0x2e8   : > { %1099 = vadd.xlane.f32.xlu1 %v1098_v51 }
 0x2eb   : > { %1096 = vadd.xlane.f32.xlu0 %v1095_v52 }
 0x2ef   : > { %1102 = vadd.xlane.f32.xlu0 %v1101_v54 }
 0x2f9   : > { %1148 = vperm.xlu1 %2531, %v1137_v55  }
 0x2fd   : > { %1158 = vperm.xlu1 %2531, %v1139_v56  }
 0x301   : > { %1163 = vperm.xlu1 %2531, %v1140_v57  }
 0x305   : > { %1168 = vperm.xlu1 %2531, %v1141_v58   ;;  %1153 = vperm.xlu0 %2532, %v1138_v60  }
 0x309   : > { %1173 = vperm.xlu1 %2531, %v1142_v62   ;;  %v2202_v62 = vld [vmem:[#allocation13] ss:$0 sm:$0xff] }
 0x30d   : > { %1178 = vperm.xlu1 %2531, %v1143_v63   ;;  %v2203_v63 = vld [vmem:[#allocation14] ss:$0 sm:$0xff] }
 0x311   : > { %1183 = vperm.xlu1 %2531, %v1144_v0  }
 0x322   : > { %v943_v1 = vpop.permute.xlu1 %942 }
 0x323   : > { %v3848_v7 = vsel %vm964_vm4, %v3808_v61, %v943_v1 }
 0x326   : > { %v947_v2 = vpop.permute.xlu0 %946  ;;  %v941_v3 = vpop.permute.xlu1 %940 }
 0x327   : > { %v3844_v5 = vsel %vm964_vm4, %v3804_v59, %v941_v3  ;;  %v3859_v11 = vsel %vm964_vm4, %v927_v13, %v947_v2 }
 0x328   : > { %2284 = vmatprep.mubr.msk.f32.mxu0 %vm1225_vm5, %v3844_v5 }
 0x329   : > { %2285 = vmatmul.mubr.msk.f32.vlgmr.msra.gmra.mrb[8].mxu0 %vm1225_vm5, %v3848_v7 }
 0x32a   : > { %v945_v8 = vpop.permute.xlu0 %944  ;;  %v951_v10 = vpop.permute.xlu1 %950 }
 0x32b   : > { %v3856_v9 = vsel %vm964_vm4, %v3812_v4, %v945_v8  ;;  %v3871_v4 = vsel %vm964_vm4, %v929_v38, %v951_v10 }
 0x32c   : > { %2287 = vmatprep.mubr.msk.f32.mxu1 %vm1225_vm5, %v3856_v9 }
 0x32d   : > { %2288 = vmatmul.mubr.msk.f32.vlgmr.msra.gmra.mrb[0].mxu1 %vm1225_vm5, %v3859_v11 }
 0x32e   : > { %v949_v59 = vpop.permute.xlu0 %948  ;;  %2304 = vmatpush3.msra.mxu1 %v3777_v32  ;;  %v955_v12 = vpop.permute.xlu1 %954 }
 0x32f   : > { %v3868_v61 = vsel %vm964_vm4, %v3815_v6, %v949_v59  ;;  %v3882_v32 = vsel %vm964_vm4, %v931_v47, %v955_v12 }
 0x330   : > { %2290 = vmatprep.mubr.msk.f32.mxu1 %vm1225_vm5, %v3868_v61 }
 0x331   : > { %2291 = vmatmul.mubr.msk.f32.gmra.mrb[2].mxu1 %vm1225_vm5, %v3871_v4 }
 0x332   : > { %v953_v13 = vpop.permute.xlu0 %952 }
 0x333   : > { %v3879_v14 = vsel %vm964_vm4, %v3822_v15, %v953_v13 }
 0x334   : > { %2293 = vmatprep.mubr.msk.f32.mxu1 %vm1225_vm5, %v3879_v14 }
 0x335   : > { %2294 = vmatmul.mubr.msk.f32.gmra.mrb[4].mxu1 %vm1225_vm5, %v3882_v32 }
 0x336   : > { %2305 = vmatprep.mubr.msk.f32.mxu1 %vm964_vm4, %v916_v23  ;;  %v3135_v23 = vmov 0.0  }
 0x337   : > { %2300 = vmatprep.mubr.msk.f32.mxu0 %vm3134_vm6, %v3135_v23 }
 0x339   : > { %2306 = vmatmul.mubr.msk.f32.vlgmr.msra.gmra.mrb[6].mxu1 %vm964_vm4, %v917_v18  ;;  %v1580_v18 = vld [vmem:[#allocation17 + $0x8] sm:$0xff] }
 0x33a   : > { %2308 = vmatprep.mubr.msk.f32.mxu1 %vm964_vm4, %v918_v30  ;;  %v2328_v21 = vpack.c.bf16 %v1580_v18, %v1579_v16 }
 0x33c   : > { %2329 = vmatpush3.bf16.msra.mxu0 %v2328_v21 }
 0x33d   : > { %2309 = vmatmul.mubr.msk.f32.gmra.mrb[8].mxu1 %vm964_vm4, %v919_v24 }
 0x33e   : > { %2311 = vmatprep.mubr.msk.f32.mxu1 %vm964_vm4, %v920_v34 }
 0x341   : > { %2312 = vmatmul.mubr.msk.f32.gmra.mrb[10].mxu1 %vm964_vm4, %v921_v31 }
 0x342   : > { %2314 = vmatprep.mubr.msk.f32.mxu1 %vm964_vm4, %v922_v42 }
 0x345   : > { %2315 = vmatmul.mubr.msk.f32.gmra.mrb[12].mxu1 %vm964_vm4, %v923_v41 }
 0x36c   : > { %v1082_v25 = vpop.xlane.xlu0 %1081 }
 0x36d   : > { %v1085_v24 = vpop.xlane.xlu1 %1084  ;;  %v1105_v35 = vmul.f32 0.125, %v1082_v25 }
 0x36e   : > { %v1106_v37 = vmul.f32 0.125, %v1085_v24 }
 0x36f   : > { %v1113_v17 = vsub.f32 0.0, %v1105_v35 }
 0x370   : > { %v1088_v29 = vpop.xlane.xlu0 %1087  ;;  %v1114_v41 = vsub.f32 0.0, %v1106_v37 }
 0x371   : > { %v1094_v27 = vpop.xlane.xlu1 %1093  ;;  %v1107_v20 = vmul.f32 0.125, %v1088_v29  ;;  %v1121_v36 = vmul.f32 1.442695, %v1113_v17 }
 0x372   : > { %v1123_v26 = vmul.f32 1.442695, %v1114_v41  ;;  %v1109_v28 = vmul.f32 0.125, %v1094_v27 }
 0x373   : > { %v1115_v38 = vsub.f32 0.0, %v1107_v20 }
 0x374   : > { %v1091_v31 = vpop.xlane.xlu0 %1090  ;;  %2534 = vpow2.f32 %v1123_v26  ;;  %v1117_v45 = vsub.f32 0.0, %v1109_v28 }
 0x375   : > { %v1100_v30 = vpop.xlane.xlu1 %1099  ;;  %v1108_v6 = vmul.f32 0.125, %v1091_v31  ;;  %2536 = vpow2.f32 %v1121_v36  ;;  %v1125_v48 = vmul.f32 1.442695, %v1115_v38 }
 0x376   : > { %v1111_v40 = vmul.f32 0.125, %v1100_v30  ;;  %v1129_v51 = vmul.f32 1.442695, %v1117_v45 }
 0x377   : > { %v1116_v33 = vsub.f32 0.0, %v1108_v6 }
 0x378   : > { %v1097_v42 = vpop.xlane.xlu0 %1096  ;;  %v1119_v49 = vsub.f32 0.0, %v1111_v40 }
 0x379   : > { %v1149_v34 = vpop.permute.xlu1 %1148  ;;  %v1110_v22 = vmul.f32 0.125, %v1097_v42  ;;  %v1127_v46 = vmul.f32 1.442695, %v1116_v33 }
 0x37a   : > { %v1133_v54 = vmul.f32 1.442695, %v1119_v49  ;;  %v1192_v3 = vmul.f32 %v2202_v62, %v1149_v34 }
 0x37b   : > { %v1118_v44 = vsub.f32 0.0, %v1110_v22  ;;  %2538 = vpow2.f32 %v1127_v46 }
 0x37c   : > { %v1103_v39 = vpop.xlane.xlu0 %1102  ;;  %2540 = vpow2.f32 %v1125_v48 }
 0x37d   : > { %v1159_v15 = vpop.permute.xlu1 %1158  ;;  %v1112_v47 = vmul.f32 0.125, %v1103_v39  ;;  %v1131_v50 = vmul.f32 1.442695, %v1118_v44 }
 0x37e   : > { %v2535_v56 = vpop.eup %2534  ;;  %v1194_v21 = vmul.f32 %v2202_v62, %v1159_v15 }
 0x37f   : > { %v1120_v52 = vsub.f32 0.0, %v1112_v47  ;;  %2542 = vpow2.f32 %v1131_v50  ;;  %v2537_v60 = vpop.eup %2536  ;;  %v1208_v1 = vmul.f32 %v2535_v56, %v2203_v63 }
 0x380   : > { %2544 = vpow2.f32 %v1129_v51  ;;  %v1207_v8 = vmul.f32 %v2537_v60, %v2203_v63 }
 0x381   : > { %v1164_v43 = vpop.permute.xlu1 %1163  ;;  %v1135_v55 = vmul.f32 1.442695, %v1120_v52  ;;  %2546 = vpow2.f32 %v1133_v54 }
 0x382   : > { %v1195_v13 = vmul.f32 %v2202_v62, %v1164_v43  ;;  %v1215_v24 = vadd.f32 %v1207_v8, %v1192_v3 }
 0x383   : > { %2548 = vpow2.f32 %v1135_v55 }
 0x384   : > { %v1154_v58 = vpop.permute.xlu0 %1153 }
 0x385   : > { %v1169_v53 = vpop.permute.xlu1 %1168  ;;  %v1193_v0 = vmul.f32 %v2202_v62, %v1154_v58  ;;  %v2539_v2 = vpop.eup %2538 }
 0x386   : > { %v2541_v10 = vpop.eup %2540  ;;  %v1210_v18 = vmul.f32 %v2539_v2, %v2203_v63  ;;  %v1196_v17 = vmul.f32 %v2202_v62, %v1169_v53 }
 0x387   : > { %v1216_v16 = vadd.f32 %v1208_v1, %v1193_v0  ;;  %v1209_v25 = vmul.f32 %v2541_v10, %v2203_v63 }
 0x388   : > { %v1218_v42 = vadd.f32 %v1210_v18, %v1195_v13 }
 0x389   : > { %v1174_v57 = vpop.permute.xlu1 %1173  ;;  %v2543_v12 = vpop.eup %2542  ;;  %v1217_v28 = vadd.f32 %v1209_v25, %v1194_v21 }
 0x38a   : > { %v2545_v19 = vpop.eup %2544  ;;  %v1197_v31 = vmul.f32 %v2202_v62, %v1174_v57  ;;  %v1212_v34 = vmul.f32 %v2543_v12, %v2203_v63 }
 0x38b   : > { %v2547_v30 = vpop.eup %2546  ;;  %v1211_v41 = vmul.f32 %v2545_v19, %v2203_v63 }
 0x38c   : > { %v1213_v39 = vmul.f32 %v2547_v30, %v2203_v63  ;;  %v1220_v45 = vadd.f32 %v1212_v34, %v1197_v31 }
 0x38d   : > { %v1179_v59 = vpop.permute.xlu1 %1178  ;;  %v2549_v6 = vpop.eup %2548  ;;  %v1219_v54 = vadd.f32 %v1211_v41, %v1196_v17 }
 0x38e   : > { %v1198_v40 = vmul.f32 %v2202_v62, %v1179_v59  ;;  %v1214_v49 = vmul.f32 %v2549_v6, %v2203_v63 }
 0x390   : > { %v1221_v1 = vadd.f32 %v1213_v39, %v1198_v40 }
 0x391   : > { %v1184_v20 = vpop.permute.xlu1 %1183 }
 0x392   : > { %v1199_v46 = vmul.f32 %v2202_v62, %v1184_v20 }
 0x394   : > { %v1222_v8 = vadd.f32 %v1214_v49, %v1199_v46 }
 0x3fc   : > { %v2286_v23 = vpop.f32.mrb[8].mxu0 }
 0x3fd   : > { %v3912_v27 = vadd.f32 %v2286_v23, %v1216_v16  ;;  %v1316_v29 = vpop.f32.mrb[9].mxu0 }
 0x3fe   : > { %v3914_v37 = vadd.f32 %v1316_v29, %v1215_v24 }
 0x3ff   : > { %v1370_v35 = vsel %vm1225_vm5, %v3912_v27, -inf }
 0x400   : > { %v1371_v15 = vrot.slane %v1370_v35, 4  ;;  %v1363_v22 = vsel %vm1225_vm5, %v3914_v37, -inf  ;;  %v2289_v26 = vpop.f32.mrb[0].mxu1 }
 0x401   : > { %v1364_v33 = vrot.slane %v1363_v22, 4  ;;  %v3920_v36 = vadd.f32 %v2289_v26, %v1218_v42  ;;  %v1326_v38 = vpop.f32.mrb[1].mxu1 }
 0x402   : > { %v1372_v43 = vmax.f32 %v1370_v35, %v1371_v15  ;;  %v3922_v44 = vadd.f32 %v1326_v38, %v1217_v28 }
 0x403   : > { %v1365_v47 = vmax.f32 %v1363_v22, %v1364_v33  ;;  %v1384_v48 = vsel %vm1225_vm5, %v3920_v36, -inf }
 0x404   : > { %v1373_v50 = vrot.slane %v1372_v43, 2  ;;  %v1385_v51 = vrot.slane %v1384_v48, 4  ;;  %v1377_v52 = vsel %vm1225_vm5, %v3922_v44, -inf  ;;  %v2292_v53 = vpop.f32.mrb[2].mxu1 }
 0x405   : > { %v1366_v55 = vrot.slane %v1365_v47, 2  ;;  %v1378_v56 = vrot.slane %v1377_v52, 4  ;;  %v3928_v57 = vadd.f32 %v2292_v53, %v1220_v45  ;;  %v1336_v58 = vpop.f32.mrb[3].mxu1 }
 0x406   : > { %v1374_v60 = vmax.f32 %v1372_v43, %v1373_v50  ;;  %v1386_v0 = vmax.f32 %v1384_v48, %v1385_v51  ;;  %v3930_v62 = vadd.f32 %v1336_v58, %v1219_v54  ;;  %v2214_v50 = vld [vmem:[#allocation22] ss:$0 sm:$0xff] }
 0x407   : > { %v1367_v2 = vmax.f32 %v1365_v47, %v1366_v55  ;;  %v1379_v3 = vmax.f32 %v1377_v52, %v1378_v56  ;;  %v1398_v63 = vsel %vm1225_vm5, %v3928_v57, -inf }
 0x408   : > { %v1375_v10 = vrot.slane %v1374_v60, 1  ;;  %v1387_v59 = vrot.slane %v1386_v0, 2  ;;  %v1399_v12 = vrot.slane %v1398_v63, 4  ;;  %v1391_v13 = vsel %vm1225_vm5, %v3930_v62, -inf  ;;  %v2295_v16 = vpop.f32.mrb[4].mxu1 }
 0x409   : > { %v1368_v18 = vrot.slane %v1367_v2, 1  ;;  %v1380_v19 = vrot.slane %v1379_v3, 2  ;;  %v1392_v21 = vrot.slane %v1391_v13, 4  ;;  %v3936_v23 = vadd.f32 %v2295_v16, %v1222_v8  ;;  %v1346_v24 = vpop.f32.mrb[5].mxu1 }
 0x40a   : > { %v1376_v25 = vmax.f32 %v1374_v60, %v1375_v10  ;;  %v1388_v29 = vmax.f32 %v1386_v0, %v1387_v59  ;;  %v1400_v30 = vmax.f32 %v1398_v63, %v1399_v12  ;;  %v3938_v31 = vadd.f32 %v1346_v24, %v1221_v1 }
 0x40b   : > { %v1369_v34 = vmax.f32 %v1367_v2, %v1368_v18  ;;  %v1381_v35 = vmax.f32 %v1379_v3, %v1380_v19  ;;  %v1393_v42 = vmax.f32 %v1391_v13, %v1392_v21  ;;  %v1412_v41 = vsel %vm1225_vm5, %v3936_v23, -inf }
 0x40c   : > { %v1420_v6 = vsub.f32 %v3912_v27, %v1376_v25  ;;  %v1389_v17 = vrot.slane %v1388_v29, 1  ;;  %v1401_v20 = vrot.slane %v1400_v30, 2  ;;  %v1413_v15 = vrot.slane %v1412_v41, 4  ;;  %v2307_v22 = vpop.f32.mrb[6].mxu1 }
 0x40d   : > { %v1419_v26 = vsub.f32 %v3914_v37, %v1369_v34  ;;  %v1382_v28 = vrot.slane %v1381_v35, 1  ;;  %v1394_v33 = vrot.slane %v1393_v42, 2  ;;  %v1405_v38 = vsel %vm1225_vm5, %v3938_v31, -inf  ;;  %v1774_v39 = vpop.f32.mrb[7].mxu1 }
 0x40e   : > { %v1429_v40 = vmul.f32 1.442695, %v1420_v6  ;;  %v1390_v43 = vmax.f32 %v1388_v29, %v1389_v17  ;;  %v1402_v45 = vmax.f32 %v1400_v30, %v1401_v20  ;;  %v1414_v46 = vmax.f32 %v1412_v41, %v1413_v15 }
 0x40f   : > { %v1427_v47 = vmul.f32 1.442695, %v1419_v26  ;;  %v1383_v48 = vmax.f32 %v1381_v35, %v1382_v28  ;;  %v1395_v49 = vmax.f32 %v1393_v42, %v1394_v33  ;;  %v1406_v27 = vrot.slane %v1405_v38, 4 }
 0x410   : > { %2550 = vpow2.f32 %v1429_v40  ;;  %v1422_v51 = vsub.f32 %v3920_v36, %v1390_v43  ;;  %v1403_v52 = vrot.slane %v1402_v45, 1  ;;  %v1415_v37 = vrot.slane %v1414_v46, 2  ;;  %v2310_v53 = vpop.f32.mrb[8].mxu1 }
 0x411   : > { %2552 = vpow2.f32 %v1427_v47  ;;  %v1421_v54 = vsub.f32 %v3922_v44, %v1383_v48  ;;  %v1396_v55 = vrot.slane %v1395_v49, 1  ;;  %v1407_v56 = vmax.f32 %v1405_v38, %v1406_v27  ;;  %v1784_v58 = vpop.f32.mrb[9].mxu1 }
 0x412   : > { %v1433_v60 = vmul.f32 1.442695, %v1422_v51  ;;  %v1404_v0 = vmax.f32 %v1402_v45, %v1403_v52  ;;  %v1416_v1 = vmax.f32 %v1414_v46, %v1415_v37  ;;  %v1780_v2 = vadd.f32 %v2307_v22, %v2214_v50 }
 0x413   : > { %v1431_v3 = vmul.f32 1.442695, %v1421_v54  ;;  %v1397_v63 = vmax.f32 %v1395_v49, %v1396_v55  ;;  %v1408_v8 = vrot.slane %v1407_v56, 2  ;;  %v1775_v10 = vadd.f32 %v2214_v50, %v1774_v39 }
 0x414   : > { %2554 = vpow2.f32 %v1433_v60  ;;  %v1424_v36 = vsub.f32 %v3928_v57, %v1404_v0  ;;  %v1417_v59 = vrot.slane %v1416_v1, 1  ;;  %v1814_v12 = vmax.f32 %v1780_v2, 0.0  ;;  %v2313_v13 = vpop.f32.mrb[10].mxu1 }
 0x415   : > { %2556 = vpow2.f32 %v1431_v3  ;;  %v1423_v44 = vsub.f32 %v3930_v62, %v1397_v63  ;;  %v1409_v16 = vmax.f32 %v1407_v56, %v1408_v8  ;;  %v1813_v18 = vmax.f32 %v1775_v10, 0.0  ;;  %v1794_v19 = vpop.f32.mrb[11].mxu1 }
 0x416   : > { %v1437_v21 = vmul.f32 1.442695, %v1424_v36  ;;  %v1418_v24 = vmax.f32 %v1416_v1, %v1417_v59  ;;  %1822 = vst.msk [vmem:[%s3951_s26 + $0x8] sm:$0xff] %vm964_vm4, %v1814_v12  ;;  %v1790_v25 = vadd.f32 %v2310_v53, %v2214_v50  ;;  %v1785_v29 = vadd.f32 %v2214_v50, %v1784_v58 }
 0x417   : > { %v1435_v57 = vmul.f32 1.442695, %v1423_v44  ;;  %v1410_v30 = vrot.slane %v1409_v16, 1  ;;  %1821 = vst.msk [vmem:[%s3951_s26] sm:$0xff] %vm964_vm4, %v1813_v18  ;;  %v1800_v62 = vadd.f32 %v2313_v13, %v2214_v50  ;;  %v1795_v34 = vadd.f32 %v2214_v50, %v1794_v19 }
 0x418   : > { %2558 = vpow2.f32 %v1437_v21  ;;  %v1426_v35 = vsub.f32 %v3936_v23, %v1418_v24  ;;  %v1816_v42 = vmax.f32 %v1790_v25, 0.0  ;;  %v1815_v41 = vmax.f32 %v1785_v29, 0.0  ;;  %v2316_v6 = vpop.f32.mrb[12].mxu1 }
 0x419   : > { %2560 = vpow2.f32 %v1435_v57  ;;  %v1411_v17 = vmax.f32 %v1409_v16, %v1410_v30  ;;  %v1818_v20 = vmax.f32 %v1800_v62, 0.0  ;;  %v1817_v15 = vmax.f32 %v1795_v34, 0.0  ;;  %v1804_v22 = vpop.f32.mrb[13].mxu1 }
 0x41a   : > { %v3958_v26 = vpop.eup %2550  ;;  %v1441_v28 = vmul.f32 1.442695, %v1426_v35  ;;  %1824 = vst.msk [vmem:[%s3951_s26 + $0x18] sm:$0xff] %vm964_vm4, %v1816_v42  ;;  %1823 = vst.msk [vmem:[%s3951_s26 + $0x10] sm:$0xff] %vm964_vm4, %v1815_v41  ;;  %v1810_v33 = vadd.f32 %v2316_v6, %v2214_v50  ;;  %v1805_v23 = vadd.f32 %v2214_v50, %v1804_v22 }
 0x41b   : > { %v3964_v38 = vpop.eup %2552  ;;  %v1450_v39 = vsel %vm1225_vm5, %v3958_v26, 0.0  ;;  %v1425_v40 = vsub.f32 %v3938_v31, %v1411_v17  ;;  %1826 = vst.msk [vmem:[%s3951_s26 + $0x28] sm:$0xff] %vm964_vm4, %v1818_v20  ;;  %1825 = vst.msk [vmem:[%s3951_s26 + $0x20] sm:$0xff] %vm964_vm4, %v1817_v15 }
 0x41c   : > { %v1451_v43 = vrot.slane %v1450_v39, 4  ;;  %v1443_v45 = vsel %vm1225_vm5, %v3964_v38, 0.0  ;;  %2562 = vpow2.f32 %v1441_v28  ;;  %v1820_v46 = vmax.f32 %v1810_v33, 0.0 }
 0x41d   : > { %v1444_v47 = vrot.slane %v1443_v45, 4  ;;  %v1439_v48 = vmul.f32 1.442695, %v1425_v40  ;;  %v1819_v49 = vmax.f32 %v1805_v23, 0.0 }
 0x41e   : > { %v3975_v27 = vpop.eup %2554  ;;  %v1452_v50 = vadd.f32 %v1451_v43, %v1450_v39  ;;  %1828 = vst.msk [vmem:[%s3951_s26 + $0x38] sm:$0xff] %vm964_vm4, %v1820_v46 }
 0x41f   : > { %v3979_v31 = vpop.eup %2556  ;;  %v1445_v51 = vadd.f32 %v1444_v47, %v1443_v45  ;;  %v1464_v52 = vsel %vm1225_vm5, %v3975_v27, 0.0  ;;  %2564 = vpow2.f32 %v1439_v48  ;;  %1827 = vst.msk [vmem:[%s3951_s26 + $0x30] sm:$0xff] %vm964_vm4, %v1819_v49 }
 0x420   : > { %v1453_v37 = vrot.slane %v1452_v50, 2  ;;  %v1465_v53 = vrot.slane %v1464_v52, 4  ;;  %v1457_v54 = vsel %vm1225_vm5, %v3979_v31, 0.0 }
 0x421   : > { %v1446_v55 = vrot.slane %v1445_v51, 2  ;;  %v1458_v56 = vrot.slane %v1457_v54, 4 }
 0x422   : > { %v3987_v58 = vpop.eup %2558  ;;  %v1454_v60 = vadd.f32 %v1453_v37, %v1452_v50  ;;  %v1466_v0 = vadd.f32 %v1465_v53, %v1464_v52 }
 0x423   : > { %v3989_v1 = vpop.eup %2560  ;;  %v1447_v2 = vadd.f32 %v1446_v55, %v1445_v51  ;;  %v1459_v3 = vadd.f32 %v1458_v56, %v1457_v54  ;;  %v1478_v63 = vsel %vm1225_vm5, %v3987_v58, 0.0 }
 0x424   : > { %v1455_v8 = vrot.slane %v1454_v60, 1  ;;  %v1467_v10 = vrot.slane %v1466_v0, 2  ;;  %v1479_v36 = vrot.slane %v1478_v63, 4  ;;  %v1471_v59 = vsel %vm1225_vm5, %v3989_v1, 0.0 }
 0x425   : > { %v1448_v12 = vrot.slane %v1447_v2, 1  ;;  %v1460_v13 = vrot.slane %v1459_v3, 2  ;;  %v1472_v44 = vrot.slane %v1471_v59, 4 }
 0x426   : > { %v3995_v16 = vpop.eup %2562  ;;  %v1456_v18 = vadd.f32 %v1455_v8, %v1454_v60  ;;  %v1468_v19 = vadd.f32 %v1467_v10, %v1466_v0  ;;  %v1480_v21 = vadd.f32 %v1479_v36, %v1478_v63 }
 0x427   : > { %v1449_v24 = vadd.f32 %v1448_v12, %v1447_v2  ;;  %v1461_v25 = vadd.f32 %v1460_v13, %v1459_v3  ;;  %v1473_v29 = vadd.f32 %v1472_v44, %v1471_v59  ;;  %v1492_v57 = vsel %vm1225_vm5, %v3995_v16, 0.0 }
 0x428   : > { %2566 = vrcp.f32 %v1456_v18  ;;  %v1469_v30 = vrot.slane %v1468_v19, 1  ;;  %v1481_v62 = vrot.slane %v1480_v21, 2  ;;  %v1493_v34 = vrot.slane %v1492_v57, 4 }
 0x429   : > { %v3999_v35 = vpop.eup %2564  ;;  %2568 = vrcp.f32 %v1449_v24  ;;  %v1462_v42 = vrot.slane %v1461_v25, 1  ;;  %v1474_v41 = vrot.slane %v1473_v29, 2 }
 0x42a   : > { %v1470_v6 = vadd.f32 %v1469_v30, %v1468_v19  ;;  %v1482_v17 = vadd.f32 %v1481_v62, %v1480_v21  ;;  %v1494_v20 = vadd.f32 %v1493_v34, %v1492_v57  ;;  %v1485_v15 = vsel %vm1225_vm5, %v3999_v35, 0.0 }
 0x42b   : > { %v1463_v22 = vadd.f32 %v1462_v42, %v1461_v25  ;;  %v1475_v28 = vadd.f32 %v1474_v41, %v1473_v29  ;;  %v1486_v33 = vrot.slane %v1485_v15, 4 }
 0x42c   : > { %2570 = vrcp.f32 %v1470_v6  ;;  %v1483_v23 = vrot.slane %v1482_v17, 1  ;;  %v1495_v39 = vrot.slane %v1494_v20, 2 }
 0x42d   : > { %2572 = vrcp.f32 %v1463_v22  ;;  %v1476_v40 = vrot.slane %v1475_v28, 1  ;;  %v1487_v43 = vadd.f32 %v1486_v33, %v1485_v15 }
 0x42e   : > { %v1484_v45 = vadd.f32 %v1483_v23, %v1482_v17  ;;  %v1496_v46 = vadd.f32 %v1495_v39, %v1494_v20 }
 0x42f   : > { %v1477_v47 = vadd.f32 %v1476_v40, %v1475_v28  ;;  %v1488_v48 = vrot.slane %v1487_v43, 2 }
 0x430   : > { %2574 = vrcp.f32 %v1484_v45  ;;  %v1497_v49 = vrot.slane %v1496_v46, 1 }
 0x431   : > { %2576 = vrcp.f32 %v1477_v47  ;;  %v1489_v50 = vadd.f32 %v1488_v48, %v1487_v43 }
 0x432   : > { %v2567_v51 = vpop.eup %2566  ;;  %v1498_v52 = vadd.f32 %v1497_v49, %v1496_v46 }
 0x433   : > { %v2569_v37 = vpop.eup %2568  ;;  %v1508_v53 = vmul.f32 %v2567_v51, %v3958_v26  ;;  %v1490_v54 = vrot.slane %v1489_v50, 1 }
 0x434   : > { %v1507_v55 = vmul.f32 %v2569_v37, %v3964_v38  ;;  %2578 = vrcp.f32 %v1498_v52 }
 0x435   : > { %v1516_v56 = vmul.f32 %v1508_v53, %v3848_v7  ;;  %v1491_v60 = vadd.f32 %v1490_v54, %v1489_v50 }
 0x436   : > { %v2571_v0 = vpop.eup %2570  ;;  %v1515_v2 = vmul.f32 %v1507_v55, %v3844_v5 }
 0x437   : > { %v2573_v3 = vpop.eup %2572  ;;  %v1530_v63 = vsel %vm1225_vm5, %v1516_v56, 0.0  ;;  %v1510_v8 = vmul.f32 %v2571_v0, %v3975_v27  ;;  %2580 = vrcp.f32 %v1491_v60 }
 0x438   : > { %v1531_v10 = vrot.slane %v1530_v63, 4  ;;  %v1523_v36 = vsel %vm1225_vm5, %v1515_v2, 0.0  ;;  %v1509_v26 = vmul.f32 %v2573_v3, %v3979_v31 }
 0x439   : > { %v1524_v59 = vrot.slane %v1523_v36, 4  ;;  %v1518_v38 = vmul.f32 %v1510_v8, %v3859_v11 }
 0x43a   : > { %v2575_v12 = vpop.eup %2574  ;;  %v1532_v7 = vadd.f32 %v1531_v10, %v1530_v63  ;;  %v1517_v13 = vmul.f32 %v1509_v26, %v3856_v9 }
 0x43b   : > { %v2577_v44 = vpop.eup %2576  ;;  %v1525_v5 = vadd.f32 %v1524_v59, %v1523_v36  ;;  %v1544_v18 = vsel %vm1225_vm5, %v1518_v38, 0.0  ;;  %v1512_v19 = vmul.f32 %v2575_v12, %v3987_v58 }
 0x43c   : > { %v1533_v27 = vrot.slane %v1532_v7, 2  ;;  %v1545_v21 = vrot.slane %v1544_v18, 4  ;;  %v1537_v24 = vsel %vm1225_vm5, %v1517_v13, 0.0  ;;  %v1511_v25 = vmul.f32 %v2577_v44, %v3989_v1 }
 0x43d   : > { %v1526_v31 = vrot.slane %v1525_v5, 2  ;;  %v1538_v29 = vrot.slane %v1537_v24, 4  ;;  %v1520_v11 = vmul.f32 %v1512_v19, %v3871_v4 }
 0x43e   : > { %v2579_v57 = vpop.eup %2578  ;;  %v1534_v30 = vadd.f32 %v1533_v27, %v1532_v7  ;;  %v1546_v62 = vadd.f32 %v1545_v21, %v1544_v18  ;;  %v1519_v9 = vmul.f32 %v1511_v25, %v3868_v61 }
 0x43f   : > { %v1527_v34 = vadd.f32 %v1526_v31, %v1525_v5  ;;  %v1539_v42 = vadd.f32 %v1538_v29, %v1537_v24  ;;  %v1558_v58 = vsel %vm1225_vm5, %v1520_v11, 0.0  ;;  %v1514_v41 = vmul.f32 %v2579_v57, %v3995_v16 }
 0x440   : > { %v1535_v6 = vrot.slane %v1534_v30, 1  ;;  %v1547_v17 = vrot.slane %v1546_v62, 2  ;;  %v1559_v20 = vrot.slane %v1558_v58, 4  ;;  %v1551_v1 = vsel %vm1225_vm5, %v1519_v9, 0.0 }
 0x441   : > { %v2581_v15 = vpop.eup %2580  ;;  %v1528_v22 = vrot.slane %v1527_v34, 1  ;;  %v1540_v4 = vrot.slane %v1539_v42, 2  ;;  %v1552_v28 = vrot.slane %v1551_v1, 4  ;;  %v1522_v33 = vmul.f32 %v1514_v41, %v3882_v32 }
 0x442   : > { %v1536_v23 = vadd.f32 %v1535_v6, %v1534_v30  ;;  %v1513_v61 = vmul.f32 %v2581_v15, %v3999_v35  ;;  %v1548_v39 = vadd.f32 %v1547_v17, %v1546_v62  ;;  %v1560_v40 = vadd.f32 %v1559_v20, %v1558_v58 }
 0x443   : > { %v1529_v43 = vadd.f32 %v1528_v22, %v1527_v34  ;;  %v1541_v45 = vadd.f32 %v1540_v4, %v1539_v42  ;;  %v1553_v46 = vadd.f32 %v1552_v28, %v1551_v1  ;;  %v1572_v16 = vsel %vm1225_vm5, %v1522_v33, 0.0 }
 0x444   : > { %v1521_v47 = vmul.f32 %v1513_v61, %v3879_v14  ;;  %v1549_v48 = vrot.slane %v1548_v39, 1  ;;  %v1561_v49 = vrot.slane %v1560_v40, 2  ;;  %v1573_v50 = vrot.slane %v1572_v16, 4 }
 0x445   : > { %v1542_v51 = vrot.slane %v1541_v45, 1  ;;  %v1554_v52 = vrot.slane %v1553_v46, 2  ;;  %v1597_v37 = vsel %vm1596_vm7, %v1536_v23, %v1529_v43 }
 0x446   : > { %v1562_v32 = vadd.f32 %v1561_v49, %v1560_v40  ;;  %v1565_v53 = vsel %vm1225_vm5, %v1521_v47, 0.0  ;;  %v1574_v35 = vadd.f32 %v1573_v50, %v1572_v16  ;;  %v1550_v60 = vadd.f32 %v1549_v48, %v1548_v39 }
 0x447   : > { %v1543_v54 = vadd.f32 %v1542_v51, %v1541_v45  ;;  %v1555_v55 = vadd.f32 %v1554_v52, %v1553_v46  ;;  %v1566_v56 = vrot.slane %v1565_v53, 4 }
 0x448   : > { %v1563_v0 = vrot.slane %v1562_v32, 1  ;;  %v1575_v2 = vrot.slane %v1574_v35, 2 }
 0x449   : > { %v1556_v14 = vrot.slane %v1555_v55, 1  ;;  %v1567_v3 = vadd.f32 %v1566_v56, %v1565_v53  ;;  %v1599_v63 = vsel %vm1598_vm8, %v1543_v54, %v1597_v37 }
 0x44a   : > { %v1576_v8 = vadd.f32 %v1575_v2, %v1574_v35  ;;  %v1601_v10 = vsel %vm1600_vm9, %v1550_v60, %v1599_v63  ;;  %v1564_v59 = vadd.f32 %v1563_v0, %v1562_v32 }
 0x44b   : > { %v1557_v36 = vadd.f32 %v1556_v14, %v1555_v55  ;;  %v1568_v26 = vrot.slane %v1567_v3, 2 }
 0x44c   : > { %v1577_v7 = vrot.slane %v1576_v8, 1 }
 0x44d   : > { %v1569_v38 = vadd.f32 %v1568_v26, %v1567_v3  ;;  %v1603_v12 = vsel %vm1602_vm10, %v1557_v36, %v1601_v10 }
 0x44e   : > { %v1605_v13 = vsel %vm1604_vm11, %v1564_v59, %v1603_v12  ;;  %v1578_v18 = vadd.f32 %v1577_v7, %v1576_v8 }
 0x44f   : > { %v1570_v44 = vrot.slane %v1569_v38, 1 }
 0x451   : > { %v1571_v5 = vadd.f32 %v1570_v44, %v1569_v38 }
 0x453   : > { %v1607_v19 = vsel %vm1606_vm12, %v1571_v5, %v1605_v13 }
 0x454   : > { %v1609_v27 = vsel %vm1608_vm13, %v1578_v18, %v1607_v19 }
 0x455   : > { %2301 = vmatmul.mubr.msk.f32.vlgmr.msra.gmra.mrb[10].mxu0 %vm1225_vm5, %v1609_v27 }
 0x456   : > { %2967 = shalt.err (!%p2964_p10)
}
 0x457   : > { %s2968_s25 = scalar_lea.hbm %s4037_s17, 1024  ;;  %s2972_s26 = scalar_lea.hbm %s4247_s8, 4096 }
 0x458   : > { %p2969_p3 = scmp.ne.s32.totalorder %s4037_s17, %s2968_s25  ;;  %p2973_p11 = scmp.lt.u32.totalorder %s4037_s17, %s4247_s8 }
 0x459   : > { %p2974_p5 = scmp.lt.u32.totalorder %s2972_s26, %s2968_s25  ;;  %p2976_p4 = scmp.lt.u32.totalorder %s2968_s25, %s4037_s17 }
 0x45a   : > { %p2970_p13 = pnand %p2969_p3, %p4248_p6 }
 0x45b   : > { %p2975_p1 = por %p2974_p5, %p2973_p11 }
 0x45c   : > { %p2971_p2 = pneg %p2970_p13 }
 0x45d   : > { %p2977_p9 = por %p2976_p4, %p2975_p1 }
 0x45f   : > { %p2978_p0 = pnand %p2977_p9, %p2971_p2 }
 0x461   : > { %2981 = shalt.err (!%p2978_p0)
}
 0x462   : > { %s3137_s3 = smov 128   ;;  %s2225_s12 = sshll.u32 %s4245_s23, 1  ;;  %v2212_v21 = vld [vmem:[#allocation19] ss:$0 sm:$0xff] }
 0x463   : > { %2377 = dma.vmem_to_hbm [thread:$0]  (%p4248_p6), %s4032_s13, 1024, %s4037_s17, %s1835_s7, %s3137_s3, %s3137_s3, %s3130_s21  }
 0x464   : > { %s1846_s16 = sadd.s32 %s4244_s1, %s2225_s12  ;;  %s753_s29 = scalar_lea.vmem [#allocation23], %s2179_s4 }
 0x465   : > { %s2226_s15 = sshll.u32 %s1846_s16, 7  ;;  %s1850_s14 = sshll.u32 %s753_s29, 4  ;;  %s4073_s14 = int_to_ptr.vmem [resolvable:$true] %s1850_s14 }
 0x466   : > { %s4249_s24 = sld [smem:[#allocation58_spill]]  ;;  %s1830_s21 = scalar_lea.sflag [#allocation4], %s3682_s28 }
 0x467   : > { %s2982_s1 = scalar_lea.vmem %s4073_s14, 128  ;;  %s3138_s4 = smov [#allocation23]  }
 0x468   : > { %p2983_p12 = scmp.ne.s32.totalorder %s4073_s14, %s2982_s1  ;;  %s2986_s23 = sshll.u32 %s3138_s4, 4  ;;  %s2987_s23 = int_to_ptr.vmem [resolvable:$false] %s2986_s23 }
 0x469   : > { %s2988_s13 = scalar_lea.vmem %s2987_s23, 256  ;;  %p2989_p10 = scmp.lt.s32.totalorder %s4073_s14, %s2987_s23 }
 0x46a   : > { %p2984_p8 = pnand %p2983_p12, %p4248_p6  ;;  %p2990_p3 = scmp.lt.s32.totalorder %s2988_s13, %s2982_s1 }
 0x46c   : > { %s4071_s25 = scalar_lea.hbm %s4249_s24, %s2226_s15  ;;  %p2985_p7 = pneg %p2984_p8 }
 0x46d   : > { %p2991_p13 = por %p2990_p3, %p2989_p10 }
 0x46f   : > { %p2992_p2 = pnand %p2991_p13, %p2985_p7 }
 0x528   : > { %v1678_v24 = vpop.f32.mrb[10].mxu0 }
 0x529   : > { %v1679_v25 = vadd.f32 %v2212_v21, %v1678_v24  ;;  %v2302_v31 = vpop.f32.mrb[11].mxu0 }
 0x52b   : > { %v1682_v29 = vmax.f32 %v1679_v25, 0.0 }
 0x52d   : > { %1683 = vst.msk [vmem:[%s753_s29] sm:$0xff] %vm964_vm4, %v1682_v29 }
 0x52e   : > { %2995 = shalt.err (!%p2992_p2)
}
 0x52f   : > { %s2996_s28 = scalar_lea.hbm %s4071_s25, 128  ;;  %s3000_s2 = scalar_lea.hbm %s4249_s24, 512 }
 0x530   : > { %p2997_p11 = scmp.ne.s32.totalorder %s4071_s25, %s2996_s28  ;;  %p3001_p4 = scmp.lt.u32.totalorder %s4071_s25, %s4249_s24 }
 0x531   : > { %p3002_p9 = scmp.lt.u32.totalorder %s3000_s2, %s2996_s28  ;;  %p3004_p12 = scmp.lt.u32.totalorder %s2996_s28, %s4071_s25 }
 0x532   : > { %p2998_p5 = pnand %p2997_p11, %p4248_p6 }
 0x533   : > { %p3003_p0 = por %p3002_p9, %p3001_p4 }
 0x534   : > { %p2999_p1 = pneg %p2998_p5 }
 0x535   : > { %p3005_p8 = por %p3004_p12, %p3003_p0 }
 0x537   : > { %p3006_p7 = pnand %p3005_p8, %p2999_p1 }
 0x539   : > { %3009 = shalt.err (!%p3006_p7)
}
 0x53a   : > { %2376 = dma.vmem_to_hbm [thread:$0]  (%p4248_p6), %s4073_s14, 128, %s4071_s25, %s1830_s21  }
 0x53b PF: > { %s4250_s0 = sld [smem:[#allocation36_spill]]  ;;  %s4251_s9 = sld [smem:[#allocation43_spill]] }
 0x53c   : > { %p2447_p10 = scmp.ge.s32.totalorder %s3112_s20, 2 }
 0x541   : > { %s1880_s3 = sand.u32 1, %s4250_s0   ;;  %p4252_p3 = scmp.ne.s32.totalorder %s4251_s9, 0 }
 0x542   : > { %s1881_s12 = scalar_lea.sflag [#allocation4], %s1880_s3 }
 0x543   : > { %p2422_p13 = pnand %p2447_p10, %p4252_p3 }
 0x545   : > { %3075 = dma.done.wait (!%p2422_p13), %s1881_s12, 128  }
 0x546   : > { %3077 = vsyncadd (!%p2422_p13), %s1881_s12, 4294967168  ;;  %s1890_s16 = scalar_lea.sflag [#allocation25], %s1880_s3 }
 0x547   : > { %3079 = dma.done.wait (!%p2422_p13), %s1890_s16, 1024  }
 0x548   : > { %3081 = vsyncadd (!%p2422_p13), %s1890_s16, 4294966272  ;;  %s44_s20 = sadd.s32 1, %s3112_s20   ;;  %s4253_s27 = sld [smem:[#allocation37_spill]] }
 0x549   : > { %p41_p2 = scmp.ge.s32.totalorder %s44_s20, 6   ;;  %s4254_s15 = sld [smem:[#allocation44_spill]] }
 0x54a   : > { %s4255_s14 = sld [smem:[#allocation41_spill]]  ;;  %s4256_s10 = sld [smem:[#allocation42_spill]] }
 0x54b   : > { %s4257_s29 = smov %s3088_s30  ;;  %s4259_s16 = smov %s3104_s18 }
 0x54c   : > { %s4260_s17 = smov %s3108_s19  ;;  %43 = sbr.rel (!%p41_p2) target bundleno = 33 (0x21), region = 207 }
 0x54e   : > { %s4258_s30 = smov %s4253_s27 }
 0x550   : > { %s4261_s18 = smov %s4255_s14  ;;  %s4262_s19 = smov %s4256_s10 }
 0x553   :  { %1895 = vsyncpa [#allocation3], 1 }
 0x554   :  { %1897 = vsyncpa [#allocation3 + $0x1], 1 }
 0x555   :  { %1898 = vsyncpa [#allocation6], 1 }
 0x556   :  { %1900 = vsyncpa [#allocation6 + $0x1], 1 }
 0x557   :  { %1901 = vsyncpa [#allocation9], 1 }
 0x558   :  { %1903 = vsyncpa [#allocation9 + $0x1], 1 }
 0x559   :  { %1904 = vsyncpa [#allocation12], 1 }
 0x55a   :  { %1905 = vsyncpa [#allocation15], 1 }
 0x55b   :  { %1906 = vsyncpa [#allocation18], 1 }
 0x55c   :  { %1907 = vsyncpa [#allocation21], 1 }
 0x55d   :  { %1908 = vsyncpa [#allocation4], 1 }
 0x55e   :  { %1910 = vsyncpa [#allocation4 + $0x1], 1 }
 0x55f   :  { %1911 = vsyncpa [#allocation25], 1 }
 0x560   :  { %1913 = vsyncpa [#allocation25 + $0x1], 1 }

// kernel: lfa_forward.5
= control target key start
LH: loop header
LB: loop body
LE: loop exit
PB: predicated region body
PF: predicated region fallthrough
CT: control target
= control target key end

     0   :  { %s4878_s0 = inlined_call_operand.hbm [shape: f32[2,16,8], index: 0, kind: input, shape index: {}]   ;;  %s4879_s1 = inlined_call_operand.hbm [shape: f32[2,16,8,8], index: 1, kind: input, shape index: {}]   ;;  %s4880_s2 = inlined_call_operand.hbm [shape: f32[2,16,8,8], index: 2, kind: input, shape index: {}]   ;;  %s4881_s3 = inlined_call_operand.hbm [shape: f32[2,16,8,1], index: 3, kind: input, shape index: {}]   ;;  %s4882_s4 = inlined_call_operand.hbm [shape: f32[2,16,1], index: 4, kind: input, shape index: {}]   ;;  %s4883_s5 = inlined_call_operand.hbm [shape: f32[2,16,3], index: 5, kind: input, shape index: {}]   ;;  %s4884_s6 = inlined_call_operand.hbm [shape: f32[2,16,32], index: 6, kind: input, shape index: {}]   ;;  %s4885_s7 = inlined_call_operand.hbm [shape: f32[1,16], index: 7, kind: input, shape index: {}]   ;;  %s4886_s8 = inlined_call_operand.hbm [shape: f32[1,16], index: 8, kind: input, shape index: {}]   ;;  %s4887_s9 = inlined_call_operand.hbm [shape: f32[16,16], index: 9, kind: input, shape index: {}]   ;;  %s4888_s10 = inlined_call_operand.hbm [shape: f32[16,16], index: 10, kind: input, shape index: {}]   ;;  %s4889_s11 = inlined_call_operand.hbm [shape: f32[1,16], index: 11, kind: input, shape index: {}]   ;;  %s4890_s12 = inlined_call_operand.hbm [shape: f32[16,32], index: 12, kind: input, shape index: {}]   ;;  %s4891_s13 = inlined_call_operand.hbm [shape: f32[1,32], index: 13, kind: input, shape index: {}]   ;;  %s4892_s14 = inlined_call_operand.hbm [shape: f32[3,32], index: 14, kind: input, shape index: {}]   ;;  %s4893_s15 = inlined_call_operand.hbm [shape: f32[1,32], index: 15, kind: input, shape index: {}]   ;;  %s4894_s16 = inlined_call_operand.hbm [shape: f32[1,32], index: 16, kind: input, shape index: {}]   ;;  %s4895_s17 = inlined_call_operand.hbm [shape: f32[32,32], index: 17, kind: input, shape index: {}]   ;;  %s4896_s18 = inlined_call_operand.hbm [shape: f32[32,32], index: 18, kind: input, shape index: {}]   ;;  %s4897_s19 = inlined_call_operand.hbm [shape: f32[1,32], index: 19, kind: input, shape index: {}]   ;;  %s4898_s20 = inlined_call_operand.hbm [shape: f32[2,16,32], index: 20, kind: output, shape index: {}]  }
   0x1   :  { %4949 = sst [smem:[#allocation61_spill]] %s4878_s0 }
   0x2   :  { %4950 = sst [smem:[#allocation62_spill]] %s4879_s1 }
   0x3   :  { %4951 = sst [smem:[#allocation63_spill]] %s4880_s2 }
   0x4   :  { %4952 = sst [smem:[#allocation64_spill]] %s4881_s3 }
   0x5   :  { %4953 = sst [smem:[#allocation65_spill]] %s4882_s4 }
   0x6   :  { %4954 = sst [smem:[#allocation66_spill]] %s4883_s5 }
   0x7   :  { %4955 = sst [smem:[#allocation67_spill]] %s4884_s6 }
   0x8   :  { %4956 = sst [smem:[#allocation68_spill]] %s4885_s7 }
   0x9   :  { %4957 = sst [smem:[#allocation69_spill]] %s4886_s8 }
   0xa   :  { %4958 = sst [smem:[#allocation70_spill]] %s4887_s9 }
   0xb   :  { %4959 = sst [smem:[#allocation71_spill]] %s4888_s10 }
   0xc   :  { %4960 = sst [smem:[#allocation72_spill]] %s4889_s11 }
   0xd   :  { %4961 = sst [smem:[#allocation73_spill]] %s4890_s12 }
   0xe   :  { %4962 = sst [smem:[#allocation74_spill]] %s4891_s13 }
   0xf   :  { %4963 = sst [smem:[#allocation75_spill]] %s4892_s14 }
  0x10   :  { %4964 = sst [smem:[#allocation76_spill]] %s4893_s15 }
  0x11   :  { %4965 = sst [smem:[#allocation77_spill]] %s4894_s16 }
  0x12   :  { %4966 = sst [smem:[#allocation78_spill]] %s4895_s17 }
  0x13   :  { %4967 = sst [smem:[#allocation79_spill]] %s4896_s18 }
  0x14   :  { %4968 = sst [smem:[#allocation80_spill]] %s4897_s19 }
  0x15   :  { %4969 = sst [smem:[#allocation81_spill]] %s4898_s20 }
  0x16   :  { %25 = vsyncpa [#allocation3], 0 }
  0x17   :  { %27 = vsyncpa [#allocation3 + $0x1], 0 }
  0x18   :  { %28 = vsyncpa [#allocation6], 0 }
  0x19   :  { %30 = vsyncpa [#allocation6 + $0x1], 0 }
  0x1a   :  { %31 = vsyncpa [#allocation9], 0 }
  0x1b   :  { %33 = vsyncpa [#allocation9 + $0x1], 0 }
  0x1c   :  { %34 = vsyncpa [#allocation12], 0 }
  0x1d   :  { %36 = vsyncpa [#allocation12 + $0x1], 0 }
  0x1e   :  { %37 = vsyncpa [#allocation15], 0 }
  0x1f   :  { %38 = vsyncpa [#allocation18], 0 }
  0x20   :  { %39 = vsyncpa [#allocation21], 0 }
  0x21   :  { %40 = vsyncpa [#allocation24], 0 }
  0x22   :  { %41 = vsyncpa [#allocation27], 0 }
  0x23   :  { %42 = vsyncpa [#allocation30], 0 }
  0x24   :  { %43 = vsyncpa [#allocation33], 0 }
  0x25   :  { %44 = vsyncpa [#allocation4], 0 }
  0x26   :  { %46 = vsyncpa [#allocation4 + $0x1], 0  ;;  %s3914_s1 = smov 0   ;;  %s3916_s22 = smov 0  }
  0x27   :  { %s3918_s23 = smov 0   ;;  %s3920_s24 = smov 0  }
  0x28   :  { %s3922_s2 = smov 0   ;;  %s3924_s25 = smov 0  }
  0x29   :  { %s3926_s3 = smov 0   ;;  %s3928_s26 = smov 0  }
  0x2a LB: > { %4970 = sst [smem:[#allocation47_spill]] %s3750_s1  ;;  %s3955_s27 = sadd.s32 4294967295, %s3778_s26   ;;  %s3778_s26 = sphi %s3928_s26, %s52_s26   ;;  %s3774_s3 = sphi %s3926_s3, %s5062_s3   ;;  %s3770_s25 = sphi %s3924_s25, %s5066_s25   ;;  %s3766_s2 = sphi %s3922_s2, %s5060_s2   ;;  %s3762_s24 = sphi %s3920_s24, %s5065_s24   ;;  %s3758_s23 = sphi %s3918_s23, %s5059_s23   ;;  %s3754_s22 = sphi %s3916_s22, %s5064_s22   ;;  %s3750_s1 = sphi %s3914_s1, %s5063_s1  }
  0x2b   : > { %4971 = sst [smem:[#allocation48_spill]] %s3758_s23  ;;  %p2574_p0 = scmp.ge.s32.totalorder %s3778_s26, 1 }
  0x2c   : > { %4972 = sst [smem:[#allocation49_spill]] %s3762_s24  ;;  %p4909_p1 = scmp.eq.s32.totalorder %s3955_s27, 0 }
  0x2d   : > { %4973 = sst [smem:[#allocation50_spill]] %s3766_s2  ;;  %p566_p2 = scmp.lt.s32.totalorder %s3778_s26, 5 }
  0x2e   : > { %4974 = sst [smem:[#allocation51_spill]] %s3774_s3  ;;  %s3780_s4 = smov [#allocation14]  }
  0x2f   : > { %4975 = sst [smem:[#allocation52_spill]] %s3778_s26  ;;  %p3960_p3 = pnand %p2574_p0, %p566_p2 }
  0x30   : > { %4976 = sst [smem:[#allocation53_spill]] %s3955_s27  ;;  %s579_s29 = sshll.u32 %s3780_s4, 4  ;;  %s580_s29 = int_to_ptr.vmem [resolvable:$true] %s579_s29 }
  0x31   : > { %s4977_s28 = scalar_select %p3960_p3, 1, 0 }
  0x32   : > { %p2836_p4 = pneg %p3960_p3  ;;  %s3781_s30 = smov [#allocation17]  }
  0x33   : > { %4978 = sst [smem:[#allocation54_spill]] %s4977_s28  ;;  %s600_s0 = sshll.u32 %s3781_s30, 4  ;;  %s3972_s0 = int_to_ptr.vmem [resolvable:$true] %s600_s0 }
  0x34   : > { %p3968_p5 = pnand %p2836_p4, %p4909_p1  ;;  %s3782_s20 = smov [#allocation20]  }
  0x35   : > { %s3974_s24 = sshll.u32 %s3782_s20, 4  ;;  %s4980_s7 = sld [smem:[#allocation68_spill]]  ;;  %s628_s24 = int_to_ptr.vmem [resolvable:$true] %s3974_s24 }
  0x36   : > { %s4979_s21 = scalar_select %p3968_p5, 1, 0 }
  0x37   : > { %p3984_p7 = pneg %p3968_p5 }
  0x39   : > { %s4981_s30 = scalar_select %p3984_p7, 1, 0 }
  0x3b   : > { %s3066_s4 = scalar_lea.hbm %s4980_s7, 16 }
  0x3c   : > { %p3067_p6 = scmp.ne.s32.totalorder %s4980_s7, %s3066_s4  ;;  %p3073_p10 = scmp.lt.u32.totalorder %s3066_s4, %s4980_s7 }
  0x3e   : > { %p3069_p8 = pnand %p3984_p7, %p3067_p6 }
  0x40   : > { %p3070_p9 = pneg %p3069_p8 }
  0x42   : > { %p3075_p11 = pnand %p3073_p10, %p3070_p9 }
  0x44   : > { %3078 = shalt.err (!%p3075_p11)
}
  0x45   : > { %s3079_s6 = scalar_lea.vmem %s580_s29, 16  ;;  %s3086_s19 = scalar_lea.vmem %s580_s29, 32 }
  0x46   : > { %p3080_p12 = scmp.ne.s32.totalorder %s580_s29, %s3079_s6  ;;  %p3087_p2 = scmp.lt.s32.totalorder %s580_s29, %s580_s29 }
  0x47   : > { %p3088_p4 = scmp.lt.s32.totalorder %s3086_s19, %s3079_s6 }
  0x48   : > { %p3082_p13 = pnand %p3080_p12, %p3984_p7 }
  0x49   : > { %p3089_p1 = por %p3088_p4, %p3087_p2 }
  0x4a   : > { %p3083_p0 = pneg %p3082_p13 }
  0x4c   : > { %p3090_p3 = pnand %p3089_p1, %p3083_p0 }
  0x4e   : > { %3093 = shalt.err (!%p3090_p3)
}
  0x4f   : > { %2839 = dma.hbm_to_vmem [thread:$0]  (!%p3968_p5), %s4980_s7, 16, %s580_s29, [#allocation15]  }
  0x50   : > { %s4982_s9 = sld [smem:[#allocation70_spill]] }
  0x56   : > { %s3094_s20 = scalar_lea.hbm %s4982_s9, 256 }
  0x57   : > { %p3095_p6 = scmp.ne.s32.totalorder %s4982_s9, %s3094_s20  ;;  %p3101_p1 = scmp.lt.u32.totalorder %s3094_s20, %s4982_s9 }
  0x59   : > { %p3097_p8 = pnand %p3095_p6, %p3984_p7 }
  0x5b   : > { %p3098_p9 = pneg %p3097_p8 }
  0x5d   : > { %p3103_p3 = pnand %p3101_p1, %p3098_p9 }
  0x5f   : > { %3106 = shalt.err (!%p3103_p3)
}
  0x60   : > { %s3107_s29 = scalar_lea.vmem %s3972_s0, 256  ;;  %p3115_p13 = scmp.lt.s32.totalorder %s3972_s0, %s3972_s0 }
  0x61   : > { %p3108_p10 = scmp.ne.s32.totalorder %s3972_s0, %s3107_s29  ;;  %p3116_p0 = scmp.lt.s32.totalorder %s3107_s29, %s3107_s29 }
  0x63   : > { %p3110_p11 = pnand %p3108_p10, %p3984_p7  ;;  %p3117_p2 = por %p3116_p0, %p3115_p13 }
  0x65   : > { %p3111_p12 = pneg %p3110_p11 }
  0x67   : > { %p3118_p4 = pnand %p3117_p2, %p3111_p12 }
  0x69   : > { %3121 = shalt.err (!%p3118_p4)
}
  0x6a   : > { %s4913_s14 = smov 128   ;;  %s4915_s16 = smov 8  }
  0x6b   : > { %2845 = dma.hbm_to_vmem [thread:$0]  (!%p3968_p5), %s4982_s9, 256, %s3972_s0, [#allocation18], %s4913_s14, %s4913_s14, %s4915_s16  }
  0x6c   : > { %s4983_s11 = sld [smem:[#allocation72_spill]] }
  0x72   : > { %s3122_s20 = scalar_lea.hbm %s4983_s11, 16 }
  0x73   : > { %p3123_p6 = scmp.ne.s32.totalorder %s4983_s11, %s3122_s20  ;;  %p3129_p1 = scmp.lt.u32.totalorder %s3122_s20, %s4983_s11 }
  0x75   : > { %p3125_p8 = pnand %p3123_p6, %p3984_p7 }
  0x77   : > { %p3126_p9 = pneg %p3125_p8 }
  0x79   : > { %p3131_p3 = pnand %p3129_p1, %p3126_p9 }
  0x7b   : > { %3134 = shalt.err (!%p3131_p3)
}
  0x7c   : > { %s3135_s2 = scalar_lea.vmem %s628_s24, 16  ;;  %s3142_s0 = scalar_lea.vmem %s628_s24, 32 }
  0x7d   : > { %p3136_p10 = scmp.ne.s32.totalorder %s628_s24, %s3135_s2  ;;  %p3143_p13 = scmp.lt.s32.totalorder %s628_s24, %s628_s24 }
  0x7e   : > { %p3144_p0 = scmp.lt.s32.totalorder %s3142_s0, %s3135_s2 }
  0x7f   : > { %p3138_p11 = pnand %p3136_p10, %p3984_p7 }
  0x80   : > { %p3145_p2 = por %p3144_p0, %p3143_p13 }
  0x81   : > { %p3139_p12 = pneg %p3138_p11 }
  0x83   : > { %p3146_p4 = pnand %p3145_p2, %p3139_p12 }
  0x85   : > { %3149 = shalt.err (!%p3146_p4)
}
  0x86   : > { %2851 = dma.hbm_to_vmem [thread:$0]  (!%p3968_p5), %s4983_s11, 16, %s628_s24, [#allocation21]  }
  0x87   : > { %s3785_s7 = smov [#allocation23]   ;;  %s3786_s20 = smov [#allocation26]  }
  0x88   : > { %s651_s4 = sshll.u32 %s3785_s7, 4  ;;  %s673_s6 = sshll.u32 %s3786_s20, 4  ;;  %s652_s4 = int_to_ptr.vmem [resolvable:$true] %s651_s4  ;;  %s674_s6 = int_to_ptr.vmem [resolvable:$true] %s673_s6 }
  0x89   : > { %s4984_s13 = sld [smem:[#allocation74_spill]] }
  0x8f   : > { %s3150_s14 = scalar_lea.hbm %s4984_s13, 16 }
  0x90   : > { %p3151_p6 = scmp.ne.s32.totalorder %s4984_s13, %s3150_s14  ;;  %p3157_p1 = scmp.lt.u32.totalorder %s3150_s14, %s4984_s13 }
  0x92   : > { %p3153_p8 = pnand %p3151_p6, %p3984_p7 }
  0x94   : > { %p3154_p9 = pneg %p3153_p8 }
  0x96   : > { %p3159_p3 = pnand %p3157_p1, %p3154_p9 }
  0x98   : > { %3162 = shalt.err (!%p3159_p3)
}
  0x99   : > { %s3163_s24 = scalar_lea.vmem %s652_s4, 16  ;;  %s3170_s18 = scalar_lea.vmem %s652_s4, 32 }
  0x9a   : > { %p3164_p10 = scmp.ne.s32.totalorder %s652_s4, %s3163_s24  ;;  %p3171_p13 = scmp.lt.s32.totalorder %s652_s4, %s652_s4 }
  0x9b   : > { %p3172_p0 = scmp.lt.s32.totalorder %s3170_s18, %s3163_s24 }
  0x9c   : > { %p3166_p11 = pnand %p3164_p10, %p3984_p7 }
  0x9d   : > { %p3173_p2 = por %p3172_p0, %p3171_p13 }
  0x9e   : > { %p3167_p12 = pneg %p3166_p11 }
  0xa0   : > { %p3174_p4 = pnand %p3173_p2, %p3167_p12 }
  0xa2   : > { %3177 = shalt.err (!%p3174_p4)
}
  0xa3   : > { %2857 = dma.hbm_to_vmem [thread:$0]  (!%p3968_p5), %s4984_s13, 16, %s652_s4, [#allocation24]  }
  0xa4   : > { %s4985_s15 = sld [smem:[#allocation76_spill]] }
  0xaa   : > { %s3178_s19 = scalar_lea.hbm %s4985_s15, 16 }
  0xab   : > { %p3179_p6 = scmp.ne.s32.totalorder %s4985_s15, %s3178_s19  ;;  %p3185_p1 = scmp.lt.u32.totalorder %s3178_s19, %s4985_s15 }
  0xad   : > { %p3181_p8 = pnand %p3179_p6, %p3984_p7 }
  0xaf   : > { %p3182_p9 = pneg %p3181_p8 }
  0xb1   : > { %p3187_p3 = pnand %p3185_p1, %p3182_p9 }
  0xb3   : > { %3190 = shalt.err (!%p3187_p3)
}
  0xb4   : > { %s3191_s24 = scalar_lea.vmem %s674_s6, 16  ;;  %s3198_s4 = scalar_lea.vmem %s674_s6, 32 }
  0xb5   : > { %p3192_p10 = scmp.ne.s32.totalorder %s674_s6, %s3191_s24  ;;  %p3199_p13 = scmp.lt.s32.totalorder %s674_s6, %s674_s6 }
  0xb6   : > { %p3200_p0 = scmp.lt.s32.totalorder %s3198_s4, %s3191_s24 }
  0xb7   : > { %p3194_p11 = pnand %p3192_p10, %p3984_p7 }
  0xb8   : > { %p3201_p2 = por %p3200_p0, %p3199_p13 }
  0xb9   : > { %p3195_p12 = pneg %p3194_p11 }
  0xbb   : > { %p3202_p4 = pnand %p3201_p2, %p3195_p12 }
  0xbd   : > { %3205 = shalt.err (!%p3202_p4)
}
  0xbe   : > { %2863 = dma.hbm_to_vmem [thread:$0]  (!%p3968_p5), %s4985_s15, 16, %s674_s6, [#allocation27]  }
  0xbf   : > { %s3787_s20 = smov [#allocation29]   ;;  %s4986_s17 = sld [smem:[#allocation78_spill]] }
  0xc0   : > { %s694_s14 = sshll.u32 %s3787_s20, 4  ;;  %s695_s14 = int_to_ptr.vmem [resolvable:$true] %s694_s14 }
  0xc5   : > { %s3206_s29 = scalar_lea.hbm %s4986_s17, 512 }
  0xc6   : > { %p3207_p6 = scmp.ne.s32.totalorder %s4986_s17, %s3206_s29  ;;  %p3213_p1 = scmp.lt.u32.totalorder %s3206_s29, %s4986_s17 }
  0xc8   : > { %p3209_p8 = pnand %p3207_p6, %p3984_p7 }
  0xca   : > { %p3210_p9 = pneg %p3209_p8 }
  0xcc   : > { %p3215_p3 = pnand %p3213_p1, %p3210_p9 }
  0xce   : > { %3218 = shalt.err (!%p3215_p3)
}
  0xcf   : > { %s3219_s6 = scalar_lea.vmem %s695_s14, 512  ;;  %p3227_p13 = scmp.lt.s32.totalorder %s695_s14, %s695_s14 }
  0xd0   : > { %p3220_p10 = scmp.ne.s32.totalorder %s695_s14, %s3219_s6  ;;  %p3228_p0 = scmp.lt.s32.totalorder %s3219_s6, %s3219_s6 }
  0xd2   : > { %p3222_p11 = pnand %p3220_p10, %p3984_p7  ;;  %p3229_p2 = por %p3228_p0, %p3227_p13 }
  0xd4   : > { %p3223_p12 = pneg %p3222_p11 }
  0xd6   : > { %p3230_p4 = pnand %p3229_p2, %p3223_p12 }
  0xd8   : > { %3233 = shalt.err (!%p3230_p4)
}
  0xd9   : > { %s4987_s4 = smov 8   ;;  %s4988_s18 = smov 128  }
  0xda   : > { %2869 = dma.hbm_to_vmem [thread:$0]  (!%p3968_p5), %s4986_s17, 512, %s695_s14, [#allocation30], %s4988_s18, %s4988_s18, %s4987_s4  }
  0xdb   : > { %s2573_s16 = sadd.s32 4294967294, %s3778_s26   ;;  %s61_s19 = sadd.s32 1, %s3770_s25 }
  0xdc   : > { %p62_p6 = scmp.ge.s32.totalorder %s61_s19, 2  ;;  %s64_s29 = sadd.s32 1, %s3774_s3 }
  0xdd   : > { %s73_s2 = sadd.s32 1, %s3758_s23  ;;  %p80_p8 = scmp.ne.s32.totalorder %s3758_s23, %s3754_s22 }
  0xde   : > { %s5068_s19 = smov (%p62_p6, %s61_s19), 0  ;;  %s5070_s29 = smov (!%p62_p6, %s64_s29), %s3774_s3 }
  0xdf   : > { %4989 = sst [smem:[#allocation55_spill]] %s5068_s19  ;;  %s69_s0 = ssub.s32 %s3770_s25, %s5068_s19 }
  0xe0   : > { %p81_p9 = scmp.eq.s32.totalorder %s3778_s26, 0  ;;  %p66_p1 = scmp.ge.s32.totalorder %s5070_s29, 2 }
  0xe1   : > { %p86_p3 = scmp.ne.s32.totalorder %s3754_s22, %s3750_s1  ;;  %p553_p11 = scmp.eq.s32.totalorder %s3955_s27, 3 }
  0xe2   : > { %p82_p10 = por %p81_p9, %p80_p8  ;;  %s5072_s29 = smov (%p66_p1, %s5070_s29), 0 }
  0xe3   : > { %4990 = sst [smem:[#allocation56_spill]] %s5072_s29  ;;  %p4991_p12 = scmp.eq.s32.totalorder %s3955_s27, 0 }
  0xe4   : > { %p4125_p0 = por %p553_p11, %p80_p8  ;;  %s68_s24 = ssub.s32 %s3774_s3, %s5072_s29 }
  0xe5   : > { %p4121_p13 = por %p4991_p12, %p86_p3  ;;  %p559_p2 = scmp.eq.s32.totalorder %s2573_s16, 3 }
  0xe6   : > { %s4994_s28 = scalar_select %p4125_p0, 1, 0 }
  0xe7   : > { %s4992_s14 = scalar_select %p4121_p13, 1, 0 }
  0xe8   : > { %4995 = sst [smem:[#allocation58_spill]] %s4994_s28  ;;  %s70_s6 = sor.u32 %s69_s0, %s68_s24 }
  0xe9   : > { %4993 = sst [smem:[#allocation57_spill]] %s4992_s14  ;;  %p2915_p4 = scmp.lt.s32.totalorder %s3778_s26, 4 }
  0xea   : > { %p71_p6 = scmp.eq.s32.totalorder %s70_s6, 0  ;;  %p4132_p9 = por %p559_p2, %p86_p3 }
  0xeb   : > { %s4137_s20 = sand.u32 1, %s3758_s23   ;;  %p4139_p1 = pnand %p2915_p4, %p82_p10 }
  0xec   : > { %s4996_s7 = scalar_select %p4132_p9, 1, 0 }
  0xed   : > { %s4998_s9 = scalar_select %p4139_p1, 1, 0 }
  0xee   : > { %4997 = sst [smem:[#allocation59_spill]] %s4996_s7  ;;  %s4147_s13 = sand.u32 1, %s3778_s26  }
  0xef   : > { %s4144_s11 = scalar_select %p71_p6, %s3758_s23, %s73_s2  }
  0xf0   : > { %s4150_s16 = sshll.u32 %s4137_s20, 6  ;;  %s2593_s0 = sshll.u32 %s3770_s25, 3 }
  0xf1   : > { %4999 = sst [smem:[#allocation60_spill]] %s4144_s11  ;;  %s2594_s24 = sshll.u32 %s3774_s3, 4 }
  0xf2   : > { %s756_s6 = scalar_lea.vmem [#allocation5], %s4150_s16  ;;  %s762_s17 = sadd.s32 %s2594_s24, %s2593_s0 }
  0xf3   : > { %s765_s15 = sshll.u32 %s756_s6, 4  ;;  %s4157_s29 = sshll.u32 %s762_s17, 7  ;;  %s4155_s15 = int_to_ptr.vmem [resolvable:$true] %s765_s15 }
  0xf4   : > { %s5000_s2 = sld [smem:[#allocation62_spill]]  ;;  %s4933_s23 = scalar_lea.sflag [#allocation6], %s4147_s13 }
  0xf5   : > { %p4170_p3 = pneg %p4139_p1 }
  0xf7   : > { %s5002_s0 = scalar_select %p4170_p3, 1, 0 }
  0xfa   : > { %s5001_s28 = smov %s5000_s2  ;;  %s4163_s11 = scalar_lea.hbm %s5000_s2, %s4157_s29 }
  0xfb   : > { %s3234_s1 = scalar_lea.hbm %s4163_s11, 1024  ;;  %s3239_s7 = scalar_lea.hbm %s5001_s28, 4096 }
  0xfc   : > { %p3235_p8 = scmp.ne.s32.totalorder %s4163_s11, %s3234_s1  ;;  %p3240_p12 = scmp.lt.u32.totalorder %s4163_s11, %s5001_s28 }
  0xfd   : > { %p3241_p2 = scmp.lt.u32.totalorder %s3239_s7, %s3234_s1  ;;  %p3243_p6 = scmp.lt.u32.totalorder %s3234_s1, %s4163_s11 }
  0xfe   : > { %p3237_p10 = pnand %p4170_p3, %p3235_p8 }
  0xff   : > { %p3242_p4 = por %p3241_p2, %p3240_p12 }
 0x100   : > { %p3238_p11 = pneg %p3237_p10 }
 0x101   : > { %p3244_p9 = por %p3243_p6, %p3242_p4 }
 0x103   : > { %p3245_p0 = pnand %p3244_p9, %p3238_p11 }
 0x105   : > { %3248 = shalt.err (!%p3245_p0)
}
 0x106   : > { %s3249_s2 = scalar_lea.vmem %s4155_s15, 1024  ;;  %s3788_s17 = smov [#allocation5]  }
 0x107   : > { %p3250_p8 = scmp.ne.s32.totalorder %s4155_s15, %s3249_s2  ;;  %s3254_s19 = sshll.u32 %s3788_s17, 4  ;;  %s3255_s19 = int_to_ptr.vmem [resolvable:$false] %s3254_s19 }
 0x108   : > { %s3256_s24 = scalar_lea.vmem %s3255_s19, 2048  ;;  %p3257_p5 = scmp.lt.s32.totalorder %s4155_s15, %s3255_s19 }
 0x109   : > { %p3252_p10 = pnand %p3250_p8, %p4170_p3  ;;  %p3258_p7 = scmp.lt.s32.totalorder %s3256_s24, %s3249_s2 }
 0x10b   : > { %p3253_p13 = pneg %p3252_p10  ;;  %p3259_p12 = por %p3258_p7, %p3257_p5 }
 0x10d   : > { %p3260_p2 = pnand %p3259_p12, %p3253_p13 }
 0x10f   : > { %3263 = shalt.err (!%p3260_p2)
}
 0x110   : > { %2882 = dma.hbm_to_vmem [thread:$0]  (!%p4139_p1), %s4163_s11, 1024, %s4155_s15, %s4933_s23, %s4988_s18, %s4988_s18, %s4987_s4  }
 0x111   : > { %s5003_s6 = sld [smem:[#allocation64_spill]]  ;;  %s802_s17 = scalar_lea.vmem [#allocation8], %s4150_s16 }
 0x112   : > { %s811_s19 = sshll.u32 %s802_s17, 4  ;;  %s4208_s24 = sshll.u32 %s4137_s20, 3  ;;  %s4205_s19 = int_to_ptr.vmem [resolvable:$true] %s811_s19 }
 0x113   : > { %s4939_s28 = scalar_lea.sflag [#allocation9], %s4147_s13 }
 0x117   : > { %s4202_s2 = scalar_lea.hbm %s5003_s6, %s4157_s29  ;;  %s3269_s1 = scalar_lea.hbm %s5003_s6, 4096 }
 0x118   : > { %s3264_s26 = scalar_lea.hbm %s4202_s2, 1024  ;;  %p3270_p0 = scmp.lt.u32.totalorder %s4202_s2, %s5003_s6 }
 0x119   : > { %p3265_p5 = scmp.ne.s32.totalorder %s4202_s2, %s3264_s26  ;;  %p3271_p9 = scmp.lt.u32.totalorder %s3269_s1, %s3264_s26 }
 0x11a   : > { %p3273_p4 = scmp.lt.u32.totalorder %s3264_s26, %s4202_s2 }
 0x11b   : > { %p3267_p7 = pnand %p3265_p5, %p4170_p3  ;;  %p3272_p11 = por %p3271_p9, %p3270_p0 }
 0x11d   : > { %p3268_p13 = pneg %p3267_p7  ;;  %p3274_p6 = por %p3273_p4, %p3272_p11 }
 0x11f   : > { %p3275_p8 = pnand %p3274_p6, %p3268_p13 }
 0x121   : > { %3278 = shalt.err (!%p3275_p8)
}
 0x122   : > { %s3279_s17 = scalar_lea.vmem %s4205_s19, 1024  ;;  %s3789_s11 = smov [#allocation8]  }
 0x123   : > { %p3280_p10 = scmp.ne.s32.totalorder %s4205_s19, %s3279_s17  ;;  %s3284_s15 = sshll.u32 %s3789_s11, 4  ;;  %s3285_s15 = int_to_ptr.vmem [resolvable:$false] %s3284_s15 }
 0x124   : > { %s3286_s23 = scalar_lea.vmem %s3285_s15, 2048  ;;  %p3287_p5 = scmp.lt.s32.totalorder %s4205_s19, %s3285_s15 }
 0x125   : > { %p3282_p12 = pnand %p3280_p10, %p4170_p3  ;;  %p3288_p7 = scmp.lt.s32.totalorder %s3286_s23, %s3279_s17 }
 0x127   : > { %p3283_p2 = pneg %p3282_p12  ;;  %p3289_p0 = por %p3288_p7, %p3287_p5 }
 0x129   : > { %p3290_p9 = pnand %p3289_p0, %p3283_p2 }
 0x12b   : > { %3293 = shalt.err (!%p3290_p9)
}
 0x12c   : > { %2888 = dma.hbm_to_vmem [thread:$0]  (!%p4139_p1), %s4202_s2, 1024, %s4205_s19, %s4939_s28, %s4988_s18, %s4988_s18, %s4987_s4  }
 0x12d   : > { %s2590_s26 = sshll.u32 %s3774_s3, 1  ;;  %s845_s17 = scalar_lea.vmem [#allocation11], %s4208_s24 }
 0x12e   : > { %s741_s1 = sadd.s32 %s3770_s25, %s2590_s26  ;;  %s854_s11 = sshll.u32 %s845_s17, 4  ;;  %s855_s11 = int_to_ptr.vmem [resolvable:$true] %s854_s11 }
 0x12f   : > { %s4239_s7 = sshll.u32 %s741_s1, 7  ;;  %s5004_s5 = sld [smem:[#allocation66_spill]] }
 0x130   : > { %s4944_s27 = scalar_lea.sflag [#allocation12], %s4147_s13 }
 0x135   : > { %s4246_s6 = scalar_lea.hbm %s5004_s5, %s4239_s7  ;;  %s3299_s26 = scalar_lea.hbm %s5004_s5, 512 }
 0x136   : > { %s3294_s14 = scalar_lea.hbm %s4246_s6, 128  ;;  %p3300_p6 = scmp.lt.u32.totalorder %s4246_s6, %s5004_s5 }
 0x137   : > { %p3295_p13 = scmp.ne.s32.totalorder %s4246_s6, %s3294_s14  ;;  %p3301_p8 = scmp.lt.u32.totalorder %s3299_s26, %s3294_s14 }
 0x138   : > { %p3303_p12 = scmp.lt.u32.totalorder %s3294_s14, %s4246_s6 }
 0x139   : > { %p3297_p11 = pnand %p3295_p13, %p4170_p3  ;;  %p3302_p10 = por %p3301_p8, %p3300_p6 }
 0x13b   : > { %p3298_p4 = pneg %p3297_p11  ;;  %p3304_p2 = por %p3303_p12, %p3302_p10 }
 0x13d   : > { %p3305_p5 = pnand %p3304_p2, %p3298_p4 }
 0x13f   : > { %3308 = shalt.err (!%p3305_p5)
}
 0x140   : > { %s3309_s15 = scalar_lea.vmem %s855_s11, 128  ;;  %s3790_s23 = smov [#allocation11]  }
 0x141   : > { %p3310_p7 = scmp.ne.s32.totalorder %s855_s11, %s3309_s15  ;;  %s3314_s28 = sshll.u32 %s3790_s23, 4  ;;  %s3315_s28 = int_to_ptr.vmem [resolvable:$false] %s3314_s28 }
 0x142   : > { %s3316_s2 = scalar_lea.vmem %s3315_s28, 256  ;;  %p3317_p13 = scmp.lt.s32.totalorder %s855_s11, %s3315_s28 }
 0x143   : > { %p3312_p0 = pnand %p3310_p7, %p4170_p3  ;;  %p3318_p11 = scmp.lt.s32.totalorder %s3316_s2, %s3309_s15 }
 0x145   : > { %p3313_p9 = pneg %p3312_p0  ;;  %p3319_p1 = por %p3318_p11, %p3317_p13 }
 0x147   : > { %p3320_p6 = pnand %p3319_p1, %p3313_p9 }
 0x149   : > { %3323 = shalt.err (!%p3320_p6)
}
 0x14a   : > { %p5005_p8 = scmp.ne.s32.totalorder %s4998_s9, 0  ;;  %s3791_s14 = smov [#allocation16]  }
 0x14b   : > { %s590_s19 = sshll.u32 %s3791_s14, 4  ;;  %s3792_s26 = smov [#allocation19]   ;;  %s591_s19 = int_to_ptr.vmem [resolvable:$true] %s590_s19 }
 0x14c   : > { %2894 = dma.hbm_to_vmem [thread:$0]  (!%p5005_p8), %s4246_s6, 128, %s855_s11, %s4944_s27  }
 0x14d   : > { %s613_s1 = sshll.u32 %s3792_s26, 4  ;;  %s5006_s8 = sld [smem:[#allocation69_spill]]  ;;  %s4268_s1 = int_to_ptr.vmem [resolvable:$true] %s613_s1 }
 0x14e   : > { %p5007_p4 = scmp.ne.s32.totalorder %s4981_s30, 0 }
 0x153   : > { %s3324_s15 = scalar_lea.hbm %s5006_s8, 16 }
 0x154   : > { %p3325_p1 = scmp.ne.s32.totalorder %s5006_s8, %s3324_s15  ;;  %p3331_p2 = scmp.lt.u32.totalorder %s3324_s15, %s5006_s8 }
 0x156   : > { %p3327_p10 = pnand %p3325_p1, %p5007_p4 }
 0x158   : > { %p3328_p12 = pneg %p3327_p10 }
 0x15a   : > { %p3333_p5 = pnand %p3331_p2, %p3328_p12 }
 0x15c   : > { %3336 = shalt.err (!%p3333_p5)
}
 0x15d   : > { %s3337_s11 = scalar_lea.vmem %s591_s19, 16  ;;  %s3344_s14 = scalar_lea.vmem %s591_s19, 32 }
 0x15e   : > { %p3338_p7 = scmp.ne.s32.totalorder %s591_s19, %s3337_s11  ;;  %p3345_p13 = scmp.lt.s32.totalorder %s591_s19, %s591_s19 }
 0x15f   : > { %p3346_p11 = scmp.lt.s32.totalorder %s3344_s14, %s3337_s11 }
 0x160   : > { %p3340_p0 = pnand %p3338_p7, %p5007_p4 }
 0x161   : > { %p3347_p6 = por %p3346_p11, %p3345_p13 }
 0x162   : > { %p3341_p9 = pneg %p3340_p0 }
 0x164   : > { %p3348_p8 = pnand %p3347_p6, %p3341_p9 }
 0x166   : > { %3351 = shalt.err (!%p3348_p8)
}
 0x167   : > { %p5008_p1 = scmp.ne.s32.totalorder %s4979_s21, 0  ;;  %s5009_s10 = sld [smem:[#allocation71_spill]] }
 0x169   : > { %2842 = dma.hbm_to_vmem [thread:$0]  (!%p5008_p1), %s5006_s8, 16, %s591_s19, [#allocation15]  }
 0x16d   : > { %s3352_s15 = scalar_lea.hbm %s5009_s10, 256 }
 0x16e   : > { %p3353_p10 = scmp.ne.s32.totalorder %s5009_s10, %s3352_s15  ;;  %p3359_p8 = scmp.lt.u32.totalorder %s3352_s15, %s5009_s10 }
 0x170   : > { %p3355_p12 = pnand %p3353_p10, %p5007_p4 }
 0x172   : > { %p3356_p2 = pneg %p3355_p12 }
 0x174   : > { %p3361_p5 = pnand %p3359_p8, %p3356_p2 }
 0x176   : > { %3364 = shalt.err (!%p3361_p5)
}
 0x177   : > { %s3365_s19 = scalar_lea.vmem %s4268_s1, 256  ;;  %p3373_p13 = scmp.lt.s32.totalorder %s4268_s1, %s4268_s1 }
 0x178   : > { %p3366_p7 = scmp.ne.s32.totalorder %s4268_s1, %s3365_s19  ;;  %p3374_p11 = scmp.lt.s32.totalorder %s3365_s19, %s3365_s19 }
 0x17a   : > { %p3368_p0 = pnand %p3366_p7, %p5007_p4  ;;  %p3375_p6 = por %p3374_p11, %p3373_p13 }
 0x17c   : > { %p3369_p9 = pneg %p3368_p0 }
 0x17e   : > { %p3376_p10 = pnand %p3375_p6, %p3369_p9 }
 0x180   : > { %3379 = shalt.err (!%p3376_p10)
}
 0x181   : > { %2848 = dma.hbm_to_vmem [thread:$0]  (!%p5008_p1), %s5009_s10, 256, %s4268_s1, [#allocation18], %s4988_s18, %s4988_s18, %s4987_s4  }
 0x182   : > { %s3793_s17 = smov [#allocation22]   ;;  %s3794_s28 = smov [#allocation25]  }
 0x183   : > { %s637_s5 = sshll.u32 %s3793_s17, 4  ;;  %s662_s15 = sshll.u32 %s3794_s28, 4  ;;  %s638_s5 = int_to_ptr.vmem [resolvable:$true] %s637_s5  ;;  %s4314_s15 = int_to_ptr.vmem [resolvable:$true] %s662_s15 }
 0x184   : > { %s5010_s12 = sld [smem:[#allocation73_spill]] }
 0x18a   : > { %s3380_s6 = scalar_lea.hbm %s5010_s12, 256 }
 0x18b   : > { %p3381_p12 = scmp.ne.s32.totalorder %s5010_s12, %s3380_s6  ;;  %p3387_p5 = scmp.lt.u32.totalorder %s3380_s6, %s5010_s12 }
 0x18d   : > { %p3383_p2 = pnand %p3381_p12, %p5007_p4 }
 0x18f   : > { %p3384_p8 = pneg %p3383_p2 }
 0x191   : > { %p3389_p7 = pnand %p3387_p5, %p3384_p8 }
 0x193   : > { %3392 = shalt.err (!%p3389_p7)
}
 0x194   : > { %s3393_s26 = scalar_lea.vmem %s638_s5, 256  ;;  %p3401_p11 = scmp.lt.s32.totalorder %s638_s5, %s638_s5 }
 0x195   : > { %p3394_p0 = scmp.ne.s32.totalorder %s638_s5, %s3393_s26  ;;  %p3402_p6 = scmp.lt.s32.totalorder %s3393_s26, %s3393_s26 }
 0x197   : > { %p3396_p9 = pnand %p3394_p0, %p5007_p4  ;;  %p3403_p10 = por %p3402_p6, %p3401_p11 }
 0x199   : > { %p3397_p13 = pneg %p3396_p9 }
 0x19b   : > { %p3404_p3 = pnand %p3403_p10, %p3397_p13 }
 0x19d   : > { %3407 = shalt.err (!%p3404_p3)
}
 0x19e   : > { %2854 = dma.hbm_to_vmem [thread:$0]  (!%p5008_p1), %s5010_s12, 256, %s638_s5, [#allocation21], %s4988_s18, %s4988_s18, %s4987_s4  }
 0x19f   : > { %s5011_s6 = sld [smem:[#allocation75_spill]] }
 0x1a5   : > { %s3408_s11 = scalar_lea.hbm %s5011_s6, 64 }
 0x1a6   : > { %p3409_p12 = scmp.ne.s32.totalorder %s5011_s6, %s3408_s11  ;;  %p3415_p8 = scmp.lt.u32.totalorder %s3408_s11, %s5011_s6 }
 0x1a8   : > { %p3411_p3 = pnand %p3409_p12, %p5007_p4 }
 0x1aa   : > { %p3412_p2 = pneg %p3411_p3 }
 0x1ac   : > { %p3417_p5 = pnand %p3415_p8, %p3412_p2 }
 0x1ae   : > { %3420 = shalt.err (!%p3417_p5)
}
 0x1af   : > { %s3421_s5 = scalar_lea.vmem %s4314_s15, 64  ;;  %p3429_p13 = scmp.lt.s32.totalorder %s4314_s15, %s4314_s15 }
 0x1b0   : > { %p3422_p7 = scmp.ne.s32.totalorder %s4314_s15, %s3421_s5  ;;  %p3430_p11 = scmp.lt.s32.totalorder %s3421_s5, %s3421_s5 }
 0x1b2   : > { %p3424_p0 = pnand %p3422_p7, %p5007_p4  ;;  %p3431_p6 = por %p3430_p11, %p3429_p13 }
 0x1b4   : > { %p3425_p9 = pneg %p3424_p0 }
 0x1b6   : > { %p3432_p10 = pnand %p3431_p6, %p3425_p9 }
 0x1b8   : > { %3435 = shalt.err (!%p3432_p10)
}
 0x1b9   : > { %2860 = dma.hbm_to_vmem [thread:$0]  (!%p5008_p1), %s5011_s6, 64, %s4314_s15, [#allocation24]  }
 0x1ba   : > { %s3795_s23 = smov [#allocation28]   ;;  %s3796_s11 = smov [#allocation31]  }
 0x1bb   : > { %s684_s2 = sshll.u32 %s3795_s23, 4  ;;  %s707_s19 = sshll.u32 %s3796_s11, 4  ;;  %s685_s2 = int_to_ptr.vmem [resolvable:$true] %s684_s2  ;;  %s4360_s19 = int_to_ptr.vmem [resolvable:$true] %s707_s19 }
 0x1bc   : > { %s5012_s26 = sld [smem:[#allocation77_spill]] }
 0x1c2   : > { %s5013_s5 = smov %s5012_s26  ;;  %s3436_s27 = scalar_lea.hbm %s5012_s26, 16 }
 0x1c3   : > { %p3437_p12 = scmp.ne.s32.totalorder %s5013_s5, %s3436_s27  ;;  %p3443_p8 = scmp.lt.u32.totalorder %s3436_s27, %s5013_s5 }
 0x1c5   : > { %p3439_p3 = pnand %p3437_p12, %p5007_p4 }
 0x1c7   : > { %p3440_p2 = pneg %p3439_p3 }
 0x1c9   : > { %p3445_p5 = pnand %p3443_p8, %p3440_p2 }
 0x1cb   : > { %3448 = shalt.err (!%p3445_p5)
}
 0x1cc   : > { %s3449_s28 = scalar_lea.vmem %s685_s2, 16  ;;  %s3456_s23 = scalar_lea.vmem %s685_s2, 32 }
 0x1cd   : > { %p3450_p7 = scmp.ne.s32.totalorder %s685_s2, %s3449_s28  ;;  %p3457_p13 = scmp.lt.s32.totalorder %s685_s2, %s685_s2 }
 0x1ce   : > { %p3458_p11 = scmp.lt.s32.totalorder %s3456_s23, %s3449_s28 }
 0x1cf   : > { %p3452_p0 = pnand %p3450_p7, %p5007_p4 }
 0x1d0   : > { %p3459_p6 = por %p3458_p11, %p3457_p13 }
 0x1d1   : > { %p3453_p9 = pneg %p3452_p0 }
 0x1d3   : > { %p3460_p10 = pnand %p3459_p6, %p3453_p9 }
 0x1d5   : > { %3463 = shalt.err (!%p3460_p10)
}
 0x1d6   : > { %2866 = dma.hbm_to_vmem [thread:$0]  (!%p5008_p1), %s5013_s5, 16, %s685_s2, [#allocation27]  }
 0x1d7   : > { %s5014_s14 = sld [smem:[#allocation79_spill]] }
 0x1dd   : > { %s3464_s1 = scalar_lea.hbm %s5014_s14, 512 }
 0x1de   : > { %p3465_p12 = scmp.ne.s32.totalorder %s5014_s14, %s3464_s1  ;;  %p3471_p8 = scmp.lt.u32.totalorder %s3464_s1, %s5014_s14 }
 0x1e0   : > { %p3467_p3 = pnand %p3465_p12, %p5007_p4 }
 0x1e2   : > { %p3468_p2 = pneg %p3467_p3 }
 0x1e4   : > { %p3473_p5 = pnand %p3471_p8, %p3468_p2 }
 0x1e6   : > { %3476 = shalt.err (!%p3473_p5)
}
 0x1e7   : > { %s3477_s2 = scalar_lea.vmem %s4360_s19, 512  ;;  %p3485_p13 = scmp.lt.s32.totalorder %s4360_s19, %s4360_s19 }
 0x1e8   : > { %p3478_p7 = scmp.ne.s32.totalorder %s4360_s19, %s3477_s2  ;;  %p3486_p11 = scmp.lt.s32.totalorder %s3477_s2, %s3477_s2 }
 0x1ea   : > { %p3480_p0 = pnand %p3478_p7, %p5007_p4  ;;  %p3487_p6 = por %p3486_p11, %p3485_p13 }
 0x1ec   : > { %p3481_p9 = pneg %p3480_p0 }
 0x1ee   : > { %p3488_p10 = pnand %p3487_p6, %p3481_p9 }
 0x1f0   : > { %3491 = shalt.err (!%p3488_p10)
}
 0x1f1   : > { %2872 = dma.hbm_to_vmem [thread:$0]  (!%p5008_p1), %s5014_s14, 512, %s4360_s19, [#allocation30], %s4988_s18, %s4988_s18, %s4987_s4  }
 0x1f2   : > { %s3797_s10 = smov [#allocation32]   ;;  %s5015_s26 = sld [smem:[#allocation61_spill]] }
 0x1f3   : > { %s721_s27 = sshll.u32 %s3797_s10, 4  ;;  %s5017_s5 = sld [smem:[#allocation80_spill]]  ;;  %s722_s27 = int_to_ptr.vmem [resolvable:$true] %s721_s27 }
 0x1f8   : > { %s5016_s17 = smov %s5015_s26  ;;  %s4410_s15 = scalar_lea.hbm %s5015_s26, %s4239_s7 }
 0x1f9   : > { %s3492_s6 = scalar_lea.hbm %s5017_s5, 16 }
 0x1fa   : > { %p3493_p12 = scmp.ne.s32.totalorder %s5017_s5, %s3492_s6  ;;  %p3499_p8 = scmp.lt.u32.totalorder %s3492_s6, %s5017_s5 }
 0x1fc   : > { %p3495_p3 = pnand %p3493_p12, %p5007_p4 }
 0x1fe   : > { %p3496_p2 = pneg %p3495_p3 }
 0x200   : > { %p3501_p5 = pnand %p3499_p8, %p3496_p2 }
 0x202   : > { %3504 = shalt.err (!%p3501_p5)
}
 0x203   : > { %s3505_s8 = scalar_lea.vmem %s722_s27, 16  ;;  %s3512_s10 = scalar_lea.vmem %s722_s27, 32 }
 0x204   : > { %p3506_p7 = scmp.ne.s32.totalorder %s722_s27, %s3505_s8  ;;  %p3513_p13 = scmp.lt.s32.totalorder %s722_s27, %s722_s27 }
 0x205   : > { %p3514_p11 = scmp.lt.s32.totalorder %s3512_s10, %s3505_s8 }
 0x206   : > { %p3508_p0 = pnand %p3506_p7, %p5007_p4 }
 0x207   : > { %p3515_p6 = por %p3514_p11, %p3513_p13 }
 0x208   : > { %p3509_p9 = pneg %p3508_p0 }
 0x20a   : > { %p3516_p10 = pnand %p3515_p6, %p3509_p9 }
 0x20c   : > { %3519 = shalt.err (!%p3516_p10)
}
 0x20d   : > { %2875 = dma.hbm_to_vmem [thread:$0]  (!%p5008_p1), %s5017_s5, 16, %s722_s27, [#allocation33]  }
 0x20e   : > { %s736_s30 = scalar_lea.vmem [#allocation2], %s4208_s24  ;;  %s5018_s26 = sld [smem:[#allocation63_spill]] }
 0x20f   : > { %s745_s6 = sshll.u32 %s736_s30, 4  ;;  %s733_s2 = scalar_lea.sflag [#allocation3], %s4137_s20  ;;  %s4431_s6 = int_to_ptr.vmem [resolvable:$true] %s745_s6 }
 0x210   : > { %s3520_s19 = scalar_lea.hbm %s4410_s15, 128  ;;  %p5020_p12 = scmp.ne.s32.totalorder %s5002_s0, 0 }
 0x211   : > { %p3521_p4 = scmp.ne.s32.totalorder %s4410_s15, %s3520_s19  ;;  %s3525_s10 = scalar_lea.hbm %s5016_s17, 512 }
 0x212   : > { %p3526_p1 = scmp.lt.u32.totalorder %s4410_s15, %s5016_s17  ;;  %p3527_p8 = scmp.lt.u32.totalorder %s3525_s10, %s3520_s19 }
 0x213   : > { %p3523_p3 = pnand %p3521_p4, %p5020_p12  ;;  %p3529_p7 = scmp.lt.u32.totalorder %s3520_s19, %s4410_s15 }
 0x214   : > { %s5019_s28 = smov %s5018_s26  ;;  %s4437_s21 = scalar_lea.hbm %s5018_s26, %s4157_s29 }
 0x215   : > { %p3524_p2 = pneg %p3523_p3  ;;  %p3528_p5 = por %p3527_p8, %p3526_p1 }
 0x217   : > { %p3530_p0 = por %p3529_p7, %p3528_p5 }
 0x219   : > { %p3531_p9 = pnand %p3530_p0, %p3524_p2 }
 0x21b   : > { %3534 = shalt.err (!%p3531_p9)
}
 0x21c   : > { %s3535_s29 = scalar_lea.vmem %s4431_s6, 128  ;;  %s3798_s20 = smov [#allocation2]  }
 0x21d   : > { %p3536_p13 = scmp.ne.s32.totalorder %s4431_s6, %s3535_s29  ;;  %s3540_s3 = sshll.u32 %s3798_s20, 4  ;;  %s3541_s3 = int_to_ptr.vmem [resolvable:$false] %s3540_s3 }
 0x21e   : > { %s3542_s30 = scalar_lea.vmem %s3541_s3, 256  ;;  %p3543_p10 = scmp.lt.s32.totalorder %s4431_s6, %s3541_s3 }
 0x21f   : > { %p3538_p11 = pnand %p3536_p13, %p5020_p12  ;;  %p3544_p4 = scmp.lt.s32.totalorder %s3542_s30, %s3535_s29 }
 0x221   : > { %p3539_p6 = pneg %p3538_p11  ;;  %p3545_p3 = por %p3544_p4, %p3543_p10 }
 0x223   : > { %p3546_p1 = pnand %p3545_p3, %p3539_p6 }
 0x225   : > { %3549 = shalt.err (!%p3546_p1)
}
 0x226   : > { %p5021_p2 = scmp.ne.s32.totalorder %s4998_s9, 0  ;;  %s779_s11 = scalar_lea.vmem [#allocation7], %s4150_s16 }
 0x227   : > { %s788_s1 = sshll.u32 %s779_s11, 4  ;;  %s5022_s23 = sld [smem:[#allocation65_spill]]  ;;  %s4462_s1 = int_to_ptr.vmem [resolvable:$true] %s788_s1 }
 0x228   : > { %2879 = dma.hbm_to_vmem [thread:$0]  (!%p5021_p2), %s4410_s15, 128, %s4431_s6, %s733_s2  }
 0x229   : > { %s3550_s27 = scalar_lea.hbm %s4437_s21, 1024  ;;  %s3555_s20 = scalar_lea.hbm %s5019_s28, 4096 }
 0x22a   : > { %p3551_p8 = scmp.ne.s32.totalorder %s4437_s21, %s3550_s27  ;;  %p3556_p0 = scmp.lt.u32.totalorder %s4437_s21, %s5019_s28 }
 0x22b   : > { %p3557_p9 = scmp.lt.u32.totalorder %s3555_s20, %s3550_s27  ;;  %p3559_p11 = scmp.lt.u32.totalorder %s3550_s27, %s4437_s21 }
 0x22c   : > { %p3553_p5 = pnand %p3551_p8, %p5020_p12 }
 0x22d   : > { %s5023_s8 = smov %s5022_s23  ;;  %s4468_s10 = scalar_lea.hbm %s5022_s23, %s4239_s7 }
 0x22e   : > { %p3554_p7 = pneg %p3553_p5  ;;  %p3558_p13 = por %p3557_p9, %p3556_p0 }
 0x230   : > { %p3560_p6 = por %p3559_p11, %p3558_p13 }
 0x232   : > { %p3561_p10 = pnand %p3560_p6, %p3554_p7 }
 0x234   : > { %3564 = shalt.err (!%p3561_p10)
}
 0x235   : > { %s3565_s16 = scalar_lea.vmem %s4462_s1, 1024  ;;  %s3799_s6 = smov [#allocation7]  }
 0x236   : > { %p3566_p4 = scmp.ne.s32.totalorder %s4462_s1, %s3565_s16  ;;  %s3570_s2 = sshll.u32 %s3799_s6, 4  ;;  %s3571_s2 = int_to_ptr.vmem [resolvable:$false] %s3570_s2 }
 0x237   : > { %s3572_s30 = scalar_lea.vmem %s3571_s2, 2048  ;;  %p3573_p8 = scmp.lt.s32.totalorder %s4462_s1, %s3571_s2 }
 0x238   : > { %p3568_p3 = pnand %p3566_p4, %p5020_p12  ;;  %p3574_p5 = scmp.lt.s32.totalorder %s3572_s30, %s3565_s16 }
 0x23a   : > { %p3569_p1 = pneg %p3568_p3  ;;  %p3575_p0 = por %p3574_p5, %p3573_p8 }
 0x23c   : > { %p3576_p9 = pnand %p3575_p0, %p3569_p1 }
 0x23e   : > { %3579 = shalt.err (!%p3576_p9)
}
 0x23f   : > { %s5024_s11 = scalar_lea.sflag [#allocation6], %s4147_s13  ;;  %s825_s26 = scalar_lea.vmem [#allocation10], %s4208_s24 }
 0x240   : > { %2885 = dma.hbm_to_vmem [thread:$0]  (!%p5021_p2), %s4437_s21, 1024, %s4462_s1, %s5024_s11, %s4988_s18, %s4988_s18, %s4987_s4  }
 0x241   : > { %s834_s19 = sshll.u32 %s825_s26, 4  ;;  %s5025_s12 = sld [smem:[#allocation67_spill]]  ;;  %s835_s19 = int_to_ptr.vmem [resolvable:$true] %s834_s19 }
 0x242   : > { %s3580_s20 = scalar_lea.hbm %s4468_s10, 128  ;;  %s3585_s16 = scalar_lea.hbm %s5023_s8, 512 }
 0x243   : > { %p3581_p7 = scmp.ne.s32.totalorder %s4468_s10, %s3580_s20  ;;  %p3586_p6 = scmp.lt.u32.totalorder %s4468_s10, %s5023_s8 }
 0x244   : > { %p3587_p10 = scmp.lt.u32.totalorder %s3585_s16, %s3580_s20  ;;  %p3589_p3 = scmp.lt.u32.totalorder %s3580_s20, %s4468_s10 }
 0x245   : > { %p3583_p13 = pnand %p3581_p7, %p5020_p12 }
 0x246   : > { %p3588_p4 = por %p3587_p10, %p3586_p6 }
 0x247   : > { %s4501_s29 = scalar_lea.hbm %s5025_s12, %s4239_s7  ;;  %p3584_p11 = pneg %p3583_p13 }
 0x248   : > { %p3590_p1 = por %p3589_p3, %p3588_p4 }
 0x24a   : > { %p3591_p8 = pnand %p3590_p1, %p3584_p11 }
 0x24c   : > { %3594 = shalt.err (!%p3591_p8)
}
 0x24d   : > { %s3595_s4 = scalar_lea.vmem %s835_s19, 128  ;;  %s3800_s18 = smov [#allocation10]  }
 0x24e   : > { %p3596_p5 = scmp.ne.s32.totalorder %s835_s19, %s3595_s4  ;;  %s3600_s7 = sshll.u32 %s3800_s18, 4  ;;  %s3601_s7 = int_to_ptr.vmem [resolvable:$false] %s3600_s7 }
 0x24f   : > { %s3602_s21 = scalar_lea.vmem %s3601_s7, 256  ;;  %p3603_p7 = scmp.lt.s32.totalorder %s835_s19, %s3601_s7 }
 0x250   : > { %p3598_p0 = pnand %p3596_p5, %p5020_p12  ;;  %p3604_p13 = scmp.lt.s32.totalorder %s3602_s21, %s3595_s4 }
 0x252   : > { %p3599_p9 = pneg %p3598_p0  ;;  %p3605_p2 = por %p3604_p13, %p3603_p7 }
 0x254   : > { %p3606_p6 = pnand %p3605_p2, %p3599_p9 }
 0x256   : > { %3609 = shalt.err (!%p3606_p6)
}
 0x257   : > { %p5026_p10 = scmp.ne.s32.totalorder %s4998_s9, 0  ;;  %s5027_s1 = scalar_lea.sflag [#allocation9], %s4147_s13 }
 0x258   : > { %s865_s30 = scalar_lea.vmem [#allocation13], %s4208_s24  ;;  %s3610_s26 = scalar_lea.hbm %s4501_s29, 128 }
 0x259   : > { %2891 = dma.hbm_to_vmem [thread:$0]  (!%p5026_p10), %s4468_s10, 128, %s835_s19, %s5027_s1  }
 0x25a   : > { %s874_s11 = sshll.u32 %s865_s30, 4  ;;  %p3611_p11 = scmp.ne.s32.totalorder %s4501_s29, %s3610_s26  ;;  %s875_s11 = int_to_ptr.vmem [resolvable:$true] %s874_s11 }
 0x25b   : > { %s3615_s20 = scalar_lea.hbm %s5025_s12, 512  ;;  %p3616_p3 = scmp.lt.u32.totalorder %s4501_s29, %s5025_s12 }
 0x25c   : > { %p3613_p2 = pnand %p3611_p11, %p5020_p12  ;;  %p3617_p1 = scmp.lt.u32.totalorder %s3615_s20, %s3610_s26 }
 0x25d   : > { %p3619_p5 = scmp.lt.u32.totalorder %s3610_s26, %s4501_s29 }
 0x25e   : > { %p3614_p4 = pneg %p3613_p2  ;;  %p3618_p8 = por %p3617_p1, %p3616_p3 }
 0x260   : > { %p3620_p0 = por %p3619_p5, %p3618_p8 }
 0x262   : > { %p3621_p9 = pnand %p3620_p0, %p3614_p4 }
 0x264   : > { %3624 = shalt.err (!%p3621_p9)
}
 0x265   : > { %s3625_s24 = scalar_lea.vmem %s875_s11, 128  ;;  %s3801_s10 = smov [#allocation13]  }
 0x266   : > { %p3626_p7 = scmp.ne.s32.totalorder %s875_s11, %s3625_s24  ;;  %s3630_s19 = sshll.u32 %s3801_s10, 4  ;;  %s3631_s19 = int_to_ptr.vmem [resolvable:$false] %s3630_s19 }
 0x267   : > { %s3632_s16 = scalar_lea.vmem %s3631_s19, 256  ;;  %p3633_p11 = scmp.lt.s32.totalorder %s875_s11, %s3631_s19 }
 0x268   : > { %p3628_p13 = pnand %p3626_p7, %p5020_p12  ;;  %p3634_p2 = scmp.lt.s32.totalorder %s3632_s16, %s3625_s24 }
 0x26a   : > { %p3629_p6 = pneg %p3628_p13  ;;  %p3635_p10 = por %p3634_p2, %p3633_p11 }
 0x26c   : > { %p3636_p1 = pnand %p3635_p10, %p3629_p6 }
 0x26e   : > { %3639 = shalt.err (!%p3636_p1)
}
 0x26f   : > { %p5028_p3 = scmp.ne.s32.totalorder %s4998_s9, 0  ;;  %s5029_s6 = scalar_lea.sflag [#allocation12], %s4147_s13 }
 0x270   : > { %s5030_s2 = sld [smem:[#allocation54_spill]] }
 0x271   : > { %2897 = dma.hbm_to_vmem [thread:$0]  (!%p5028_p3), %s4501_s29, 128, %s875_s11, %s5029_s6  }
 0x276   : > { %p5031_p4 = scmp.ne.s32.totalorder %s5030_s2, 0 }
 0x277   : > { %s5032_s0 = sld [smem:[#allocation57_spill]] (!%p5031_p4)  ;;  %s4545_s4 = sand.u32 (!%p5031_p4), 1, %s3754_s22  }
 0x278   : > { %883 = sbr.rel (%p5031_p4) target bundleno = 1767 (0x6e7), region = 100  ;;  %s4548_s18 = sshll.u32 (!%p5031_p4), %s4545_s4, 3 }
 0x279   : > { %s886_s7 = scalar_lea.sflag (!%p5031_p4), [#allocation3], %s4545_s4  ;;  %s889_s21 = scalar_lea.vmem (!%p5031_p4), [#allocation2], %s4548_s18 }
 0x27d   : > { %p5033_p12 = scmp.ne.s32.totalorder (!%p5031_p4), %s5032_s0, 0 }
 0x27f   : > { %3701 = dma.done.wait (%p5033_p12), %s886_s7, 128  }
 0x280   : > { %3703 = vsyncadd (%p5033_p12), %s886_s7, 4294967168  ;;  %s5034_s9 = sld [smem:[#allocation53_spill]]  ;;  %s2615_s29 = sshll.u32 %s4545_s4, 6 }
 0x281   : > { %s4558_s30 = scalar_lea.vmem [#allocation5], %s2615_s29 }
 0x286   : > { %s894_s13 = sand.u32 1, %s5034_s9  }
 0x287   : > { %s895_s1 = scalar_lea.sflag [#allocation6], %s894_s13 }
 0x288   : > { %3705 = dma.done.wait (%p5033_p12), %s895_s1, 2048  }
 0x289   : > { %3707 = vsyncadd (%p5033_p12), %s895_s1, 4294965248  ;;  %s4564_s11 = scalar_lea.vmem [#allocation7], %s2615_s29  ;;  %s913_s26 = scalar_lea.sflag [#allocation9], %s894_s13 }
 0x28a   : > { %s4566_s23 = scalar_lea.vmem [#allocation8], %s2615_s29 }
 0x28b   : > { %3709 = dma.done.wait (%p5033_p12), %s913_s26, 1152  }
 0x28c   : > { %3711 = vsyncadd (%p5033_p12), %s913_s26, 4294966144  ;;  %s925_s27 = scalar_lea.vmem [#allocation10], %s4548_s18  ;;  %s931_s20 = scalar_lea.sflag [#allocation12], %s894_s13 }
 0x28d   : > { %s934_s3 = scalar_lea.vmem [#allocation11], %s4548_s18 }
 0x28e   : > { %3713 = dma.done.wait (%p5033_p12), %s931_s20, 256  }
 0x28f   : > { %3715 = vsyncadd (%p5033_p12), %s931_s20, 4294967040  ;;  %s943_s15 = scalar_lea.vmem [#allocation13], %s4548_s18  ;;  %p5035_p10 = scmp.eq.s32.totalorder %s5034_s9, 0 }
 0x291   : > { %3717 = dma.done.wait (%p5035_p10), [#allocation15], 32   ;;  %p5036_p8 = pmov %p5035_p10 }
 0x293   : > { %3719 = vsyncadd (%p5036_p8), [#allocation15], 4294967264  ;;  %p5037_p5 = pmov %p5036_p8 }
 0x295   : > { %3721 = dma.done.wait (%p5037_p5), [#allocation18], 512   ;;  %p5038_p0 = pmov %p5037_p5 }
 0x297   : > { %3723 = vsyncadd (%p5038_p0), [#allocation18], 4294966784  ;;  %p5039_p9 = pmov %p5038_p0 }
 0x298   : > { %p5040_p7 = pmov %p5038_p0 }
 0x299   : > { %3725 = dma.done.wait (%p5039_p9), [#allocation21], 272  }
 0x29a   : > { %3727 = vsyncadd (%p5040_p7), [#allocation21], 4294967024  ;;  %p5041_p13 = pmov %p5038_p0 }
 0x29b   : > { %p5042_p6 = pmov %p5038_p0 }
 0x29c   : > { %3729 = dma.done.wait (%p5041_p13), [#allocation24], 80  }
 0x29d   : > { %3731 = vsyncadd (%p5042_p6), [#allocation24], 4294967216  ;;  %p5043_p11 = pmov %p5038_p0 }
 0x29e   : > { %p5044_p2 = pmov %p5038_p0 }
 0x29f   : > { %3733 = dma.done.wait (%p5043_p11), [#allocation27], 32  }
 0x2a0   : > { %3735 = vsyncadd (%p5044_p2), [#allocation27], 4294967264  ;;  %p5045_p1 = pmov %p5038_p0 }
 0x2a1   : > { %p5046_p3 = pmov %p5038_p0 }
 0x2a2   : > { %3737 = dma.done.wait (%p5045_p1), [#allocation30], 1024  }
 0x2a3   : > { %3739 = vsyncadd (%p5046_p3), [#allocation30], 4294966272  ;;  %p5047_p4 = pmov %p5038_p0 }
 0x2a4   : > { %p5048_p12 = pmov %p5038_p0 }
 0x2a5   : > { %3741 = dma.done.wait (%p5047_p4), [#allocation33], 16  }
 0x2a6   : > { %3743 = vsyncadd (%p5048_p12), [#allocation33], 4294967280  ;;  %v1093_v0 = vld [vmem:[%s4564_s11] sm:$0xff]  ;;  %v1095_v1 = vld [vmem:[%s4564_s11 + $0x10] sm:$0xff]  ;;  %s3802_s24 = smov 8   ;;  %v3803_v9 = vmov 0   ;;  %v1148_v14 = vlaneseq }
 0x2a7   : > { %1109 = vrot.lane.b32.xlu0 %v1093_v0, %s3802_s24  ;;  %1113 = vrot.lane.b32.xlu1 %v1095_v1, %s3802_s24  ;;  %v1392_v2 = vld [vmem:[#allocation17] sm:$0xff]  ;;  %v1094_v3 = vld [vmem:[%s4564_s11 + $0x8] sm:$0xff]  ;;  %v1393_v5 = vld [vmem:[#allocation17 + $0x8] sm:$0xff]  ;;  %v3804_v12 = vmov 1966171168   ;;  %vm1133_vm0 = vcmask 64512  }
 0x2a8   : > { %v1096_v4 = vld [vmem:[%s4564_s11 + $0x18] sm:$0xff]  ;;  %v2746_v6 = vpack.c.bf16 %v1393_v5, %v1392_v2  ;;  %v1097_v7 = vld [vmem:[%s4564_s11 + $0x20] sm:$0xff]  ;;  %v1098_v8 = vld [vmem:[%s4564_s11 + $0x28] sm:$0xff]  ;;  %3015 = vset.pattern.permute.xlu1 %v3803_v9  ;;  %3016 = vset.pattern.permute.xlu0 %v3803_v9  ;;  %v1146_v13 = vunpack.c.l.s4 %v3804_v12  ;;  %v1149_v16 = vshrl.u32 %v1148_v14, 7  ;;  %vm1394_vm1 = vcmask 130048   ;;  %s5049_s10 = sld [smem:[#allocation50_spill]] }
 0x2a9   : > { %v1099_v10 = vld [vmem:[%s4564_s11 + $0x30] sm:$0xff]  ;;  %v1100_v11 = vld [vmem:[%s4564_s11 + $0x38] sm:$0xff]  ;;  %v4618_v28 = vld [vmem:[%s4558_s30] sm:$0xff]  ;;  %vm3806_vm2 = vmmov 0   ;;  %vm1765_vm3 = vcmask 1041409   ;;  %vm1767_vm4 = vcmask 1042434  }
 0x2aa   : > { %2747 = vmatprep.subr.bf16.mxu0 %v2746_v6  ;;  %v1147_v15 = vunpack.c.0.s8 %v1146_v13  ;;  %v1142_v18 = vld [vmem:[%s889_s21] sm:$0xff]  ;;  %v1195_v23 = vsub.s32 0, %v1149_v16  ;;  %v4625_v37 = vld [vmem:[%s4558_s30 + $0x8] sm:$0xff]  ;;  %v4633_v46 = vld [vmem:[%s4558_s30 + $0x20] sm:$0xff]  ;;  %vm1769_vm5 = vcmask 1043459   ;;  %vm1771_vm6 = vcmask 1044484  }
 0x2ab   : > { %1111 = vrot.lane.b32.xlu0 %v1094_v3, %s3802_s24  ;;  %1115 = vrot.lane.b32.xlu1 %v1096_v4, %s3802_s24  ;;  %v1144_v22 = vcombine.high %v1142_v18, %v1142_v18  ;;  %v4622_v35 = vld [vmem:[%s4558_s30 + $0x10] sm:$0xff]  ;;  %v4630_v44 = vld [vmem:[%s4558_s30 + $0x18] sm:$0xff]  ;;  %vm1773_vm7 = vcmask 1045509   ;;  %vm1775_vm8 = vcmask 1046534   ;;  %vm1777_vm9 = vcmask 1047559   ;;  %s5050_s19 = sld [smem:[#allocation49_spill]] }
 0x2ac   : > { %2749 = vmatpush3.bf16.msra.mxu0 %v2746_v6  ;;  %v1150_v17 = vsub.s32 %v1147_v15, %v1149_v16  ;;  %v1090_v54 = vld [vmem:[%s4558_s30 + $0x28] sm:$0xff]  ;;  %v4640_v55 = vld [vmem:[%s4558_s30 + $0x30] sm:$0xff]  ;;  %v1092_v63 = vld [vmem:[%s4558_s30 + $0x38] sm:$0xff]  ;;  %vm1954_vm10 = vcmask 1042432   ;;  %vm1950_vm11 = vcmask 23552   ;;  %vm2046_vm12 = vcmask 261120  }
 0x2ad   : > { %v1306_v9 = vld [vmem:[%s4566_s23] sm:$0xff]  ;;  %v1307_v12 = vld [vmem:[%s4566_s23 + $0x8] sm:$0xff]  ;;  %v1312_v15 = vld [vmem:[%s4566_s23 + $0x30] sm:$0xff]  ;;  %s5051_s2 = sld [smem:[#allocation58_spill]]  ;;  %s1081_s7 = scalar_lea.vmem [#allocation34], %s4548_s18 }
 0x2ae   : > { %v1151_v19 = vrot.slane %v1142_v18, %v1150_v17  ;;  %v1158_v27 = vrot.slane %v1144_v22, %v1150_v17  ;;  %v1310_v13 = vld [vmem:[%s4566_s23 + $0x20] sm:$0xff]  ;;  %v1311_v14 = vld [vmem:[%s4566_s23 + $0x28] sm:$0xff]  ;;  %v1313_v16 = vld [vmem:[%s4566_s23 + $0x38] sm:$0xff]  ;;  %s2657_s16 = sshll.u32 %s5049_s10, 1  ;;  %s2219_s21 = sshll.u32 %s1081_s7, 4  ;;  %s4825_s21 = int_to_ptr.vmem [resolvable:$true] %s2219_s21 }
 0x2af   : > { %1117 = vrot.lane.b32.xlu0 %v1097_v7, %s3802_s24  ;;  %1119 = vrot.lane.b32.xlu1 %v1098_v8, %s3802_s24  ;;  %s5052_s29 = sld [smem:[#allocation81_spill]]  ;;  %s2204_s30 = scalar_lea.sflag [#allocation4], %s4545_s4 }
 0x2b0   : > { %v1167_v20 = vrot.slane %v1151_v19, %v1150_v17  ;;  %v1159_v21 = vcombine.high %v1151_v19, %v1151_v19  ;;  %v1160_v29 = vcombine.high %v1158_v27, %v1158_v27  ;;  %v1174_v34 = vrot.slane %v1158_v27, %v1150_v17  ;;  %s3640_s11 = scalar_lea.vmem %s4825_s21, 128  ;;  %s3808_s18 = smov [#allocation34]  }
 0x2b1   : > { %s2215_s6 = sadd.s32 %s5050_s19, %s2657_s16  ;;  %p3641_p10 = scmp.ne.s32.totalorder %s4825_s21, %s3640_s11 }
 0x2b2   : > { %v1196_v24 = vrot.slane %v1167_v20, %v1195_v23  ;;  %v1189_v25 = vcombine.high %v1167_v20, %v1167_v20  ;;  %v1181_v26 = vrot.slane %v1159_v21, %v1150_v17  ;;  %v1188_v36 = vrot.slane %v1160_v29, %v1150_v17  ;;  %v1936_v17 = vld [vmem:[%s925_s27] sm:$0xff]  ;;  %s2658_s0 = sshll.u32 %s2215_s6, 7  ;;  %s3644_s26 = sshll.u32 %s3808_s18, 4  ;;  %s3645_s26 = int_to_ptr.vmem [resolvable:$false] %s3644_s26 }
 0x2b3   : > { %1121 = vrot.lane.b32.xlu0 %v1099_v10, %s3802_s24  ;;  %1123 = vrot.lane.b32.xlu1 %v1100_v11, %s3802_s24  ;;  %v1212_v42 = vrot.slane %v1174_v34, %v1195_v23  ;;  %v1190_v43 = vcombine.high %v1174_v34, %v1174_v34  ;;  %v1308_v10 = vld [vmem:[%s4566_s23 + $0x10] sm:$0xff]  ;;  %v1309_v11 = vld [vmem:[%s4566_s23 + $0x18] sm:$0xff]  ;;  %v1748_v34 = vld [vmem:[#allocation19] sm:$0xff]  ;;  %p5053_p8 = scmp.ne.s32.totalorder %s5051_s2, 0  ;;  %s3646_s23 = scalar_lea.vmem %s3645_s26, 256 }
 0x2b4   : > { %v1233_v30 = vsub.f32 %v1196_v24, %v4618_v28  ;;  %v1204_v31 = vrot.slane %v1189_v25, %v1195_v23  ;;  %v1191_v32 = vcombine.high %v1181_v26, %v1181_v26  ;;  %v1200_v33 = vrot.slane %v1181_v26, %v1195_v23  ;;  %p3647_p9 = scmp.lt.s32.totalorder %s4825_s21, %s3645_s26  ;;  %p3648_p7 = scmp.lt.s32.totalorder %s3646_s23, %s3640_s11 }
 0x2b5   : > { %v1216_v45 = vrot.slane %v1188_v36, %v1195_v23  ;;  %v1192_v50 = vcombine.high %v1188_v36, %v1188_v36  ;;  %v1237_v52 = vsub.f32 %v1212_v42, %v4633_v46  ;;  %v1220_v53 = vrot.slane %v1190_v43, %v1195_v23  ;;  %s4823_s1 = scalar_lea.hbm %s5052_s29, %s2658_s0  ;;  %p3642_p5 = pnand %p3641_p10, %p5053_p8 }
 0x2b6   : > { %v1241_v38 = vand.u32 2147483647, %v1233_v30  ;;  %v1235_v39 = vsub.f32 %v1204_v31, %v4622_v35  ;;  %v1208_v40 = vrot.slane %v1191_v32, %v1195_v23  ;;  %v1234_v41 = vsub.f32 %v1200_v33, %v4625_v37  ;;  %p3649_p13 = por %p3648_p7, %p3647_p9 }
 0x2b7   : > { %v1238_v58 = vsub.f32 %v1216_v45, %v1090_v54  ;;  %v1224_v59 = vrot.slane %v1192_v50, %v1195_v23  ;;  %v1245_v61 = vand.u32 2147483647, %v1237_v52  ;;  %v1239_v62 = vsub.f32 %v1220_v53, %v4640_v55  ;;  %p3643_p0 = pneg %p3642_p5 }
 0x2b8   : > { %v1249_v47 = vsel %vm1133_vm0, %v1241_v38, 0.0  ;;  %v1243_v48 = vand.u32 2147483647, %v1235_v39  ;;  %v1236_v49 = vsub.f32 %v1208_v40, %v4630_v44  ;;  %v1242_v51 = vand.u32 2147483647, %v1234_v41 }
 0x2b9   : > { %v1246_v1 = vand.u32 2147483647, %v1238_v58  ;;  %v1240_v2 = vsub.f32 %v1224_v59, %v1092_v63  ;;  %v1261_v3 = vsel %vm1133_vm0, %v1245_v61, 0.0  ;;  %v1247_v4 = vand.u32 2147483647, %v1239_v62  ;;  %p3650_p6 = pnand %p3649_p13, %p3643_p0 }
 0x2ba   : > { %v1255_v56 = vsel %vm1133_vm0, %v1243_v48, 0.0  ;;  %v1244_v57 = vand.u32 2147483647, %v1236_v49  ;;  %v1252_v60 = vsel %vm1133_vm0, %v1242_v51, 0.0  ;;  %v3805_v36 = vmov 0.0|0.0  }
 0x2bb   : > { %v1264_v5 = vsel %vm1133_vm0, %v1246_v1, 0.0  ;;  %v1248_v6 = vand.u32 2147483647, %v1240_v2  ;;  %v1267_v7 = vsel %vm1133_vm0, %v1247_v4, 0.0  ;;  %2750 = vmatprep.subr.bf16.mxu1 %v3805_v36  ;;  %v3807_v38 = vmov 0.0   ;;  %2756 = vmatprep.subr.bf16.mxu0 %v3805_v36 }
 0x2bc   : > { %v1258_v0 = vsel %vm1133_vm0, %v1244_v57, 0.0  ;;  %2709 = vmatprep.mubr.msk.f32.mxu1 %vm3806_vm2, %v3807_v38 }
 0x2bd   : > { %v1270_v8 = vsel %vm1133_vm0, %v1248_v6, 0.0 }
 0x2d2   : > { %1250 = vadd.xlane.f32.xlu0 %v1249_v47 }
 0x2d6   : > { %1256 = vadd.xlane.f32.xlu0 %v1255_v56 }
 0x2d7   : > { %1253 = vadd.xlane.f32.xlu1 %v1252_v60 }
 0x2da   : > { %1259 = vadd.xlane.f32.xlu0 %v1258_v0 }
 0x2db   : > { %1262 = vadd.xlane.f32.xlu1 %v1261_v3 }
 0x2de   : > { %1265 = vadd.xlane.f32.xlu0 %v1264_v5 }
 0x2df   : > { %1268 = vadd.xlane.f32.xlu1 %v1267_v7 }
 0x2e2   : > { %1271 = vadd.xlane.f32.xlu0 %v1270_v8 }
 0x2f0   : > { %1317 = vperm.xlu1 %3015, %v1306_v9  }
 0x2f4   : > { %1327 = vperm.xlu1 %3015, %v1308_v10  }
 0x2f8   : > { %1332 = vperm.xlu1 %3015, %v1309_v11   ;;  %1322 = vperm.xlu0 %3016, %v1307_v12  }
 0x2fc   : > { %1337 = vperm.xlu1 %3015, %v1310_v13  }
 0x300   : > { %1342 = vperm.xlu1 %3015, %v1311_v14   ;;  %v2635_v14 = vld [vmem:[#allocation14] ss:$0 sm:$0xff] }
 0x304   : > { %1347 = vperm.xlu1 %3015, %v1312_v15   ;;  %v2636_v15 = vld [vmem:[#allocation16] ss:$0 sm:$0xff] }
 0x308   : > { %1352 = vperm.xlu1 %3015, %v1313_v16  }
 0x30c   : > { %1940 = vperm.xlu1 %3015, %v1936_v17  }
 0x319   : > { %v1110_v18 = vpop.permute.xlu0 %1109  ;;  %v1114_v19 = vpop.permute.xlu1 %1113 }
 0x31a   : > { %v4663_v20 = vsel %vm1133_vm0, %v4618_v28, %v1110_v18  ;;  %v4669_v21 = vsel %vm1133_vm0, %v4622_v35, %v1114_v19  ;;  %v1749_v35 = vld [vmem:[#allocation19 + $0x8] sm:$0xff] }
 0x31b   : > { %2693 = vmatprep.mubr.msk.f32.mxu0 %vm1394_vm1, %v4663_v20 }
 0x31d   : > { %v1112_v22 = vpop.permute.xlu0 %1111  ;;  %v1116_v23 = vpop.permute.xlu1 %1115 }
 0x31e   : > { %v4673_v24 = vsel %vm1133_vm0, %v4625_v37, %v1112_v22  ;;  %v4681_v25 = vsel %vm1133_vm0, %v4630_v44, %v1116_v23  ;;  %v2751_v37 = vpack.c.bf16 %v1749_v35, %v1748_v34 }
 0x31f   : > { %2694 = vmatmul.mubr.msk.f32.vlgmr.msra.gmra.mrb[0].mxu0 %vm1394_vm1, %v4673_v24 }
 0x320   : > { %2696 = vmatprep.mubr.msk.f32.mxu0 %vm1394_vm1, %v4669_v21  ;;  %2752 = vmatpush3.bf16.msra.mxu1 %v2751_v37 }
 0x321   : > { %v1118_v26 = vpop.permute.xlu0 %1117  ;;  %v1120_v27 = vpop.permute.xlu1 %1119  ;;  %2753 = vmatprep.subr.bf16.mxu1 %v3805_v36 }
 0x322   : > { %v4685_v28 = vsel %vm1133_vm0, %v4633_v46, %v1118_v26  ;;  %v4690_v29 = vsel %vm1133_vm0, %v1090_v54, %v1120_v27 }
 0x323   : > { %2697 = vmatmul.mubr.msk.f32.gmra.mrb[2].mxu0 %vm1394_vm1, %v4681_v25 }
 0x324   : > { %2699 = vmatprep.mubr.msk.f32.mxu0 %vm1394_vm1, %v4685_v28 }
 0x325   : > { %v1122_v30 = vpop.permute.xlu0 %1121  ;;  %v1124_v31 = vpop.permute.xlu1 %1123 }
 0x326   : > { %v4696_v32 = vsel %vm1133_vm0, %v4640_v55, %v1122_v30  ;;  %v4701_v33 = vsel %vm1133_vm0, %v1092_v63, %v1124_v31 }
 0x327   : > { %2700 = vmatmul.mubr.msk.f32.gmra.mrb[4].mxu0 %vm1394_vm1, %v4690_v29 }
 0x328   : > { %2702 = vmatprep.mubr.msk.f32.mxu0 %vm1394_vm1, %v4696_v32 }
 0x32b   : > { %2703 = vmatmul.mubr.msk.f32.gmra.mrb[6].mxu0 %vm1394_vm1, %v4701_v33 }
 0x32c   : > { %2732 = vmatprep.mubr.msk.f32.mxu0 %vm3806_vm2, %v3807_v38 }
 0x35f   : > { %v1251_v40 = vpop.xlane.xlu0 %1250 }
 0x360   : > { %v1274_v47 = vmul.f32 0.125, %v1251_v40 }
 0x362   : > { %v1282_v52 = vsub.f32 0.0, %v1274_v47 }
 0x363   : > { %v1257_v42 = vpop.xlane.xlu0 %1256 }
 0x364   : > { %v1254_v39 = vpop.xlane.xlu1 %1253  ;;  %v1276_v49 = vmul.f32 0.125, %v1257_v42  ;;  %v1290_v60 = vmul.f32 1.442695, %v1282_v52 }
 0x365   : > { %v1275_v45 = vmul.f32 0.125, %v1254_v39 }
 0x366   : > { %v1284_v54 = vsub.f32 0.0, %v1276_v49 }
 0x367   : > { %v1260_v44 = vpop.xlane.xlu0 %1259  ;;  %v1283_v50 = vsub.f32 0.0, %v1275_v45 }
 0x368   : > { %v1263_v41 = vpop.xlane.xlu1 %1262  ;;  %v1277_v51 = vmul.f32 0.125, %v1260_v44  ;;  %v1294_v62 = vmul.f32 1.442695, %v1284_v54 }
 0x369   : > { %v1292_v55 = vmul.f32 1.442695, %v1283_v50  ;;  %v1278_v59 = vmul.f32 0.125, %v1263_v41 }
 0x36a   : > { %v1285_v56 = vsub.f32 0.0, %v1277_v51 }
 0x36b   : > { %v1266_v48 = vpop.xlane.xlu0 %1265  ;;  %3018 = vpow2.f32 %v1292_v55  ;;  %v1286_v3 = vsub.f32 0.0, %v1278_v59 }
 0x36c   : > { %v1269_v43 = vpop.xlane.xlu1 %1268  ;;  %v1279_v57 = vmul.f32 0.125, %v1266_v48  ;;  %v1296_v0 = vmul.f32 1.442695, %v1285_v56  ;;  %3020 = vpow2.f32 %v1290_v60 }
 0x36d   : > { %v1280_v61 = vmul.f32 0.125, %v1269_v43  ;;  %3022 = vpow2.f32 %v1294_v62  ;;  %v1298_v7 = vmul.f32 1.442695, %v1286_v3 }
 0x36e   : > { %v1287_v1 = vsub.f32 0.0, %v1279_v57  ;;  %3024 = vpow2.f32 %v1296_v0 }
 0x36f   : > { %v1272_v58 = vpop.xlane.xlu0 %1271  ;;  %v1288_v4 = vsub.f32 0.0, %v1280_v61 }
 0x370   : > { %v1318_v46 = vpop.permute.xlu1 %1317  ;;  %v1281_v63 = vmul.f32 0.125, %v1272_v58  ;;  %v1300_v6 = vmul.f32 1.442695, %v1287_v1 }
 0x371   : > { %v1302_v8 = vmul.f32 1.442695, %v1288_v4  ;;  %v1361_v23 = vmul.f32 %v2635_v14, %v1318_v46 }
 0x372   : > { %v1289_v5 = vsub.f32 0.0, %v1281_v63  ;;  %3026 = vpow2.f32 %v1300_v6 }
 0x373   : > { %3028 = vpow2.f32 %v1298_v7 }
 0x374   : > { %v1328_v53 = vpop.permute.xlu1 %1327  ;;  %v1304_v10 = vmul.f32 1.442695, %v1289_v5  ;;  %3030 = vpow2.f32 %v1302_v8 }
 0x375   : > { %v3019_v11 = vpop.eup %3018  ;;  %v1363_v27 = vmul.f32 %v2635_v14, %v1328_v53 }
 0x376   : > { %v3021_v13 = vpop.eup %3020  ;;  %3032 = vpow2.f32 %v1304_v10  ;;  %v1377_v19 = vmul.f32 %v3019_v11, %v2636_v15 }
 0x377   : > { %v1323_v12 = vpop.permute.xlu0 %1322  ;;  %v3023_v17 = vpop.eup %3022  ;;  %v1376_v26 = vmul.f32 %v3021_v13, %v2636_v15 }
 0x378   : > { %v1333_v2 = vpop.permute.xlu1 %1332  ;;  %v1362_v18 = vmul.f32 %v2635_v14, %v1323_v12  ;;  %v3025_v22 = vpop.eup %3024  ;;  %v1378_v30 = vmul.f32 %v3023_v17, %v2636_v15 }
 0x379   : > { %v1364_v31 = vmul.f32 %v2635_v14, %v1333_v2  ;;  %v1379_v35 = vmul.f32 %v3025_v22, %v2636_v15  ;;  %v1384_v41 = vadd.f32 %v1376_v26, %v1361_v23 }
 0x37a   : > { %v1385_v34 = vadd.f32 %v1377_v19, %v1362_v18  ;;  %v1386_v48 = vadd.f32 %v1378_v30, %v1363_v27 }
 0x37b   : > { %v1387_v51 = vadd.f32 %v1379_v35, %v1364_v31 }
 0x37c   : > { %v1338_v9 = vpop.permute.xlu1 %1337  ;;  %v3027_v37 = vpop.eup %3026 }
 0x37d   : > { %v3029_v42 = vpop.eup %3028  ;;  %v1381_v52 = vmul.f32 %v3027_v37, %v2636_v15  ;;  %v1365_v53 = vmul.f32 %v2635_v14, %v1338_v9 }
 0x37e   : > { %v3031_v45 = vpop.eup %3030  ;;  %v1380_v57 = vmul.f32 %v3029_v42, %v2636_v15 }
 0x37f   : > { %v1382_v61 = vmul.f32 %v3031_v45, %v2636_v15 }
 0x380   : > { %v1343_v16 = vpop.permute.xlu1 %1342  ;;  %v3033_v49 = vpop.eup %3032  ;;  %v1388_v11 = vadd.f32 %v1380_v57, %v1365_v53 }
 0x381   : > { %v1366_v46 = vmul.f32 %v2635_v14, %v1343_v16  ;;  %v1383_v2 = vmul.f32 %v3033_v49, %v2636_v15 }
 0x383   : > { %v1389_v6 = vadd.f32 %v1381_v52, %v1366_v46 }
 0x384   : > { %v1348_v39 = vpop.permute.xlu1 %1347 }
 0x385   : > { %v1367_v62 = vmul.f32 %v2635_v14, %v1348_v39 }
 0x387   : > { %v1390_v19 = vadd.f32 %v1382_v61, %v1367_v62 }
 0x388   : > { %v1353_v63 = vpop.permute.xlu1 %1352 }
 0x389   : > { %v1368_v3 = vmul.f32 %v2635_v14, %v1353_v63 }
 0x38b   : > { %v1391_v27 = vadd.f32 %v1383_v2, %v1368_v3 }
 0x3f2   : > { %v2695_v40 = vpop.f32.mrb[0].mxu0 }
 0x3f3   : > { %v4714_v43 = vadd.f32 %v2695_v40, %v1385_v34  ;;  %v1485_v44 = vpop.f32.mrb[1].mxu0 }
 0x3f4   : > { %v4716_v47 = vadd.f32 %v1485_v44, %v1384_v41 }
 0x3f5   : > { %v1539_v50 = vsel %vm1394_vm1, %v4714_v43, -inf }
 0x3f6   : > { %v1540_v54 = vrot.slane %v1539_v50, 4  ;;  %v1532_v55 = vsel %vm1394_vm1, %v4716_v47, -inf  ;;  %v2698_v56 = vpop.f32.mrb[2].mxu0 }
 0x3f7   : > { %v1533_v58 = vrot.slane %v1532_v55, 4  ;;  %v4722_v59 = vadd.f32 %v2698_v56, %v1387_v51  ;;  %v1495_v60 = vpop.f32.mrb[3].mxu0 }
 0x3f8   : > { %v1541_v0 = vmax.f32 %v1539_v50, %v1540_v54  ;;  %v4724_v1 = vadd.f32 %v1495_v60, %v1386_v48 }
 0x3f9   : > { %v1534_v4 = vmax.f32 %v1532_v55, %v1533_v58  ;;  %v1553_v5 = vsel %vm1394_vm1, %v4722_v59, -inf }
 0x3fa   : > { %v1542_v7 = vrot.slane %v1541_v0, 2  ;;  %v1554_v8 = vrot.slane %v1553_v5, 4  ;;  %v1546_v9 = vsel %vm1394_vm1, %v4724_v1, -inf  ;;  %v2701_v10 = vpop.f32.mrb[4].mxu0 }
 0x3fb   : > { %v1535_v12 = vrot.slane %v1534_v4, 2  ;;  %v1547_v13 = vrot.slane %v1546_v9, 4  ;;  %v4730_v16 = vadd.f32 %v2701_v10, %v1389_v6  ;;  %v1505_v17 = vpop.f32.mrb[5].mxu0 }
 0x3fc   : > { %v1543_v18 = vmax.f32 %v1541_v0, %v1542_v7  ;;  %v1555_v15 = vmax.f32 %v1553_v5, %v1554_v8  ;;  %v1528_v14 = vadd.f32 %v1505_v17, %v1388_v11 }
 0x3fd   : > { %v1536_v22 = vmax.f32 %v1534_v4, %v1535_v12  ;;  %v1548_v23 = vmax.f32 %v1546_v9, %v1547_v13  ;;  %v1567_v26 = vsel %vm1394_vm1, %v4730_v16, -inf }
 0x3fe   : > { %v1544_v30 = vrot.slane %v1543_v18, 1  ;;  %v1556_v31 = vrot.slane %v1555_v15, 2  ;;  %v1568_v34 = vrot.slane %v1567_v26, 4  ;;  %v1560_v35 = vsel %vm1394_vm1, %v1528_v14, -inf  ;;  %v2704_v37 = vpop.f32.mrb[6].mxu0 }
 0x3ff   : > { %v1537_v39 = vrot.slane %v1536_v22, 1  ;;  %v1549_v40 = vrot.slane %v1548_v23, 2  ;;  %v1561_v41 = vrot.slane %v1560_v35, 4  ;;  %v1531_v42 = vadd.f32 %v2704_v37, %v1391_v27  ;;  %v1515_v44 = vpop.f32.mrb[7].mxu0 }
 0x400   : > { %v1545_v45 = vmax.f32 %v1543_v18, %v1544_v30  ;;  %v1557_v48 = vmax.f32 %v1555_v15, %v1556_v31  ;;  %v1569_v49 = vmax.f32 %v1567_v26, %v1568_v34  ;;  %v1530_v46 = vadd.f32 %v1515_v44, %v1390_v19 }
 0x401   : > { %v1538_v50 = vmax.f32 %v1536_v22, %v1537_v39  ;;  %v1550_v51 = vmax.f32 %v1548_v23, %v1549_v40  ;;  %v1562_v52 = vmax.f32 %v1560_v35, %v1561_v41  ;;  %v1581_v53 = vsel %vm1394_vm1, %v1531_v42, -inf }
 0x402   : > { %v1589_v54 = vsub.f32 %v4714_v43, %v1545_v45  ;;  %v1558_v55 = vrot.slane %v1557_v48, 1  ;;  %v1570_v56 = vrot.slane %v1569_v49, 2  ;;  %v1582_v57 = vrot.slane %v1581_v53, 4 }
 0x403   : > { %v1588_v58 = vsub.f32 %v4716_v47, %v1538_v50  ;;  %v1551_v60 = vrot.slane %v1550_v51, 1  ;;  %v1563_v61 = vrot.slane %v1562_v52, 2  ;;  %v1574_v62 = vsel %vm1394_vm1, %v1530_v46, -inf }
 0x404   : > { %v1598_v63 = vmul.f32 1.442695, %v1589_v54  ;;  %v1559_v0 = vmax.f32 %v1557_v48, %v1558_v55  ;;  %v1571_v2 = vmax.f32 %v1569_v49, %v1570_v56  ;;  %v1583_v3 = vmax.f32 %v1581_v53, %v1582_v57 }
 0x405   : > { %v1596_v4 = vmul.f32 1.442695, %v1588_v58  ;;  %v1552_v5 = vmax.f32 %v1550_v51, %v1551_v60  ;;  %v1564_v6 = vmax.f32 %v1562_v52, %v1563_v61  ;;  %v1575_v7 = vrot.slane %v1574_v62, 4 }
 0x406   : > { %3034 = vpow2.f32 %v1598_v63  ;;  %v1591_v43 = vsub.f32 %v4722_v59, %v1559_v0  ;;  %v1572_v8 = vrot.slane %v1571_v2, 1  ;;  %v1584_v9 = vrot.slane %v1583_v3, 2 }
 0x407   : > { %3036 = vpow2.f32 %v1596_v4  ;;  %v1590_v47 = vsub.f32 %v4724_v1, %v1552_v5  ;;  %v1565_v10 = vrot.slane %v1564_v6, 1  ;;  %v1576_v11 = vmax.f32 %v1574_v62, %v1575_v7 }
 0x408   : > { %v1602_v12 = vmul.f32 1.442695, %v1591_v43  ;;  %v1573_v13 = vmax.f32 %v1571_v2, %v1572_v8  ;;  %v1585_v17 = vmax.f32 %v1583_v3, %v1584_v9 }
 0x409   : > { %v1600_v18 = vmul.f32 1.442695, %v1590_v47  ;;  %v1566_v15 = vmax.f32 %v1564_v6, %v1565_v10  ;;  %v1577_v19 = vrot.slane %v1576_v11, 2 }
 0x40a   : > { %3038 = vpow2.f32 %v1602_v12  ;;  %v1593_v22 = vsub.f32 %v4730_v16, %v1573_v13  ;;  %v1586_v23 = vrot.slane %v1585_v17, 1 }
 0x40b   : > { %3040 = vpow2.f32 %v1600_v18  ;;  %v1592_v26 = vsub.f32 %v1528_v14, %v1566_v15  ;;  %v1578_v59 = vmax.f32 %v1576_v11, %v1577_v19 }
 0x40c   : > { %v1606_v27 = vmul.f32 1.442695, %v1593_v22  ;;  %v1587_v30 = vmax.f32 %v1585_v17, %v1586_v23 }
 0x40d   : > { %v1604_v31 = vmul.f32 1.442695, %v1592_v26  ;;  %v1579_v34 = vrot.slane %v1578_v59, 1 }
 0x40e   : > { %3042 = vpow2.f32 %v1606_v27  ;;  %v1595_v1 = vsub.f32 %v1531_v42, %v1587_v30 }
 0x40f   : > { %3044 = vpow2.f32 %v1604_v31  ;;  %v1580_v35 = vmax.f32 %v1578_v59, %v1579_v34 }
 0x410   : > { %v4742_v37 = vpop.eup %3034  ;;  %v1610_v39 = vmul.f32 1.442695, %v1595_v1 }
 0x411   : > { %v4744_v40 = vpop.eup %3036  ;;  %v1619_v16 = vsel %vm1394_vm1, %v4742_v37, 0.0  ;;  %v1594_v41 = vsub.f32 %v1530_v46, %v1580_v35 }
 0x412   : > { %v1620_v44 = vrot.slane %v1619_v16, 4  ;;  %v1612_v14 = vsel %vm1394_vm1, %v4744_v40, 0.0  ;;  %3046 = vpow2.f32 %v1610_v39 }
 0x413   : > { %v1613_v45 = vrot.slane %v1612_v14, 4  ;;  %v1608_v48 = vmul.f32 1.442695, %v1594_v41 }
 0x414   : > { %v4750_v49 = vpop.eup %3038  ;;  %v1621_v42 = vadd.f32 %v1620_v44, %v1619_v16 }
 0x415   : > { %v4752_v50 = vpop.eup %3040  ;;  %v1614_v51 = vadd.f32 %v1613_v45, %v1612_v14  ;;  %v1633_v52 = vsel %vm1394_vm1, %v4750_v49, 0.0  ;;  %3048 = vpow2.f32 %v1608_v48 }
 0x416   : > { %v1622_v53 = vrot.slane %v1621_v42, 2  ;;  %v1634_v54 = vrot.slane %v1633_v52, 4  ;;  %v1626_v46 = vsel %vm1394_vm1, %v4752_v50, 0.0 }
 0x417   : > { %v1615_v55 = vrot.slane %v1614_v51, 2  ;;  %v1627_v56 = vrot.slane %v1626_v46, 4 }
 0x418   : > { %v4758_v57 = vpop.eup %3042  ;;  %v1623_v58 = vadd.f32 %v1622_v53, %v1621_v42  ;;  %v1635_v60 = vadd.f32 %v1634_v54, %v1633_v52 }
 0x419   : > { %v4760_v61 = vpop.eup %3044  ;;  %v1616_v62 = vadd.f32 %v1615_v55, %v1614_v51  ;;  %v1628_v63 = vadd.f32 %v1627_v56, %v1626_v46  ;;  %v1647_v0 = vsel %vm1394_vm1, %v4758_v57, 0.0 }
 0x41a   : > { %v1624_v2 = vrot.slane %v1623_v58, 1  ;;  %v1636_v3 = vrot.slane %v1635_v60, 2  ;;  %v1648_v4 = vrot.slane %v1647_v0, 4  ;;  %v1640_v5 = vsel %vm1394_vm1, %v4760_v61, 0.0 }
 0x41b   : > { %v1617_v6 = vrot.slane %v1616_v62, 1  ;;  %v1629_v7 = vrot.slane %v1628_v63, 2  ;;  %v1641_v43 = vrot.slane %v1640_v5, 4 }
 0x41c   : > { %v4766_v8 = vpop.eup %3046  ;;  %v1625_v9 = vadd.f32 %v1624_v2, %v1623_v58  ;;  %v1637_v47 = vadd.f32 %v1636_v3, %v1635_v60  ;;  %v1649_v10 = vadd.f32 %v1648_v4, %v1647_v0 }
 0x41d   : > { %v1618_v11 = vadd.f32 %v1617_v6, %v1616_v62  ;;  %v1630_v12 = vadd.f32 %v1629_v7, %v1628_v63  ;;  %v1642_v13 = vadd.f32 %v1641_v43, %v1640_v5  ;;  %v1661_v17 = vsel %vm1394_vm1, %v4766_v8, 0.0 }
 0x41e   : > { %3050 = vrcp.f32 %v1625_v9  ;;  %v1638_v18 = vrot.slane %v1637_v47, 1  ;;  %v1650_v15 = vrot.slane %v1649_v10, 2  ;;  %v1662_v19 = vrot.slane %v1661_v17, 4 }
 0x41f   : > { %v4770_v22 = vpop.eup %3048  ;;  %3052 = vrcp.f32 %v1618_v11  ;;  %v1631_v23 = vrot.slane %v1630_v12, 1  ;;  %v1643_v26 = vrot.slane %v1642_v13, 2 }
 0x420   : > { %v1639_v59 = vadd.f32 %v1638_v18, %v1637_v47  ;;  %v1651_v27 = vadd.f32 %v1650_v15, %v1649_v10  ;;  %v1663_v30 = vadd.f32 %v1662_v19, %v1661_v17  ;;  %v1654_v31 = vsel %vm1394_vm1, %v4770_v22, 0.0 }
 0x421   : > { %v1632_v34 = vadd.f32 %v1631_v23, %v1630_v12  ;;  %v1644_v1 = vadd.f32 %v1643_v26, %v1642_v13  ;;  %v1655_v35 = vrot.slane %v1654_v31, 4 }
 0x422   : > { %3054 = vrcp.f32 %v1639_v59  ;;  %v1652_v39 = vrot.slane %v1651_v27, 1  ;;  %v1664_v16 = vrot.slane %v1663_v30, 2 }
 0x423   : > { %3056 = vrcp.f32 %v1632_v34  ;;  %v1645_v41 = vrot.slane %v1644_v1, 1  ;;  %v1656_v44 = vadd.f32 %v1655_v35, %v1654_v31 }
 0x424   : > { %v1653_v14 = vadd.f32 %v1652_v39, %v1651_v27  ;;  %v1665_v45 = vadd.f32 %v1664_v16, %v1663_v30 }
 0x425   : > { %v1646_v48 = vadd.f32 %v1645_v41, %v1644_v1  ;;  %v1657_v42 = vrot.slane %v1656_v44, 2 }
 0x426   : > { %3058 = vrcp.f32 %v1653_v14  ;;  %v1666_v51 = vrot.slane %v1665_v45, 1 }
 0x427   : > { %3060 = vrcp.f32 %v1646_v48  ;;  %v1658_v52 = vadd.f32 %v1657_v42, %v1656_v44 }
 0x428   : > { %v3051_v53 = vpop.eup %3050  ;;  %v1667_v54 = vadd.f32 %v1666_v51, %v1665_v45 }
 0x429   : > { %v3053_v46 = vpop.eup %3052  ;;  %v1677_v55 = vmul.f32 %v3051_v53, %v4742_v37  ;;  %v1659_v56 = vrot.slane %v1658_v52, 1 }
 0x42a   : > { %v1676_v58 = vmul.f32 %v3053_v46, %v4744_v40  ;;  %3062 = vrcp.f32 %v1667_v54 }
 0x42b   : > { %v1685_v60 = vmul.f32 %v1677_v55, %v4673_v24  ;;  %v1660_v62 = vadd.f32 %v1659_v56, %v1658_v52 }
 0x42c   : > { %v3055_v63 = vpop.eup %3054  ;;  %v1684_v0 = vmul.f32 %v1676_v58, %v4663_v20 }
 0x42d   : > { %v3057_v2 = vpop.eup %3056  ;;  %v1699_v3 = vsel %vm1394_vm1, %v1685_v60, 0.0  ;;  %v1679_v4 = vmul.f32 %v3055_v63, %v4750_v49  ;;  %3064 = vrcp.f32 %v1660_v62 }
 0x42e   : > { %v1700_v5 = vrot.slane %v1699_v3, 4  ;;  %v1692_v6 = vsel %vm1394_vm1, %v1684_v0, 0.0  ;;  %v1678_v37 = vmul.f32 %v3057_v2, %v4752_v50 }
 0x42f   : > { %v1693_v7 = vrot.slane %v1692_v6, 4  ;;  %v1687_v40 = vmul.f32 %v1679_v4, %v4681_v25 }
 0x430   : > { %v3059_v43 = vpop.eup %3058  ;;  %v1701_v24 = vadd.f32 %v1700_v5, %v1699_v3  ;;  %v1686_v9 = vmul.f32 %v1678_v37, %v4669_v21 }
 0x431   : > { %v3061_v47 = vpop.eup %3060  ;;  %v1694_v20 = vadd.f32 %v1693_v7, %v1692_v6  ;;  %v1713_v10 = vsel %vm1394_vm1, %v1687_v40, 0.0  ;;  %v1681_v11 = vmul.f32 %v3059_v43, %v4758_v57 }
 0x432   : > { %v1702_v49 = vrot.slane %v1701_v24, 2  ;;  %v1714_v12 = vrot.slane %v1713_v10, 4  ;;  %v1706_v13 = vsel %vm1394_vm1, %v1686_v9, 0.0  ;;  %v1680_v17 = vmul.f32 %v3061_v47, %v4760_v61 }
 0x433   : > { %v1695_v50 = vrot.slane %v1694_v20, 2  ;;  %v1707_v18 = vrot.slane %v1706_v13, 4  ;;  %v1689_v25 = vmul.f32 %v1681_v11, %v4690_v29 }
 0x434   : > { %v3063_v15 = vpop.eup %3062  ;;  %v1703_v19 = vadd.f32 %v1702_v49, %v1701_v24  ;;  %v1715_v23 = vadd.f32 %v1714_v12, %v1713_v10  ;;  %v1688_v21 = vmul.f32 %v1680_v17, %v4685_v28  ;;  %v1852_v17 = vld [vmem:[#allocation22] sm:$0xff] }
 0x435   : > { %v1696_v26 = vadd.f32 %v1695_v50, %v1694_v20  ;;  %v1708_v59 = vadd.f32 %v1707_v18, %v1706_v13  ;;  %v1683_v57 = vmul.f32 %v3063_v15, %v4766_v8  ;;  %v1727_v27 = vsel %vm1394_vm1, %v1689_v25, 0.0  ;;  %v1853_v50 = vld [vmem:[#allocation22 + $0x8] sm:$0xff]  ;;  %v2042_v25 = vld [vmem:[#allocation31] sm:$0xff] }
 0x436   : > { %v1720_v30 = vsel %vm1394_vm1, %v1688_v21, 0.0  ;;  %v1704_v31 = vrot.slane %v1703_v19, 1  ;;  %v1716_v61 = vrot.slane %v1715_v23, 2  ;;  %v1728_v34 = vrot.slane %v1727_v27, 4  ;;  %v2043_v15 = vld [vmem:[#allocation31 + $0x8] sm:$0xff] }
 0x437   : > { %v3065_v1 = vpop.eup %3064  ;;  %v1709_v35 = vrot.slane %v1708_v59, 2  ;;  %v1721_v29 = vrot.slane %v1720_v30, 4  ;;  %v1691_v39 = vmul.f32 %v1683_v57, %v4701_v33  ;;  %v1697_v16 = vrot.slane %v1696_v26, 1 }
 0x438   : > { %v1682_v28 = vmul.f32 %v3065_v1, %v4770_v22  ;;  %v1705_v41 = vadd.f32 %v1704_v31, %v1703_v19  ;;  %v1717_v44 = vadd.f32 %v1716_v61, %v1715_v23  ;;  %v1729_v14 = vadd.f32 %v1728_v34, %v1727_v27  ;;  %v2645_v23 = vld [vmem:[#allocation20] ss:$0 sm:$0xff]  ;;  %v1935_v27 = vld [vmem:[#allocation25] sm:$0x7]  ;;  %v2039_v31 = vld [vmem:[#allocation29 + $0x8] sm:$0xff] }
 0x439   : > { %v1698_v45 = vadd.f32 %v1697_v16, %v1696_v26  ;;  %v1710_v8 = vadd.f32 %v1709_v35, %v1708_v59  ;;  %v1722_v48 = vadd.f32 %v1721_v29, %v1720_v30  ;;  %v1741_v42 = vsel %vm1394_vm1, %v1691_v39, 0.0  ;;  %v2038_v30 = vld [vmem:[#allocation29] sm:$0xff]  ;;  %v2040_v1 = vld [vmem:[#allocation29 + $0x10] sm:$0xff]  ;;  %v2041_v35 = vld [vmem:[#allocation29 + $0x18] sm:$0xff] }
 0x43a   : > { %v1690_v51 = vmul.f32 %v1682_v28, %v4696_v32  ;;  %v1718_v52 = vrot.slane %v1717_v44, 1  ;;  %v1730_v53 = vrot.slane %v1729_v14, 2  ;;  %v1742_v54 = vrot.slane %v1741_v42, 4  ;;  %v1934_v61 = vld [vmem:[%s934_s3] sm:$0xff]  ;;  %v2044_v39 = vld [vmem:[#allocation31 + $0x10] sm:$0xff]  ;;  %v2045_v16 = vld [vmem:[#allocation31 + $0x18] sm:$0xff] }
 0x43b   : > { %v1711_v46 = vrot.slane %v1710_v8, 1  ;;  %v1723_v55 = vrot.slane %v1722_v48, 2  ;;  %v1766_v33 = vsel %vm1765_vm3, %v1705_v41, %v1698_v45  ;;  %v2754_v18 = vpack.c.bf16 %v1853_v50, %v1852_v17  ;;  %v2647_v41 = vld [vmem:[#allocation23] ss:$0 sm:$0xff] }
 0x43c   : > { %v1731_v56 = vadd.f32 %v1730_v53, %v1729_v14  ;;  %v1734_v22 = vsel %vm1394_vm1, %v1690_v51, 0.0  ;;  %v1743_v58 = vadd.f32 %v1742_v54, %v1741_v42  ;;  %v1719_v0 = vadd.f32 %v1718_v52, %v1717_v44  ;;  %v2649_v44 = vld [vmem:[#allocation26] ss:$0 sm:$0xff]  ;;  %v1941_v14 = vpop.permute.xlu1 %1940  ;;  %v2652_v52 = vld [vmem:[#allocation28] ss:$0 sm:$0xff] }
 0x43d   : > { %v1712_v60 = vadd.f32 %v1711_v46, %v1710_v8  ;;  %v1724_v62 = vadd.f32 %v1723_v55, %v1722_v48  ;;  %v1735_v63 = vrot.slane %v1734_v22, 4  ;;  %v2757_v19 = vpack.c.bf16 %v2043_v15, %v2042_v25  ;;  %v2036_v8 = vld [vmem:[%s943_s15] sm:$0xff] }
 0x43e   : > { %v1732_v2 = vrot.slane %v1731_v56, 1  ;;  %v1744_v3 = vrot.slane %v1743_v58, 2  ;;  %v2763_v34 = vpack.c.bf16 %v2039_v31, %v2038_v30  ;;  %v2766_v29 = vpack.c.bf16 %v2041_v35, %v2040_v1 }
 0x43f   : > { %v1725_v32 = vrot.slane %v1724_v62, 1  ;;  %v1736_v4 = vadd.f32 %v1735_v63, %v1734_v22  ;;  %v1768_v5 = vsel %vm1767_vm4, %v1712_v60, %v1766_v33  ;;  %2758 = vmatpush3.bf16.msra.mxu0 %v2757_v19  ;;  %v2760_v28 = vpack.c.bf16 %v2045_v16, %v2044_v39  ;;  %v2655_v22 = vld [vmem:[#allocation32] ss:$0 sm:$0xff] }
 0x440   : > { %v1745_v6 = vadd.f32 %v1744_v3, %v1743_v58  ;;  %v1770_v37 = vsel %vm1769_vm5, %v1719_v0, %v1768_v5  ;;  %v1733_v43 = vadd.f32 %v1732_v2, %v1731_v56  ;;  %2759 = vmatprep.subr.bf16.mxu0 %v3805_v36 }
 0x441   : > { %v1726_v7 = vadd.f32 %v1725_v32, %v1724_v62  ;;  %v1737_v40 = vrot.slane %v1736_v4, 2 }
 0x442   : > { %v1746_v47 = vrot.slane %v1745_v6, 1 }
 0x443   : > { %v1738_v24 = vadd.f32 %v1737_v40, %v1736_v4  ;;  %v1772_v9 = vsel %vm1771_vm6, %v1726_v7, %v1770_v37  ;;  %2761 = vmatpush3.bf16.msra.mxu0 %v2760_v28 }
 0x444   : > { %v1774_v20 = vsel %vm1773_vm7, %v1733_v43, %v1772_v9  ;;  %v1747_v49 = vadd.f32 %v1746_v47, %v1745_v6 }
 0x445   : > { %v1739_v10 = vrot.slane %v1738_v24, 1 }
 0x447   : > { %v1740_v11 = vadd.f32 %v1739_v10, %v1738_v24 }
 0x449   : > { %v1776_v12 = vsel %vm1775_vm8, %v1740_v11, %v1774_v20 }
 0x44a   : > { %v1778_v13 = vsel %vm1777_vm9, %v1747_v49, %v1776_v12 }
 0x44b   : > { %2710 = vmatmul.mubr.msk.f32.vlgmr.msra.gmra.mrb[0].mxu1 %vm1394_vm1, %v1778_v13 }
 0x44c   : > { %2716 = vmatprep.mubr.msk.f32.mxu1 %vm3806_vm2, %v3807_v38  ;;  %2755 = vmatpush3.bf16.msra.mxu1 %v2754_v18 }
 0x44d   : > { %2719 = vmatprep.subr.mxu1 %v3807_v38 }
 0x51e   : > { %v1847_v21 = vpop.f32.mrb[0].mxu1 }
 0x51f   : > { %v1848_v26 = vadd.f32 %v2645_v23, %v1847_v21  ;;  %v2711_v59 = vpop.f32.mrb[1].mxu1 }
 0x521   : > { %v1851_v57 = vmax.f32 %v1848_v26, 0.0 }
 0x523   : > { %2717 = vmatmul.mubr.msk.f32.vlgmr.msra.gmra.mrb[2].mxu1 %vm1394_vm1, %v1851_v57 }
 0x524   : > { %2720 = vmatpush3.msk.msra.mxu1 %vm1954_vm10, %v1935_v27  ;;  %2721 = vmatprep.mubr.msk.f32.mxu1 %vm3806_vm2, %v3807_v38 }
 0x525   : > { %2762 = vmatprep.subr.bf16.mxu1 %v3805_v36 }
 0x527   : > { %2722 = vmatmul.mubr.msk.f32.vlgmr.msra.gmra.mrb[4].mxu1 %vm1950_vm11, %v1934_v61 }
 0x528   : > { %2764 = vmatpush3.bf16.msra.mxu1 %v2763_v34  ;;  %2743 = vmatprep.mubr.msk.f32.mxu1 %vm3806_vm2, %v3807_v38 }
 0x529   : > { %2765 = vmatprep.subr.bf16.mxu1 %v3805_v36  ;;  %v1949_v36 = vmul.f32 %v2649_v44, %v1941_v14 }
 0x52c   : > { %2767 = vmatpush3.bf16.msra.mxu1 %v2766_v29 }
 0x5f6   : > { %v1930_v45 = vpop.f32.mrb[2].mxu1 }
 0x5f7   : > { %v1931_v48 = vadd.f32 %v2647_v41, %v1930_v45  ;;  %v2718_v38 = vpop.f32.mrb[3].mxu1 }
 0x5f9   : > { %v2037_v42 = vadd.f32 %v2036_v8, %v1931_v48 }
 0x5fa   : > { %v2024_v51 = vpop.f32.mrb[4].mxu1 }
 0x5fb   : > { %v2025_v53 = vadd.f32 %v2024_v51, %v1949_v36  ;;  %v2723_v54 = vpop.f32.mrb[5].mxu1  ;;  %2744 = vmatmul.mubr.msk.f32.vlgmr.msra.gmra.mrb[6].mxu1 %vm2046_vm12, %v2037_v42 }
 0x5fd   : > { %v2035_v46 = vadd.f32 %v2652_v52, %v2025_v53 }
 0x5ff   : > { %2733 = vmatmul.mubr.msk.f32.vlgmr.msra.gmra.mrb[8].mxu0 %vm2046_vm12, %v2035_v46 }
 0x6ce   : > { %v2189_v55 = vpop.f32.mrb[6].mxu1 }
 0x6cf   : > { %v2745_v33 = vpop.f32.mrb[7].mxu1 }
 0x6d2   : > { %v2116_v56 = vpop.f32.mrb[8].mxu0 }
 0x6d3   : > { %v2190_v58 = vadd.f32 %v2189_v55, %v2116_v56  ;;  %v2734_v60 = vpop.f32.mrb[9].mxu0 }
 0x6d5   : > { %v2200_v62 = vadd.f32 %v2655_v22, %v2190_v58 }
 0x6d7   : > { %v2201_v63 = vmax.f32 %v2200_v62, 0.0 }
 0x6d9   : > { %2202 = vst.msk [vmem:[%s1081_s7] sm:$0xff] %vm2046_vm12, %v2201_v63 }
 0x6da   : > { %3653 = shalt.err (!%p3650_p6)
}
 0x6db   : > { %s3654_s4 = scalar_lea.hbm %s4823_s1, 128  ;;  %s3658_s3 = scalar_lea.hbm %s5052_s29, 512 }
 0x6dc   : > { %p3655_p11 = scmp.ne.s32.totalorder %s4823_s1, %s3654_s4  ;;  %p3659_p3 = scmp.lt.u32.totalorder %s4823_s1, %s5052_s29 }
 0x6dd   : > { %p3660_p4 = scmp.lt.u32.totalorder %s3658_s3, %s3654_s4  ;;  %p3662_p10 = scmp.lt.u32.totalorder %s3654_s4, %s4823_s1 }
 0x6de   : > { %p3656_p2 = pnand %p3655_p11, %p5053_p8 }
 0x6df   : > { %p3661_p12 = por %p3660_p4, %p3659_p3 }
 0x6e0   : > { %p3657_p1 = pneg %p3656_p2 }
 0x6e1   : > { %p3663_p5 = por %p3662_p10, %p3661_p12 }
 0x6e3   : > { %p3664_p0 = pnand %p3663_p5, %p3657_p1 }
 0x6e5   : > { %3667 = shalt.err (!%p3664_p0)
}
 0x6e6   : > { %2834 = dma.vmem_to_hbm [thread:$0]  (%p5053_p8), %s4825_s21, 128, %s4823_s1, %s2204_s30  }
 0x6e7 PF: > { %s5054_s10 = sld [smem:[#allocation52_spill]]  ;;  %s5055_s19 = sld [smem:[#allocation47_spill]] }
 0x6e8   : > { %s5056_s16 = sld [smem:[#allocation59_spill]] }
 0x6ed   : > { %p2929_p9 = scmp.ge.s32.totalorder %s5054_s10, 2  ;;  %s2231_s6 = sand.u32 1, %s5055_s19  }
 0x6ee   : > { %p5057_p7 = scmp.ne.s32.totalorder %s5056_s16, 0  ;;  %s2232_s0 = scalar_lea.sflag [#allocation4], %s2231_s6 }
 0x6f0   : > { %p2899_p13 = pnand %p2929_p9, %p5057_p7 }
 0x6f2   : > { %3745 = dma.done.wait (!%p2899_p13), %s2232_s0, 128  }
 0x6f3   : > { %3747 = vsyncadd (!%p2899_p13), %s2232_s0, 4294967168  ;;  %s52_s26 = sadd.s32 1, %s5054_s10   ;;  %s5058_s7 = sld [smem:[#allocation48_spill]] }
 0x6f4   : > { %p49_p6 = scmp.ge.s32.totalorder %s52_s26, 6   ;;  %s5059_s23 = sld [smem:[#allocation60_spill]] }
 0x6f5   : > { %s5060_s2 = sld [smem:[#allocation51_spill]]  ;;  %s5061_s21 = sld [smem:[#allocation55_spill]] }
 0x6f6   : > { %s5062_s3 = sld [smem:[#allocation56_spill]]  ;;  %s5063_s1 = smov %s3754_s22 }
 0x6f7   : > { %s5065_s24 = smov %s3770_s25  ;;  %51 = sbr.rel (!%p49_p6) target bundleno = 42 (0x2a), region = 269 }
 0x6f9   : > { %s5064_s22 = smov %s5058_s7 }
 0x6fb   : > { %s5066_s25 = smov %s5061_s21 }
 0x6fe   :  { %2237 = vsyncpa [#allocation3], 1 }
 0x6ff   :  { %2239 = vsyncpa [#allocation3 + $0x1], 1 }
 0x700   :  { %2240 = vsyncpa [#allocation6], 1 }
 0x701   :  { %2242 = vsyncpa [#allocation6 + $0x1], 1 }
 0x702   :  { %2243 = vsyncpa [#allocation9], 1 }
 0x703   :  { %2245 = vsyncpa [#allocation9 + $0x1], 1 }
 0x704   :  { %2246 = vsyncpa [#allocation12], 1 }
 0x705   :  { %2248 = vsyncpa [#allocation12 + $0x1], 1 }
 0x706   :  { %2249 = vsyncpa [#allocation15], 1 }
 0x707   :  { %2250 = vsyncpa [#allocation18], 1 }
 0x708   :  { %2251 = vsyncpa [#allocation21], 1 }
 0x709   :  { %2252 = vsyncpa [#allocation24], 1 }
 0x70a   :  { %2253 = vsyncpa [#allocation27], 1 }
 0x70b   :  { %2254 = vsyncpa [#allocation30], 1 }
 0x70c   :  { %2255 = vsyncpa [#allocation33], 1 }
 0x70d   :  { %2256 = vsyncpa [#allocation4], 1 }
 0x70e   :  { %2258 = vsyncpa [#allocation4 + $0x1], 1 }

</bundles_post_ra>
